<compile_context>
chip_gen: v7x
topology: tpu7x:2x2x1
jax: 0.10.0
libtpu: 0.0.40
codegen_flags: <defaults>
</compile_context>

<pallas_src>
import math
from functools import partial

import jax
import jax.numpy as jnp
from jax.experimental import pallas as pl
from jax.experimental.pallas import tpu as pltpu

# ----------------------------- "args" config --------------------------------
BATCH = 2
SEQ = 8
HIDDEN = 48            # hidden_dim  (divisible by 3 and by n_heads)
N_LAYERS = 1           # LSTM layers
N_HEADS = 4
N_TEST = 10
N_QUESTIONS = 20
N_TAG = 5
EMB = HIDDEN // 3      # 16
LN_EPS = 1e-12         # BertConfig.layer_norm_eps


# ------------------------- shared math helpers -------------------------------
def _erf_approx(x):
    # Abramowitz & Stegun 7.1.26 polynomial erf (max abs err ~1.5e-7),
    # built from exp only so it lowers cleanly in Mosaic.
    a1, a2, a3, a4, a5 = 0.254829592, -0.284496736, 1.421413741, -1.453152027, 1.061405429
    p = 0.3275911
    sgn = jnp.where(x >= 0.0, 1.0, -1.0)
    ax = jnp.abs(x)
    t = 1.0 / (1.0 + p * ax)
    poly = ((((a5 * t + a4) * t + a3) * t + a2) * t + a1) * t
    y = 1.0 - poly * jnp.exp(-ax * ax)
    return sgn * y


def _gelu(x):
    # exact (erf-based) GELU, matching BERT's "gelu"
    return 0.5 * x * (1.0 + _erf_approx(x * (1.0 / math.sqrt(2.0))))


def _layernorm(x, g, b):
    mu = jnp.mean(x, axis=-1, keepdims=True)
    var = jnp.mean((x - mu) ** 2, axis=-1, keepdims=True)
    return (x - mu) * jax.lax.rsqrt(var + LN_EPS) * g + b


# ------------------------------ fused kernel ---------------------------------
def fused_lstmattn_kernel(
    embed_ref, mask_ref,
    comb_w_ref, comb_b_ref,
    wih_ref, whh_ref, bg_ref,
    wq_ref, bq_ref, wk_ref, bk_ref, wv_ref, bv_ref, wo_ref, bo_ref,
    ln1_g_ref, ln1_b_ref,
    wi_ref, bi_ref, wf_ref, bf_ref,
    ln2_g_ref, ln2_b_ref,
    fcw_ref, fcb_ref,
    out_ref,
    seq_scr,
    *, batch, seq, hidden, n_heads, n_layers,
):
    B, S, H = batch, seq, hidden
    NH = n_heads
    DH = H // NH
    scale = 1.0 / math.sqrt(DH)

    # ------------------------------ comb_proj --------------------------------
    # embed_ref: [S*B, 4*EMB], time-major rows (row = t*B + b)
    cur = (
        jnp.dot(embed_ref[...], comb_w_ref[...], preferred_element_type=jnp.float32)
        + comb_b_ref[...]
    )                                                            # [S*B, H]

    # -------------------------------- LSTM -----------------------------------
    for l in range(n_layers):
        # hoist loop-invariant weight reads (once per layer, not per step)
        whh = [whh_ref[4 * l + g] for g in range(4)]             # 4 x [H, H]
        # hoisted input projection + folded bias: one matmul per gate over the
        # whole sequence, off the serial recurrence path.
        xp = [
            jnp.dot(cur, wih_ref[4 * l + g], preferred_element_type=jnp.float32)
            + bg_ref[4 * l + g]
            for g in range(4)
        ]                                                        # 4 x [S*B, H]

        h = jnp.zeros((B, H), jnp.float32)
        c = jnp.zeros((B, H), jnp.float32)
        hs = []
        for t in range(S):                                       # fully unrolled
            r = t * B                                            # static offsets
            i_g = jax.nn.sigmoid(xp[0][r:r + B, :] + jnp.dot(h, whh[0], preferred_element_type=jnp.float32))
            f_g = jax.nn.sigmoid(xp[1][r:r + B, :] + jnp.dot(h, whh[1], preferred_element_type=jnp.float32))
            g_g = jnp.tanh(xp[2][r:r + B, :] + jnp.dot(h, whh[2], preferred_element_type=jnp.float32))
            o_g = jax.nn.sigmoid(xp[3][r:r + B, :] + jnp.dot(h, whh[3], preferred_element_type=jnp.float32))
            c = f_g * c + i_g * g_g
            h = o_g * jnp.tanh(c)
            if l == n_layers - 1:
                # store batch-major rows (row = b*S + t) for the encoder;
                # static single-sublane block stores (off the serial chain).
                for b in range(B):
                    seq_scr[b * S + t:b * S + t + 1, :] = h[b:b + 1, :]
            else:
                hs.append(h)
        if l < n_layers - 1:
            cur = jnp.concatenate(hs, axis=0)                    # [S*B, H] time-major

    # ------------------------ BERT encoder (1 layer) --------------------------
    x2d = seq_scr[...]                                           # [B*S, H], batch-major
    mask_b = ((1.0 - mask_ref[...]) * -10000.0)[:, None, :]      # [B, 1, S_key]

    attn = bo_ref[...]                                           # output bias, accumulated into
    for hd in range(NH):                                         # per-head blocks, no lane slicing
        qh = (jnp.dot(x2d, wq_ref[hd], preferred_element_type=jnp.float32) + bq_ref[hd]).reshape(B, S, DH)
        kh = (jnp.dot(x2d, wk_ref[hd], preferred_element_type=jnp.float32) + bk_ref[hd]).reshape(B, S, DH)
        vh = (jnp.dot(x2d, wv_ref[hd], preferred_element_type=jnp.float32) + bv_ref[hd]).reshape(B, S, DH)
        sc = jnp.einsum('bqd,bkd->bqk', qh, kh, preferred_element_type=jnp.float32) * scale + mask_b
        m = jnp.max(sc, axis=-1, keepdims=True)
        e = jnp.exp(sc - m)
        probs = e * pl.reciprocal(jnp.sum(e, axis=-1, keepdims=True), approx=True)
        ctx = jnp.einsum('bqk,bkd->bqd', probs, vh, preferred_element_type=jnp.float32).reshape(B * S, DH)
        attn = attn + jnp.dot(ctx, wo_ref[hd], preferred_element_type=jnp.float32)

    x1 = _layernorm(attn + x2d, ln1_g_ref[...], ln1_b_ref[...])
    inter = _gelu(jnp.dot(x1, wi_ref[...], preferred_element_type=jnp.float32) + bi_ref[...])
    ffn = jnp.dot(inter, wf_ref[...], preferred_element_type=jnp.float32) + bf_ref[...]
    x2 = _layernorm(ffn + x1, ln2_g_ref[...], ln2_b_ref[...])

    # ---------------- fc (H -> 1) as a lane reduction, emit [B, S] ------------
    x3 = x2.reshape(B, S, H)
    out_ref[...] = jnp.sum(x3 * fcw_ref[...], axis=-1) + fcb_ref[...]


# ------------------------- wrapper (weight re-layout) -------------------------
def _pack_head_cols(w):      # [H, H] -> [NH, H, DH] per-head column blocks
    return w.reshape(HIDDEN, N_HEADS, HIDDEN // N_HEADS).transpose(1, 0, 2)


def _pack_head_bias(b):      # [1, H] -> [NH, 1, DH]
    return b.reshape(1, N_HEADS, HIDDEN // N_HEADS).transpose(1, 0, 2)


@jax.jit
def lstmattn_forward(params, test, question, tag, mask, interaction):
    B, S = interaction.shape
    p = params
    H, NH, DH = HIDDEN, N_HEADS, HIDDEN // N_HEADS

    # Embedding gathers in time-major order: the in-kernel LSTM then consumes
    # contiguous [B, H] row blocks per step and no activation transpose exists.
    tT, qT, gT, iT = test.T, question.T, tag.T, interaction.T
    embed = jnp.concatenate(
        [p['emb_interaction'][iT], p['emb_test'][tT],
         p['emb_question'][qT], p['emb_tag'][gT]],
        axis=-1,
    ).reshape(S * B, 4 * EMB)                                    # row = t*B + b

    # One-time weight re-layouts: per-gate LSTM blocks, per-head attention blocks.
    wih = jnp.concatenate(
        [p[f'lstm_wih_{l}'].reshape(H, 4, H).transpose(1, 0, 2) for l in range(N_LAYERS)], axis=0)
    whh = jnp.concatenate(
        [p[f'lstm_whh_{l}'].reshape(H, 4, H).transpose(1, 0, 2) for l in range(N_LAYERS)], axis=0)
    bg = jnp.concatenate(
        [p[f'lstm_b_{l}'].reshape(1, 4, H).transpose(1, 0, 2) for l in range(N_LAYERS)], axis=0)

    args = (
        embed, mask.astype(jnp.float32),
        p['comb_w'], p['comb_b'],
        wih, whh, bg,
        _pack_head_cols(p['wq']), _pack_head_bias(p['bq']),
        _pack_head_cols(p['wk']), _pack_head_bias(p['bk']),
        _pack_head_cols(p['wv']), _pack_head_bias(p['bv']),
        p['wo'].reshape(NH, DH, H), p['bo'],
        p['ln1_g'], p['ln1_b'],
        p['wi'], p['bi'], p['wf'], p['bf'],
        p['ln2_g'], p['ln2_b'],
        p['fc_w'].reshape(1, 1, H), p['fc_b'],
    )

    vmem = pl.BlockSpec(memory_space=pltpu.MemorySpace.VMEM)
    kernel = partial(
        fused_lstmattn_kernel,
        batch=B, seq=S, hidden=H, n_heads=NH, n_layers=N_LAYERS,
    )
    # Single grid-less call: total weights + activations are ~200 KB, far under
    # the VMEM budget on v5e/v6e/v7x.  (At production sizes a batch/query-tile
    # grid with dimension_semantics=("parallel",...) should be added.)
    return pl.pallas_call(
        kernel,
        out_shape=jax.ShapeDtypeStruct((B, S), jnp.float32),
        in_specs=[vmem] * len(args),
        out_specs=vmem,
        scratch_shapes=[pltpu.VMEM((B * S, H), jnp.float32)],
    )(*args)


# ------------------------------ parameters -----------------------------------
def init_params(key):
    keys = jax.random.split(key, 40)

    def nrm(k, shape, scale=0.05):
        return (scale * jax.random.normal(k, shape)).astype(jnp.float32)

    p = {}
    p['emb_interaction'] = nrm(keys[0], (3, EMB), 1.0)
    p['emb_test'] = nrm(keys[1], (N_TEST + 1, EMB), 1.0)
    p['emb_question'] = nrm(keys[2], (N_QUESTIONS + 1, EMB), 1.0)
    p['emb_tag'] = nrm(keys[3], (N_TAG + 1, EMB), 1.0)

    p['comb_w'] = nrm(keys[4], (4 * EMB, HIDDEN))
    p['comb_b'] = nrm(keys[5], (1, HIDDEN))

    for l in range(N_LAYERS):
        in_dim = HIDDEN  # layer 0 input is HIDDEN (output of comb_proj)
        p[f'lstm_wih_{l}'] = nrm(keys[6 + 3 * l], (in_dim, 4 * HIDDEN))
        p[f'lstm_whh_{l}'] = nrm(keys[7 + 3 * l], (HIDDEN, 4 * HIDDEN))
        p[f'lstm_b_{l}'] = nrm(keys[8 + 3 * l], (1, 4 * HIDDEN))  # b_ih + b_hh folded

    p['wq'] = nrm(keys[20], (HIDDEN, HIDDEN)); p['bq'] = nrm(keys[21], (1, HIDDEN))
    p['wk'] = nrm(keys[22], (HIDDEN, HIDDEN)); p['bk'] = nrm(keys[23], (1, HIDDEN))
    p['wv'] = nrm(keys[24], (HIDDEN, HIDDEN)); p['bv'] = nrm(keys[25], (1, HIDDEN))
    p['wo'] = nrm(keys[26], (HIDDEN, HIDDEN)); p['bo'] = nrm(keys[27], (1, HIDDEN))
    p['ln1_g'] = jnp.ones((1, HIDDEN), jnp.float32)
    p['ln1_b'] = jnp.zeros((1, HIDDEN), jnp.float32)
    p['wi'] = nrm(keys[28], (HIDDEN, HIDDEN)); p['bi'] = nrm(keys[29], (1, HIDDEN))
    p['wf'] = nrm(keys[30], (HIDDEN, HIDDEN)); p['bf'] = nrm(keys[31], (1, HIDDEN))
    p['ln2_g'] = jnp.ones((1, HIDDEN), jnp.float32)
    p['ln2_b'] = jnp.zeros((1, HIDDEN), jnp.float32)

    p['fc_w'] = nrm(keys[32], (HIDDEN, 1))
    p['fc_b'] = nrm(keys[33], (1, 1))
    return p


# ------------------------- pure-JAX reference ----------------------------------
def reference_forward(params, test, question, tag, mask, interaction):
    B, S = interaction.shape
    p = params
    embed = jnp.concatenate(
        [p['emb_interaction'][interaction], p['emb_test'][test],
         p['emb_question'][question], p['emb_tag'][tag]], axis=2)
    X = (embed.reshape(B * S, -1) @ p['comb_w'] + p['comb_b']).reshape(B, S, HIDDEN)

    out = X
    for l in range(N_LAYERS):
        w_ih, w_hh, b = p[f'lstm_wih_{l}'], p[f'lstm_whh_{l}'], p[f'lstm_b_{l}']
        h = jnp.zeros((B, HIDDEN)); c = jnp.zeros((B, HIDDEN))
        ys = []
        for t in range(S):
            gates = out[:, t, :] @ w_ih + h @ w_hh + b
            i_g = jax.nn.sigmoid(gates[:, :HIDDEN])
            f_g = jax.nn.sigmoid(gates[:, HIDDEN:2 * HIDDEN])
            g_g = jnp.tanh(gates[:, 2 * HIDDEN:3 * HIDDEN])
            o_g = jax.nn.sigmoid(gates[:, 3 * HIDDEN:])
            c = f_g * c + i_g * g_g
            h = o_g * jnp.tanh(c)
            ys.append(h)
        out = jnp.stack(ys, axis=1)

    x2d = out.reshape(B * S, HIDDEN)
    mask_add = (1.0 - mask) * -10000.0
    q = (x2d @ p['wq'] + p['bq']).reshape(B, S, HIDDEN)
    k = (x2d @ p['wk'] + p['bk']).reshape(B, S, HIDDEN)
    v = (x2d @ p['wv'] + p['bv']).reshape(B, S, HIDDEN)
    dH = HIDDEN // N_HEADS
    ctxs = []
    for hh in range(N_HEADS):
        qh = q[:, :, hh * dH:(hh + 1) * dH]
        kh = k[:, :, hh * dH:(hh + 1) * dH]
        vh = v[:, :, hh * dH:(hh + 1) * dH]
        sc = jnp.einsum('bqd,bkd->bqk', qh, kh) / math.sqrt(dH) + mask_add[:, None, :]
        pr = jax.nn.softmax(sc, axis=-1)
        ctxs.append(jnp.einsum('bqk,bkd->bqd', pr, vh))
    ctx = jnp.concatenate(ctxs, axis=-1).reshape(B * S, HIDDEN)
    attn_out = ctx @ p['wo'] + p['bo']
    x1 = _layernorm(attn_out + x2d, p['ln1_g'], p['ln1_b'])
    inter = _gelu(x1 @ p['wi'] + p['bi'])
    ffn = inter @ p['wf'] + p['bf']
    x2 = _layernorm(ffn + x1, p['ln2_g'], p['ln2_b'])
    logits = x2 @ p['fc_w'] + p['fc_b']
    return logits.reshape(B, S)


# --------------------------------- main ----------------------------------------
if __name__ == "__main__":
    key = jax.random.PRNGKey(0)
    pkey, ikey = jax.random.split(key)
    params = init_params(pkey)

    ks = jax.random.split(ikey, 4)
    test = jax.random.randint(ks[0], (BATCH, SEQ), 0, N_TEST + 1)
    question = jax.random.randint(ks[1], (BATCH, SEQ), 0, N_QUESTIONS + 1)
    tag = jax.random.randint(ks[2], (BATCH, SEQ), 0, N_TAG + 1)
    interaction = jax.random.randint(ks[3], (BATCH, SEQ), 0, 3)
    mask = jnp.array([[1.0] * SEQ, [1.0] * 5 + [0.0] * 3], dtype=jnp.float32)

    out = lstmattn_forward(params, test, question, tag, mask, interaction)
    out = jax.block_until_ready(out)

    ref = reference_forward(params, test, question, tag, mask, interaction)
    assert out.shape == (BATCH, SEQ), out.shape
    assert bool(jnp.all(jnp.isfinite(out)))
    max_err = float(jnp.max(jnp.abs(out - ref)))
    assert bool(jnp.allclose(out, ref, atol=1e-2, rtol=1e-2)), max_err

    print("KERNEL_OK")
</pallas_src>

<mosaic_0001>
module attributes {stable_mosaic.version = 11 : i64} {
  func.func @fused_lstmattn_kernel(%arg0: memref<16x64xf32, #tpu.memory_space<vmem>>, %arg1: memref<2x8xf32, #tpu.memory_space<vmem>>, %arg2: memref<64x48xf32, #tpu.memory_space<vmem>>, %arg3: memref<1x48xf32, #tpu.memory_space<vmem>>, %arg4: memref<4x48x48xf32, #tpu.memory_space<vmem>>, %arg5: memref<4x48x48xf32, #tpu.memory_space<vmem>>, %arg6: memref<4x1x48xf32, #tpu.memory_space<vmem>>, %arg7: memref<4x48x12xf32, #tpu.memory_space<vmem>>, %arg8: memref<4x1x12xf32, #tpu.memory_space<vmem>>, %arg9: memref<4x48x12xf32, #tpu.memory_space<vmem>>, %arg10: memref<4x1x12xf32, #tpu.memory_space<vmem>>, %arg11: memref<4x48x12xf32, #tpu.memory_space<vmem>>, %arg12: memref<4x1x12xf32, #tpu.memory_space<vmem>>, %arg13: memref<4x12x48xf32, #tpu.memory_space<vmem>>, %arg14: memref<1x48xf32, #tpu.memory_space<vmem>>, %arg15: memref<1x48xf32, #tpu.memory_space<vmem>>, %arg16: memref<1x48xf32, #tpu.memory_space<vmem>>, %arg17: memref<48x48xf32, #tpu.memory_space<vmem>>, %arg18: memref<1x48xf32, #tpu.memory_space<vmem>>, %arg19: memref<48x48xf32, #tpu.memory_space<vmem>>, %arg20: memref<1x48xf32, #tpu.memory_space<vmem>>, %arg21: memref<1x48xf32, #tpu.memory_space<vmem>>, %arg22: memref<1x48xf32, #tpu.memory_space<vmem>>, %arg23: memref<1x1x48xf32, #tpu.memory_space<vmem>>, %arg24: memref<1x1xf32, #tpu.memory_space<vmem>>, %arg25: memref<2x8xf32, #tpu.memory_space<vmem>>, %arg26: memref<16x48xf32, #tpu.memory_space<vmem>>) attributes {dimension_semantics = [], scalar_prefetch = 0 : i64, scratch_operands = 1 : i64, tpu.core_type = #tpu.core_type<tc>} {
    %c0 = arith.constant 0 : index
    %c0_0 = arith.constant 0 : index
    %0 = vector.load %arg0[%c0, %c0_0] : memref<16x64xf32, #tpu.memory_space<vmem>>, vector<16x64xf32>
    %c0_1 = arith.constant 0 : index
    %c0_2 = arith.constant 0 : index
    %1 = vector.load %arg2[%c0_1, %c0_2] : memref<64x48xf32, #tpu.memory_space<vmem>>, vector<64x48xf32>
    %cst = arith.constant dense<0.000000e+00> : vector<16x48xf32>
    %2 = tpu.matmul %0, %1, %cst {dimension_numbers = #tpu.dot_dimension_numbers<[1], [0], [0], [1], [0, 0, 1, 1], [], []>} : vector<16x64xf32>, vector<64x48xf32>, vector<16x48xf32> -> vector<16x48xf32>
    %c0_3 = arith.constant 0 : index
    %c0_4 = arith.constant 0 : index
    %3 = vector.load %arg3[%c0_3, %c0_4] : memref<1x48xf32, #tpu.memory_space<vmem>>, vector<1x48xf32>
    %4 = vector.broadcast %3 : vector<1x48xf32> to vector<16x48xf32>
    %5 = arith.addf %2, %4 : vector<16x48xf32>
    %c0_5 = arith.constant 0 : index
    %c0_6 = arith.constant 0 : index
    %c0_7 = arith.constant 0 : index
    %6 = vector.load %arg5[%c0_5, %c0_6, %c0_7] : memref<4x48x48xf32, #tpu.memory_space<vmem>>, vector<1x48x48xf32>
    %7 = vector.shape_cast %6 : vector<1x48x48xf32> to vector<48x48xf32>
    %c1 = arith.constant 1 : index
    %c0_8 = arith.constant 0 : index
    %c0_9 = arith.constant 0 : index
    %8 = vector.load %arg5[%c1, %c0_8, %c0_9] : memref<4x48x48xf32, #tpu.memory_space<vmem>>, vector<1x48x48xf32>
    %9 = vector.shape_cast %8 : vector<1x48x48xf32> to vector<48x48xf32>
    %c2 = arith.constant 2 : index
    %c0_10 = arith.constant 0 : index
    %c0_11 = arith.constant 0 : index
    %10 = vector.load %arg5[%c2, %c0_10, %c0_11] : memref<4x48x48xf32, #tpu.memory_space<vmem>>, vector<1x48x48xf32>
    %11 = vector.shape_cast %10 : vector<1x48x48xf32> to vector<48x48xf32>
    %c3 = arith.constant 3 : index
    %c0_12 = arith.constant 0 : index
    %c0_13 = arith.constant 0 : index
    %12 = vector.load %arg5[%c3, %c0_12, %c0_13] : memref<4x48x48xf32, #tpu.memory_space<vmem>>, vector<1x48x48xf32>
    %13 = vector.shape_cast %12 : vector<1x48x48xf32> to vector<48x48xf32>
    %c0_14 = arith.constant 0 : index
    %c0_15 = arith.constant 0 : index
    %c0_16 = arith.constant 0 : index
    %14 = vector.load %arg4[%c0_14, %c0_15, %c0_16] : memref<4x48x48xf32, #tpu.memory_space<vmem>>, vector<1x48x48xf32>
    %15 = vector.shape_cast %14 : vector<1x48x48xf32> to vector<48x48xf32>
    %cst_17 = arith.constant dense<0.000000e+00> : vector<16x48xf32>
    %16 = tpu.matmul %5, %15, %cst_17 {dimension_numbers = #tpu.dot_dimension_numbers<[1], [0], [0], [1], [0, 0, 1, 1], [], []>} : vector<16x48xf32>, vector<48x48xf32>, vector<16x48xf32> -> vector<16x48xf32>
    %c0_18 = arith.constant 0 : index
    %c0_19 = arith.constant 0 : index
    %c0_20 = arith.constant 0 : index
    %17 = vector.load %arg6[%c0_18, %c0_19, %c0_20] : memref<4x1x48xf32, #tpu.memory_space<vmem>>, vector<1x1x48xf32>
    %18 = vector.shape_cast %17 : vector<1x1x48xf32> to vector<1x48xf32>
    %19 = vector.broadcast %18 : vector<1x48xf32> to vector<16x48xf32>
    %20 = arith.addf %16, %19 : vector<16x48xf32>
    %c1_21 = arith.constant 1 : index
    %c0_22 = arith.constant 0 : index
    %c0_23 = arith.constant 0 : index
    %21 = vector.load %arg4[%c1_21, %c0_22, %c0_23] : memref<4x48x48xf32, #tpu.memory_space<vmem>>, vector<1x48x48xf32>
    %22 = vector.shape_cast %21 : vector<1x48x48xf32> to vector<48x48xf32>
    %cst_24 = arith.constant dense<0.000000e+00> : vector<16x48xf32>
    %23 = tpu.matmul %5, %22, %cst_24 {dimension_numbers = #tpu.dot_dimension_numbers<[1], [0], [0], [1], [0, 0, 1, 1], [], []>} : vector<16x48xf32>, vector<48x48xf32>, vector<16x48xf32> -> vector<16x48xf32>
    %c1_25 = arith.constant 1 : index
    %c0_26 = arith.constant 0 : index
    %c0_27 = arith.constant 0 : index
    %24 = vector.load %arg6[%c1_25, %c0_26, %c0_27] : memref<4x1x48xf32, #tpu.memory_space<vmem>>, vector<1x1x48xf32>
    %25 = vector.shape_cast %24 : vector<1x1x48xf32> to vector<1x48xf32>
    %26 = vector.broadcast %25 : vector<1x48xf32> to vector<16x48xf32>
    %27 = arith.addf %23, %26 : vector<16x48xf32>
    %c2_28 = arith.constant 2 : index
    %c0_29 = arith.constant 0 : index
    %c0_30 = arith.constant 0 : index
    %28 = vector.load %arg4[%c2_28, %c0_29, %c0_30] : memref<4x48x48xf32, #tpu.memory_space<vmem>>, vector<1x48x48xf32>
    %29 = vector.shape_cast %28 : vector<1x48x48xf32> to vector<48x48xf32>
    %cst_31 = arith.constant dense<0.000000e+00> : vector<16x48xf32>
    %30 = tpu.matmul %5, %29, %cst_31 {dimension_numbers = #tpu.dot_dimension_numbers<[1], [0], [0], [1], [0, 0, 1, 1], [], []>} : vector<16x48xf32>, vector<48x48xf32>, vector<16x48xf32> -> vector<16x48xf32>
    %c2_32 = arith.constant 2 : index
    %c0_33 = arith.constant 0 : index
    %c0_34 = arith.constant 0 : index
    %31 = vector.load %arg6[%c2_32, %c0_33, %c0_34] : memref<4x1x48xf32, #tpu.memory_space<vmem>>, vector<1x1x48xf32>
    %32 = vector.shape_cast %31 : vector<1x1x48xf32> to vector<1x48xf32>
    %33 = vector.broadcast %32 : vector<1x48xf32> to vector<16x48xf32>
    %34 = arith.addf %30, %33 : vector<16x48xf32>
    %c3_35 = arith.constant 3 : index
    %c0_36 = arith.constant 0 : index
    %c0_37 = arith.constant 0 : index
    %35 = vector.load %arg4[%c3_35, %c0_36, %c0_37] : memref<4x48x48xf32, #tpu.memory_space<vmem>>, vector<1x48x48xf32>
    %36 = vector.shape_cast %35 : vector<1x48x48xf32> to vector<48x48xf32>
    %cst_38 = arith.constant dense<0.000000e+00> : vector<16x48xf32>
    %37 = tpu.matmul %5, %36, %cst_38 {dimension_numbers = #tpu.dot_dimension_numbers<[1], [0], [0], [1], [0, 0, 1, 1], [], []>} : vector<16x48xf32>, vector<48x48xf32>, vector<16x48xf32> -> vector<16x48xf32>
    %c3_39 = arith.constant 3 : index
    %c0_40 = arith.constant 0 : index
    %c0_41 = arith.constant 0 : index
    %38 = vector.load %arg6[%c3_39, %c0_40, %c0_41] : memref<4x1x48xf32, #tpu.memory_space<vmem>>, vector<1x1x48xf32>
    %39 = vector.shape_cast %38 : vector<1x1x48xf32> to vector<1x48xf32>
    %40 = vector.broadcast %39 : vector<1x48xf32> to vector<16x48xf32>
    %41 = arith.addf %37, %40 : vector<16x48xf32>
    %cst_42 = arith.constant 0.000000e+00 : f32
    %42 = vector.broadcast %cst_42 : f32 to vector<2x48xf32>
    %cst_43 = arith.constant 0.000000e+00 : f32
    %43 = vector.broadcast %cst_43 : f32 to vector<2x48xf32>
    %44 = vector.extract_strided_slice %20 {offsets = [0, 0], sizes = [2, 48], strides = [1, 1]} : vector<16x48xf32> to vector<2x48xf32>
    %cst_44 = arith.constant dense<0.000000e+00> : vector<2x48xf32>
    %45 = tpu.matmul %42, %7, %cst_44 {dimension_numbers = #tpu.dot_dimension_numbers<[1], [0], [0], [1], [0, 0, 1, 1], [], []>} : vector<2x48xf32>, vector<48x48xf32>, vector<2x48xf32> -> vector<2x48xf32>
    %46 = arith.addf %44, %45 : vector<2x48xf32>
    %47 = arith.negf %46 : vector<2x48xf32>
    %48 = math.exp %47 : vector<2x48xf32>
    %cst_45 = arith.constant 1.000000e+00 : f32
    %49 = vector.broadcast %cst_45 : f32 to vector<2x48xf32>
    %50 = arith.addf %49, %48 : vector<2x48xf32>
    %51 = arith.divf %49, %50 : vector<2x48xf32>
    %52 = vector.extract_strided_slice %27 {offsets = [0, 0], sizes = [2, 48], strides = [1, 1]} : vector<16x48xf32> to vector<2x48xf32>
    %cst_46 = arith.constant dense<0.000000e+00> : vector<2x48xf32>
    %53 = tpu.matmul %42, %9, %cst_46 {dimension_numbers = #tpu.dot_dimension_numbers<[1], [0], [0], [1], [0, 0, 1, 1], [], []>} : vector<2x48xf32>, vector<48x48xf32>, vector<2x48xf32> -> vector<2x48xf32>
    %54 = arith.addf %52, %53 : vector<2x48xf32>
    %55 = arith.negf %54 : vector<2x48xf32>
    %56 = math.exp %55 : vector<2x48xf32>
    %cst_47 = arith.constant 1.000000e+00 : f32
    %57 = vector.broadcast %cst_47 : f32 to vector<2x48xf32>
    %58 = arith.addf %57, %56 : vector<2x48xf32>
    %59 = arith.divf %57, %58 : vector<2x48xf32>
    %60 = vector.extract_strided_slice %34 {offsets = [0, 0], sizes = [2, 48], strides = [1, 1]} : vector<16x48xf32> to vector<2x48xf32>
    %cst_48 = arith.constant dense<0.000000e+00> : vector<2x48xf32>
    %61 = tpu.matmul %42, %11, %cst_48 {dimension_numbers = #tpu.dot_dimension_numbers<[1], [0], [0], [1], [0, 0, 1, 1], [], []>} : vector<2x48xf32>, vector<48x48xf32>, vector<2x48xf32> -> vector<2x48xf32>
    %62 = arith.addf %60, %61 : vector<2x48xf32>
    %63 = math.tanh %62 : vector<2x48xf32>
    %64 = vector.extract_strided_slice %41 {offsets = [0, 0], sizes = [2, 48], strides = [1, 1]} : vector<16x48xf32> to vector<2x48xf32>
    %cst_49 = arith.constant dense<0.000000e+00> : vector<2x48xf32>
    %65 = tpu.matmul %42, %13, %cst_49 {dimension_numbers = #tpu.dot_dimension_numbers<[1], [0], [0], [1], [0, 0, 1, 1], [], []>} : vector<2x48xf32>, vector<48x48xf32>, vector<2x48xf32> -> vector<2x48xf32>
    %66 = arith.addf %64, %65 : vector<2x48xf32>
    %67 = arith.negf %66 : vector<2x48xf32>
    %68 = math.exp %67 : vector<2x48xf32>
    %cst_50 = arith.constant 1.000000e+00 : f32
    %69 = vector.broadcast %cst_50 : f32 to vector<2x48xf32>
    %70 = arith.addf %69, %68 : vector<2x48xf32>
    %71 = arith.divf %69, %70 : vector<2x48xf32>
    %72 = arith.mulf %59, %43 : vector<2x48xf32>
    %73 = arith.mulf %51, %63 : vector<2x48xf32>
    %74 = arith.addf %72, %73 : vector<2x48xf32>
    %75 = math.tanh %74 : vector<2x48xf32>
    %76 = arith.mulf %71, %75 : vector<2x48xf32>
    %77 = vector.extract_strided_slice %76 {offsets = [0, 0], sizes = [1, 48], strides = [1, 1]} : vector<2x48xf32> to vector<1x48xf32>
    %c0_51 = arith.constant 0 : index
    %c0_52 = arith.constant 0 : index
    %78 = vector.load %arg26[%c0_51, %c0_52] : memref<16x48xf32, #tpu.memory_space<vmem>>, vector<1x48xf32>
    tpu.vector_store %arg26[%c0_51, %c0_52], %77 {strides = array<i32>} : memref<16x48xf32, #tpu.memory_space<vmem>>, vector<1x48xf32>,
    %79 = vector.extract_strided_slice %76 {offsets = [1, 0], sizes = [1, 48], strides = [1, 1]} : vector<2x48xf32> to vector<1x48xf32>
    %c8 = arith.constant 8 : index
    %c0_53 = arith.constant 0 : index
    %80 = vector.load %arg26[%c8, %c0_53] : memref<16x48xf32, #tpu.memory_space<vmem>>, vector<1x48xf32>
    tpu.vector_store %arg26[%c8, %c0_53], %79 {strides = array<i32>} : memref<16x48xf32, #tpu.memory_space<vmem>>, vector<1x48xf32>,
    %81 = vector.extract_strided_slice %20 {offsets = [2, 0], sizes = [2, 48], strides = [1, 1]} : vector<16x48xf32> to vector<2x48xf32>
    %cst_54 = arith.constant dense<0.000000e+00> : vector<2x48xf32>
    %82 = tpu.matmul %76, %7, %cst_54 {dimension_numbers = #tpu.dot_dimension_numbers<[1], [0], [0], [1], [0, 0, 1, 1], [], []>} : vector<2x48xf32>, vector<48x48xf32>, vector<2x48xf32> -> vector<2x48xf32>
    %83 = arith.addf %81, %82 : vector<2x48xf32>
    %84 = arith.negf %83 : vector<2x48xf32>
    %85 = math.exp %84 : vector<2x48xf32>
    %cst_55 = arith.constant 1.000000e+00 : f32
    %86 = vector.broadcast %cst_55 : f32 to vector<2x48xf32>
    %87 = arith.addf %86, %85 : vector<2x48xf32>
    %88 = arith.divf %86, %87 : vector<2x48xf32>
    %89 = vector.extract_strided_slice %27 {offsets = [2, 0], sizes = [2, 48], strides = [1, 1]} : vector<16x48xf32> to vector<2x48xf32>
    %cst_56 = arith.constant dense<0.000000e+00> : vector<2x48xf32>
    %90 = tpu.matmul %76, %9, %cst_56 {dimension_numbers = #tpu.dot_dimension_numbers<[1], [0], [0], [1], [0, 0, 1, 1], [], []>} : vector<2x48xf32>, vector<48x48xf32>, vector<2x48xf32> -> vector<2x48xf32>
    %91 = arith.addf %89, %90 : vector<2x48xf32>
    %92 = arith.negf %91 : vector<2x48xf32>
    %93 = math.exp %92 : vector<2x48xf32>
    %cst_57 = arith.constant 1.000000e+00 : f32
    %94 = vector.broadcast %cst_57 : f32 to vector<2x48xf32>
    %95 = arith.addf %94, %93 : vector<2x48xf32>
    %96 = arith.divf %94, %95 : vector<2x48xf32>
    %97 = vector.extract_strided_slice %34 {offsets = [2, 0], sizes = [2, 48], strides = [1, 1]} : vector<16x48xf32> to vector<2x48xf32>
    %cst_58 = arith.constant dense<0.000000e+00> : vector<2x48xf32>
    %98 = tpu.matmul %76, %11, %cst_58 {dimension_numbers = #tpu.dot_dimension_numbers<[1], [0], [0], [1], [0, 0, 1, 1], [], []>} : vector<2x48xf32>, vector<48x48xf32>, vector<2x48xf32> -> vector<2x48xf32>
    %99 = arith.addf %97, %98 : vector<2x48xf32>
    %100 = math.tanh %99 : vector<2x48xf32>
    %101 = vector.extract_strided_slice %41 {offsets = [2, 0], sizes = [2, 48], strides = [1, 1]} : vector<16x48xf32> to vector<2x48xf32>
    %cst_59 = arith.constant dense<0.000000e+00> : vector<2x48xf32>
    %102 = tpu.matmul %76, %13, %cst_59 {dimension_numbers = #tpu.dot_dimension_numbers<[1], [0], [0], [1], [0, 0, 1, 1], [], []>} : vector<2x48xf32>, vector<48x48xf32>, vector<2x48xf32> -> vector<2x48xf32>
    %103 = arith.addf %101, %102 : vector<2x48xf32>
    %104 = arith.negf %103 : vector<2x48xf32>
    %105 = math.exp %104 : vector<2x48xf32>
    %cst_60 = arith.constant 1.000000e+00 : f32
    %106 = vector.broadcast %cst_60 : f32 to vector<2x48xf32>
    %107 = arith.addf %106, %105 : vector<2x48xf32>
    %108 = arith.divf %106, %107 : vector<2x48xf32>
    %109 = arith.mulf %96, %74 : vector<2x48xf32>
    %110 = arith.mulf %88, %100 : vector<2x48xf32>
    %111 = arith.addf %109, %110 : vector<2x48xf32>
    %112 = math.tanh %111 : vector<2x48xf32>
    %113 = arith.mulf %108, %112 : vector<2x48xf32>
    %114 = vector.extract_strided_slice %113 {offsets = [0, 0], sizes = [1, 48], strides = [1, 1]} : vector<2x48xf32> to vector<1x48xf32>
    %c1_61 = arith.constant 1 : index
    %c0_62 = arith.constant 0 : index
    %115 = vector.load %arg26[%c1_61, %c0_62] : memref<16x48xf32, #tpu.memory_space<vmem>>, vector<1x48xf32>
    tpu.vector_store %arg26[%c1_61, %c0_62], %114 {strides = array<i32>} : memref<16x48xf32, #tpu.memory_space<vmem>>, vector<1x48xf32>,
    %116 = vector.extract_strided_slice %113 {offsets = [1, 0], sizes = [1, 48], strides = [1, 1]} : vector<2x48xf32> to vector<1x48xf32>
    %c9 = arith.constant 9 : index
    %c0_63 = arith.constant 0 : index
    %117 = vector.load %arg26[%c9, %c0_63] : memref<16x48xf32, #tpu.memory_space<vmem>>, vector<1x48xf32>
    tpu.vector_store %arg26[%c9, %c0_63], %116 {strides = array<i32>} : memref<16x48xf32, #tpu.memory_space<vmem>>, vector<1x48xf32>,
    %118 = vector.extract_strided_slice %20 {offsets = [4, 0], sizes = [2, 48], strides = [1, 1]} : vector<16x48xf32> to vector<2x48xf32>
    %cst_64 = arith.constant dense<0.000000e+00> : vector<2x48xf32>
    %119 = tpu.matmul %113, %7, %cst_64 {dimension_numbers = #tpu.dot_dimension_numbers<[1], [0], [0], [1], [0, 0, 1, 1], [], []>} : vector<2x48xf32>, vector<48x48xf32>, vector<2x48xf32> -> vector<2x48xf32>
    %120 = arith.addf %118, %119 : vector<2x48xf32>
    %121 = arith.negf %120 : vector<2x48xf32>
    %122 = math.exp %121 : vector<2x48xf32>
    %cst_65 = arith.constant 1.000000e+00 : f32
    %123 = vector.broadcast %cst_65 : f32 to vector<2x48xf32>
    %124 = arith.addf %123, %122 : vector<2x48xf32>
    %125 = arith.divf %123, %124 : vector<2x48xf32>
    %126 = vector.extract_strided_slice %27 {offsets = [4, 0], sizes = [2, 48], strides = [1, 1]} : vector<16x48xf32> to vector<2x48xf32>
    %cst_66 = arith.constant dense<0.000000e+00> : vector<2x48xf32>
    %127 = tpu.matmul %113, %9, %cst_66 {dimension_numbers = #tpu.dot_dimension_numbers<[1], [0], [0], [1], [0, 0, 1, 1], [], []>} : vector<2x48xf32>, vector<48x48xf32>, vector<2x48xf32> -> vector<2x48xf32>
    %128 = arith.addf %126, %127 : vector<2x48xf32>
    %129 = arith.negf %128 : vector<2x48xf32>
    %130 = math.exp %129 : vector<2x48xf32>
    %cst_67 = arith.constant 1.000000e+00 : f32
    %131 = vector.broadcast %cst_67 : f32 to vector<2x48xf32>
    %132 = arith.addf %131, %130 : vector<2x48xf32>
    %133 = arith.divf %131, %132 : vector<2x48xf32>
    %134 = vector.extract_strided_slice %34 {offsets = [4, 0], sizes = [2, 48], strides = [1, 1]} : vector<16x48xf32> to vector<2x48xf32>
    %cst_68 = arith.constant dense<0.000000e+00> : vector<2x48xf32>
    %135 = tpu.matmul %113, %11, %cst_68 {dimension_numbers = #tpu.dot_dimension_numbers<[1], [0], [0], [1], [0, 0, 1, 1], [], []>} : vector<2x48xf32>, vector<48x48xf32>, vector<2x48xf32> -> vector<2x48xf32>
    %136 = arith.addf %134, %135 : vector<2x48xf32>
    %137 = math.tanh %136 : vector<2x48xf32>
    %138 = vector.extract_strided_slice %41 {offsets = [4, 0], sizes = [2, 48], strides = [1, 1]} : vector<16x48xf32> to vector<2x48xf32>
    %cst_69 = arith.constant dense<0.000000e+00> : vector<2x48xf32>
    %139 = tpu.matmul %113, %13, %cst_69 {dimension_numbers = #tpu.dot_dimension_numbers<[1], [0], [0], [1], [0, 0, 1, 1], [], []>} : vector<2x48xf32>, vector<48x48xf32>, vector<2x48xf32> -> vector<2x48xf32>
    %140 = arith.addf %138, %139 : vector<2x48xf32>
    %141 = arith.negf %140 : vector<2x48xf32>
    %142 = math.exp %141 : vector<2x48xf32>
    %cst_70 = arith.constant 1.000000e+00 : f32
    %143 = vector.broadcast %cst_70 : f32 to vector<2x48xf32>
    %144 = arith.addf %143, %142 : vector<2x48xf32>
    %145 = arith.divf %143, %144 : vector<2x48xf32>
    %146 = arith.mulf %133, %111 : vector<2x48xf32>
    %147 = arith.mulf %125, %137 : vector<2x48xf32>
    %148 = arith.addf %146, %147 : vector<2x48xf32>
    %149 = math.tanh %148 : vector<2x48xf32>
    %150 = arith.mulf %145, %149 : vector<2x48xf32>
    %151 = vector.extract_strided_slice %150 {offsets = [0, 0], sizes = [1, 48], strides = [1, 1]} : vector<2x48xf32> to vector<1x48xf32>
    %c2_71 = arith.constant 2 : index
    %c0_72 = arith.constant 0 : index
    %152 = vector.load %arg26[%c2_71, %c0_72] : memref<16x48xf32, #tpu.memory_space<vmem>>, vector<1x48xf32>
    tpu.vector_store %arg26[%c2_71, %c0_72], %151 {strides = array<i32>} : memref<16x48xf32, #tpu.memory_space<vmem>>, vector<1x48xf32>,
    %153 = vector.extract_strided_slice %150 {offsets = [1, 0], sizes = [1, 48], strides = [1, 1]} : vector<2x48xf32> to vector<1x48xf32>
    %c10 = arith.constant 10 : index
    %c0_73 = arith.constant 0 : index
    %154 = vector.load %arg26[%c10, %c0_73] : memref<16x48xf32, #tpu.memory_space<vmem>>, vector<1x48xf32>
    tpu.vector_store %arg26[%c10, %c0_73], %153 {strides = array<i32>} : memref<16x48xf32, #tpu.memory_space<vmem>>, vector<1x48xf32>,
    %155 = vector.extract_strided_slice %20 {offsets = [6, 0], sizes = [2, 48], strides = [1, 1]} : vector<16x48xf32> to vector<2x48xf32>
    %cst_74 = arith.constant dense<0.000000e+00> : vector<2x48xf32>
    %156 = tpu.matmul %150, %7, %cst_74 {dimension_numbers = #tpu.dot_dimension_numbers<[1], [0], [0], [1], [0, 0, 1, 1], [], []>} : vector<2x48xf32>, vector<48x48xf32>, vector<2x48xf32> -> vector<2x48xf32>
    %157 = arith.addf %155, %156 : vector<2x48xf32>
    %158 = arith.negf %157 : vector<2x48xf32>
    %159 = math.exp %158 : vector<2x48xf32>
    %cst_75 = arith.constant 1.000000e+00 : f32
    %160 = vector.broadcast %cst_75 : f32 to vector<2x48xf32>
    %161 = arith.addf %160, %159 : vector<2x48xf32>
    %162 = arith.divf %160, %161 : vector<2x48xf32>
    %163 = vector.extract_strided_slice %27 {offsets = [6, 0], sizes = [2, 48], strides = [1, 1]} : vector<16x48xf32> to vector<2x48xf32>
    %cst_76 = arith.constant dense<0.000000e+00> : vector<2x48xf32>
    %164 = tpu.matmul %150, %9, %cst_76 {dimension_numbers = #tpu.dot_dimension_numbers<[1], [0], [0], [1], [0, 0, 1, 1], [], []>} : vector<2x48xf32>, vector<48x48xf32>, vector<2x48xf32> -> vector<2x48xf32>
    %165 = arith.addf %163, %164 : vector<2x48xf32>
    %166 = arith.negf %165 : vector<2x48xf32>
    %167 = math.exp %166 : vector<2x48xf32>
    %cst_77 = arith.constant 1.000000e+00 : f32
    %168 = vector.broadcast %cst_77 : f32 to vector<2x48xf32>
    %169 = arith.addf %168, %167 : vector<2x48xf32>
    %170 = arith.divf %168, %169 : vector<2x48xf32>
    %171 = vector.extract_strided_slice %34 {offsets = [6, 0], sizes = [2, 48], strides = [1, 1]} : vector<16x48xf32> to vector<2x48xf32>
    %cst_78 = arith.constant dense<0.000000e+00> : vector<2x48xf32>
    %172 = tpu.matmul %150, %11, %cst_78 {dimension_numbers = #tpu.dot_dimension_numbers<[1], [0], [0], [1], [0, 0, 1, 1], [], []>} : vector<2x48xf32>, vector<48x48xf32>, vector<2x48xf32> -> vector<2x48xf32>
    %173 = arith.addf %171, %172 : vector<2x48xf32>
    %174 = math.tanh %173 : vector<2x48xf32>
    %175 = vector.extract_strided_slice %41 {offsets = [6, 0], sizes = [2, 48], strides = [1, 1]} : vector<16x48xf32> to vector<2x48xf32>
    %cst_79 = arith.constant dense<0.000000e+00> : vector<2x48xf32>
    %176 = tpu.matmul %150, %13, %cst_79 {dimension_numbers = #tpu.dot_dimension_numbers<[1], [0], [0], [1], [0, 0, 1, 1], [], []>} : vector<2x48xf32>, vector<48x48xf32>, vector<2x48xf32> -> vector<2x48xf32>
    %177 = arith.addf %175, %176 : vector<2x48xf32>
    %178 = arith.negf %177 : vector<2x48xf32>
    %179 = math.exp %178 : vector<2x48xf32>
    %cst_80 = arith.constant 1.000000e+00 : f32
    %180 = vector.broadcast %cst_80 : f32 to vector<2x48xf32>
    %181 = arith.addf %180, %179 : vector<2x48xf32>
    %182 = arith.divf %180, %181 : vector<2x48xf32>
    %183 = arith.mulf %170, %148 : vector<2x48xf32>
    %184 = arith.mulf %162, %174 : vector<2x48xf32>
    %185 = arith.addf %183, %184 : vector<2x48xf32>
    %186 = math.tanh %185 : vector<2x48xf32>
    %187 = arith.mulf %182, %186 : vector<2x48xf32>
    %188 = vector.extract_strided_slice %187 {offsets = [0, 0], sizes = [1, 48], strides = [1, 1]} : vector<2x48xf32> to vector<1x48xf32>
    %c3_81 = arith.constant 3 : index
    %c0_82 = arith.constant 0 : index
    %189 = vector.load %arg26[%c3_81, %c0_82] : memref<16x48xf32, #tpu.memory_space<vmem>>, vector<1x48xf32>
    tpu.vector_store %arg26[%c3_81, %c0_82], %188 {strides = array<i32>} : memref<16x48xf32, #tpu.memory_space<vmem>>, vector<1x48xf32>,
    %190 = vector.extract_strided_slice %187 {offsets = [1, 0], sizes = [1, 48], strides = [1, 1]} : vector<2x48xf32> to vector<1x48xf32>
    %c11 = arith.constant 11 : index
    %c0_83 = arith.constant 0 : index
    %191 = vector.load %arg26[%c11, %c0_83] : memref<16x48xf32, #tpu.memory_space<vmem>>, vector<1x48xf32>
    tpu.vector_store %arg26[%c11, %c0_83], %190 {strides = array<i32>} : memref<16x48xf32, #tpu.memory_space<vmem>>, vector<1x48xf32>,
    %192 = vector.extract_strided_slice %20 {offsets = [8, 0], sizes = [2, 48], strides = [1, 1]} : vector<16x48xf32> to vector<2x48xf32>
    %cst_84 = arith.constant dense<0.000000e+00> : vector<2x48xf32>
    %193 = tpu.matmul %187, %7, %cst_84 {dimension_numbers = #tpu.dot_dimension_numbers<[1], [0], [0], [1], [0, 0, 1, 1], [], []>} : vector<2x48xf32>, vector<48x48xf32>, vector<2x48xf32> -> vector<2x48xf32>
    %194 = arith.addf %192, %193 : vector<2x48xf32>
    %195 = arith.negf %194 : vector<2x48xf32>
    %196 = math.exp %195 : vector<2x48xf32>
    %cst_85 = arith.constant 1.000000e+00 : f32
    %197 = vector.broadcast %cst_85 : f32 to vector<2x48xf32>
    %198 = arith.addf %197, %196 : vector<2x48xf32>
    %199 = arith.divf %197, %198 : vector<2x48xf32>
    %200 = vector.extract_strided_slice %27 {offsets = [8, 0], sizes = [2, 48], strides = [1, 1]} : vector<16x48xf32> to vector<2x48xf32>
    %cst_86 = arith.constant dense<0.000000e+00> : vector<2x48xf32>
    %201 = tpu.matmul %187, %9, %cst_86 {dimension_numbers = #tpu.dot_dimension_numbers<[1], [0], [0], [1], [0, 0, 1, 1], [], []>} : vector<2x48xf32>, vector<48x48xf32>, vector<2x48xf32> -> vector<2x48xf32>
    %202 = arith.addf %200, %201 : vector<2x48xf32>
    %203 = arith.negf %202 : vector<2x48xf32>
    %204 = math.exp %203 : vector<2x48xf32>
    %cst_87 = arith.constant 1.000000e+00 : f32
    %205 = vector.broadcast %cst_87 : f32 to vector<2x48xf32>
    %206 = arith.addf %205, %204 : vector<2x48xf32>
    %207 = arith.divf %205, %206 : vector<2x48xf32>
    %208 = vector.extract_strided_slice %34 {offsets = [8, 0], sizes = [2, 48], strides = [1, 1]} : vector<16x48xf32> to vector<2x48xf32>
    %cst_88 = arith.constant dense<0.000000e+00> : vector<2x48xf32>
    %209 = tpu.matmul %187, %11, %cst_88 {dimension_numbers = #tpu.dot_dimension_numbers<[1], [0], [0], [1], [0, 0, 1, 1], [], []>} : vector<2x48xf32>, vector<48x48xf32>, vector<2x48xf32> -> vector<2x48xf32>
    %210 = arith.addf %208, %209 : vector<2x48xf32>
    %211 = math.tanh %210 : vector<2x48xf32>
    %212 = vector.extract_strided_slice %41 {offsets = [8, 0], sizes = [2, 48], strides = [1, 1]} : vector<16x48xf32> to vector<2x48xf32>
    %cst_89 = arith.constant dense<0.000000e+00> : vector<2x48xf32>
    %213 = tpu.matmul %187, %13, %cst_89 {dimension_numbers = #tpu.dot_dimension_numbers<[1], [0], [0], [1], [0, 0, 1, 1], [], []>} : vector<2x48xf32>, vector<48x48xf32>, vector<2x48xf32> -> vector<2x48xf32>
    %214 = arith.addf %212, %213 : vector<2x48xf32>
    %215 = arith.negf %214 : vector<2x48xf32>
    %216 = math.exp %215 : vector<2x48xf32>
    %cst_90 = arith.constant 1.000000e+00 : f32
    %217 = vector.broadcast %cst_90 : f32 to vector<2x48xf32>
    %218 = arith.addf %217, %216 : vector<2x48xf32>
    %219 = arith.divf %217, %218 : vector<2x48xf32>
    %220 = arith.mulf %207, %185 : vector<2x48xf32>
    %221 = arith.mulf %199, %211 : vector<2x48xf32>
    %222 = arith.addf %220, %221 : vector<2x48xf32>
    %223 = math.tanh %222 : vector<2x48xf32>
    %224 = arith.mulf %219, %223 : vector<2x48xf32>
    %225 = vector.extract_strided_slice %224 {offsets = [0, 0], sizes = [1, 48], strides = [1, 1]} : vector<2x48xf32> to vector<1x48xf32>
    %c4 = arith.constant 4 : index
    %c0_91 = arith.constant 0 : index
    %226 = vector.load %arg26[%c4, %c0_91] : memref<16x48xf32, #tpu.memory_space<vmem>>, vector<1x48xf32>
    tpu.vector_store %arg26[%c4, %c0_91], %225 {strides = array<i32>} : memref<16x48xf32, #tpu.memory_space<vmem>>, vector<1x48xf32>,
    %227 = vector.extract_strided_slice %224 {offsets = [1, 0], sizes = [1, 48], strides = [1, 1]} : vector<2x48xf32> to vector<1x48xf32>
    %c12 = arith.constant 12 : index
    %c0_92 = arith.constant 0 : index
    %228 = vector.load %arg26[%c12, %c0_92] : memref<16x48xf32, #tpu.memory_space<vmem>>, vector<1x48xf32>
    tpu.vector_store %arg26[%c12, %c0_92], %227 {strides = array<i32>} : memref<16x48xf32, #tpu.memory_space<vmem>>, vector<1x48xf32>,
    %229 = vector.extract_strided_slice %20 {offsets = [10, 0], sizes = [2, 48], strides = [1, 1]} : vector<16x48xf32> to vector<2x48xf32>
    %cst_93 = arith.constant dense<0.000000e+00> : vector<2x48xf32>
    %230 = tpu.matmul %224, %7, %cst_93 {dimension_numbers = #tpu.dot_dimension_numbers<[1], [0], [0], [1], [0, 0, 1, 1], [], []>} : vector<2x48xf32>, vector<48x48xf32>, vector<2x48xf32> -> vector<2x48xf32>
    %231 = arith.addf %229, %230 : vector<2x48xf32>
    %232 = arith.negf %231 : vector<2x48xf32>
    %233 = math.exp %232 : vector<2x48xf32>
    %cst_94 = arith.constant 1.000000e+00 : f32
    %234 = vector.broadcast %cst_94 : f32 to vector<2x48xf32>
    %235 = arith.addf %234, %233 : vector<2x48xf32>
    %236 = arith.divf %234, %235 : vector<2x48xf32>
    %237 = vector.extract_strided_slice %27 {offsets = [10, 0], sizes = [2, 48], strides = [1, 1]} : vector<16x48xf32> to vector<2x48xf32>
    %cst_95 = arith.constant dense<0.000000e+00> : vector<2x48xf32>
    %238 = tpu.matmul %224, %9, %cst_95 {dimension_numbers = #tpu.dot_dimension_numbers<[1], [0], [0], [1], [0, 0, 1, 1], [], []>} : vector<2x48xf32>, vector<48x48xf32>, vector<2x48xf32> -> vector<2x48xf32>
    %239 = arith.addf %237, %238 : vector<2x48xf32>
    %240 = arith.negf %239 : vector<2x48xf32>
    %241 = math.exp %240 : vector<2x48xf32>
    %cst_96 = arith.constant 1.000000e+00 : f32
    %242 = vector.broadcast %cst_96 : f32 to vector<2x48xf32>
    %243 = arith.addf %242, %241 : vector<2x48xf32>
    %244 = arith.divf %242, %243 : vector<2x48xf32>
    %245 = vector.extract_strided_slice %34 {offsets = [10, 0], sizes = [2, 48], strides = [1, 1]} : vector<16x48xf32> to vector<2x48xf32>
    %cst_97 = arith.constant dense<0.000000e+00> : vector<2x48xf32>
    %246 = tpu.matmul %224, %11, %cst_97 {dimension_numbers = #tpu.dot_dimension_numbers<[1], [0], [0], [1], [0, 0, 1, 1], [], []>} : vector<2x48xf32>, vector<48x48xf32>, vector<2x48xf32> -> vector<2x48xf32>
    %247 = arith.addf %245, %246 : vector<2x48xf32>
    %248 = math.tanh %247 : vector<2x48xf32>
    %249 = vector.extract_strided_slice %41 {offsets = [10, 0], sizes = [2, 48], strides = [1, 1]} : vector<16x48xf32> to vector<2x48xf32>
    %cst_98 = arith.constant dense<0.000000e+00> : vector<2x48xf32>
    %250 = tpu.matmul %224, %13, %cst_98 {dimension_numbers = #tpu.dot_dimension_numbers<[1], [0], [0], [1], [0, 0, 1, 1], [], []>} : vector<2x48xf32>, vector<48x48xf32>, vector<2x48xf32> -> vector<2x48xf32>
    %251 = arith.addf %249, %250 : vector<2x48xf32>
    %252 = arith.negf %251 : vector<2x48xf32>
    %253 = math.exp %252 : vector<2x48xf32>
    %cst_99 = arith.constant 1.000000e+00 : f32
    %254 = vector.broadcast %cst_99 : f32 to vector<2x48xf32>
    %255 = arith.addf %254, %253 : vector<2x48xf32>
    %256 = arith.divf %254, %255 : vector<2x48xf32>
    %257 = arith.mulf %244, %222 : vector<2x48xf32>
    %258 = arith.mulf %236, %248 : vector<2x48xf32>
    %259 = arith.addf %257, %258 : vector<2x48xf32>
    %260 = math.tanh %259 : vector<2x48xf32>
    %261 = arith.mulf %256, %260 : vector<2x48xf32>
    %262 = vector.extract_strided_slice %261 {offsets = [0, 0], sizes = [1, 48], strides = [1, 1]} : vector<2x48xf32> to vector<1x48xf32>
    %c5 = arith.constant 5 : index
    %c0_100 = arith.constant 0 : index
    %263 = vector.load %arg26[%c5, %c0_100] : memref<16x48xf32, #tpu.memory_space<vmem>>, vector<1x48xf32>
    tpu.vector_store %arg26[%c5, %c0_100], %262 {strides = array<i32>} : memref<16x48xf32, #tpu.memory_space<vmem>>, vector<1x48xf32>,
    %264 = vector.extract_strided_slice %261 {offsets = [1, 0], sizes = [1, 48], strides = [1, 1]} : vector<2x48xf32> to vector<1x48xf32>
    %c13 = arith.constant 13 : index
    %c0_101 = arith.constant 0 : index
    %265 = vector.load %arg26[%c13, %c0_101] : memref<16x48xf32, #tpu.memory_space<vmem>>, vector<1x48xf32>
    tpu.vector_store %arg26[%c13, %c0_101], %264 {strides = array<i32>} : memref<16x48xf32, #tpu.memory_space<vmem>>, vector<1x48xf32>,
    %266 = vector.extract_strided_slice %20 {offsets = [12, 0], sizes = [2, 48], strides = [1, 1]} : vector<16x48xf32> to vector<2x48xf32>
    %cst_102 = arith.constant dense<0.000000e+00> : vector<2x48xf32>
    %267 = tpu.matmul %261, %7, %cst_102 {dimension_numbers = #tpu.dot_dimension_numbers<[1], [0], [0], [1], [0, 0, 1, 1], [], []>} : vector<2x48xf32>, vector<48x48xf32>, vector<2x48xf32> -> vector<2x48xf32>
    %268 = arith.addf %266, %267 : vector<2x48xf32>
    %269 = arith.negf %268 : vector<2x48xf32>
    %270 = math.exp %269 : vector<2x48xf32>
    %cst_103 = arith.constant 1.000000e+00 : f32
    %271 = vector.broadcast %cst_103 : f32 to vector<2x48xf32>
    %272 = arith.addf %271, %270 : vector<2x48xf32>
    %273 = arith.divf %271, %272 : vector<2x48xf32>
    %274 = vector.extract_strided_slice %27 {offsets = [12, 0], sizes = [2, 48], strides = [1, 1]} : vector<16x48xf32> to vector<2x48xf32>
    %cst_104 = arith.constant dense<0.000000e+00> : vector<2x48xf32>
    %275 = tpu.matmul %261, %9, %cst_104 {dimension_numbers = #tpu.dot_dimension_numbers<[1], [0], [0], [1], [0, 0, 1, 1], [], []>} : vector<2x48xf32>, vector<48x48xf32>, vector<2x48xf32> -> vector<2x48xf32>
    %276 = arith.addf %274, %275 : vector<2x48xf32>
    %277 = arith.negf %276 : vector<2x48xf32>
    %278 = math.exp %277 : vector<2x48xf32>
    %cst_105 = arith.constant 1.000000e+00 : f32
    %279 = vector.broadcast %cst_105 : f32 to vector<2x48xf32>
    %280 = arith.addf %279, %278 : vector<2x48xf32>
    %281 = arith.divf %279, %280 : vector<2x48xf32>
    %282 = vector.extract_strided_slice %34 {offsets = [12, 0], sizes = [2, 48], strides = [1, 1]} : vector<16x48xf32> to vector<2x48xf32>
    %cst_106 = arith.constant dense<0.000000e+00> : vector<2x48xf32>
    %283 = tpu.matmul %261, %11, %cst_106 {dimension_numbers = #tpu.dot_dimension_numbers<[1], [0], [0], [1], [0, 0, 1, 1], [], []>} : vector<2x48xf32>, vector<48x48xf32>, vector<2x48xf32> -> vector<2x48xf32>
    %284 = arith.addf %282, %283 : vector<2x48xf32>
    %285 = math.tanh %284 : vector<2x48xf32>
    %286 = vector.extract_strided_slice %41 {offsets = [12, 0], sizes = [2, 48], strides = [1, 1]} : vector<16x48xf32> to vector<2x48xf32>
    %cst_107 = arith.constant dense<0.000000e+00> : vector<2x48xf32>
    %287 = tpu.matmul %261, %13, %cst_107 {dimension_numbers = #tpu.dot_dimension_numbers<[1], [0], [0], [1], [0, 0, 1, 1], [], []>} : vector<2x48xf32>, vector<48x48xf32>, vector<2x48xf32> -> vector<2x48xf32>
    %288 = arith.addf %286, %287 : vector<2x48xf32>
    %289 = arith.negf %288 : vector<2x48xf32>
    %290 = math.exp %289 : vector<2x48xf32>
    %cst_108 = arith.constant 1.000000e+00 : f32
    %291 = vector.broadcast %cst_108 : f32 to vector<2x48xf32>
    %292 = arith.addf %291, %290 : vector<2x48xf32>
    %293 = arith.divf %291, %292 : vector<2x48xf32>
    %294 = arith.mulf %281, %259 : vector<2x48xf32>
    %295 = arith.mulf %273, %285 : vector<2x48xf32>
    %296 = arith.addf %294, %295 : vector<2x48xf32>
    %297 = math.tanh %296 : vector<2x48xf32>
    %298 = arith.mulf %293, %297 : vector<2x48xf32>
    %299 = vector.extract_strided_slice %298 {offsets = [0, 0], sizes = [1, 48], strides = [1, 1]} : vector<2x48xf32> to vector<1x48xf32>
    %c6 = arith.constant 6 : index
    %c0_109 = arith.constant 0 : index
    %300 = vector.load %arg26[%c6, %c0_109] : memref<16x48xf32, #tpu.memory_space<vmem>>, vector<1x48xf32>
    tpu.vector_store %arg26[%c6, %c0_109], %299 {strides = array<i32>} : memref<16x48xf32, #tpu.memory_space<vmem>>, vector<1x48xf32>,
    %301 = vector.extract_strided_slice %298 {offsets = [1, 0], sizes = [1, 48], strides = [1, 1]} : vector<2x48xf32> to vector<1x48xf32>
    %c14 = arith.constant 14 : index
    %c0_110 = arith.constant 0 : index
    %302 = vector.load %arg26[%c14, %c0_110] : memref<16x48xf32, #tpu.memory_space<vmem>>, vector<1x48xf32>
    tpu.vector_store %arg26[%c14, %c0_110], %301 {strides = array<i32>} : memref<16x48xf32, #tpu.memory_space<vmem>>, vector<1x48xf32>,
    %303 = vector.extract_strided_slice %20 {offsets = [14, 0], sizes = [2, 48], strides = [1, 1]} : vector<16x48xf32> to vector<2x48xf32>
    %cst_111 = arith.constant dense<0.000000e+00> : vector<2x48xf32>
    %304 = tpu.matmul %298, %7, %cst_111 {dimension_numbers = #tpu.dot_dimension_numbers<[1], [0], [0], [1], [0, 0, 1, 1], [], []>} : vector<2x48xf32>, vector<48x48xf32>, vector<2x48xf32> -> vector<2x48xf32>
    %305 = arith.addf %303, %304 : vector<2x48xf32>
    %306 = arith.negf %305 : vector<2x48xf32>
    %307 = math.exp %306 : vector<2x48xf32>
    %cst_112 = arith.constant 1.000000e+00 : f32
    %308 = vector.broadcast %cst_112 : f32 to vector<2x48xf32>
    %309 = arith.addf %308, %307 : vector<2x48xf32>
    %310 = arith.divf %308, %309 : vector<2x48xf32>
    %311 = vector.extract_strided_slice %27 {offsets = [14, 0], sizes = [2, 48], strides = [1, 1]} : vector<16x48xf32> to vector<2x48xf32>
    %cst_113 = arith.constant dense<0.000000e+00> : vector<2x48xf32>
    %312 = tpu.matmul %298, %9, %cst_113 {dimension_numbers = #tpu.dot_dimension_numbers<[1], [0], [0], [1], [0, 0, 1, 1], [], []>} : vector<2x48xf32>, vector<48x48xf32>, vector<2x48xf32> -> vector<2x48xf32>
    %313 = arith.addf %311, %312 : vector<2x48xf32>
    %314 = arith.negf %313 : vector<2x48xf32>
    %315 = math.exp %314 : vector<2x48xf32>
    %cst_114 = arith.constant 1.000000e+00 : f32
    %316 = vector.broadcast %cst_114 : f32 to vector<2x48xf32>
    %317 = arith.addf %316, %315 : vector<2x48xf32>
    %318 = arith.divf %316, %317 : vector<2x48xf32>
    %319 = vector.extract_strided_slice %34 {offsets = [14, 0], sizes = [2, 48], strides = [1, 1]} : vector<16x48xf32> to vector<2x48xf32>
    %cst_115 = arith.constant dense<0.000000e+00> : vector<2x48xf32>
    %320 = tpu.matmul %298, %11, %cst_115 {dimension_numbers = #tpu.dot_dimension_numbers<[1], [0], [0], [1], [0, 0, 1, 1], [], []>} : vector<2x48xf32>, vector<48x48xf32>, vector<2x48xf32> -> vector<2x48xf32>
    %321 = arith.addf %319, %320 : vector<2x48xf32>
    %322 = math.tanh %321 : vector<2x48xf32>
    %323 = vector.extract_strided_slice %41 {offsets = [14, 0], sizes = [2, 48], strides = [1, 1]} : vector<16x48xf32> to vector<2x48xf32>
    %cst_116 = arith.constant dense<0.000000e+00> : vector<2x48xf32>
    %324 = tpu.matmul %298, %13, %cst_116 {dimension_numbers = #tpu.dot_dimension_numbers<[1], [0], [0], [1], [0, 0, 1, 1], [], []>} : vector<2x48xf32>, vector<48x48xf32>, vector<2x48xf32> -> vector<2x48xf32>
    %325 = arith.addf %323, %324 : vector<2x48xf32>
    %326 = arith.negf %325 : vector<2x48xf32>
    %327 = math.exp %326 : vector<2x48xf32>
    %cst_117 = arith.constant 1.000000e+00 : f32
    %328 = vector.broadcast %cst_117 : f32 to vector<2x48xf32>
    %329 = arith.addf %328, %327 : vector<2x48xf32>
    %330 = arith.divf %328, %329 : vector<2x48xf32>
    %331 = arith.mulf %318, %296 : vector<2x48xf32>
    %332 = arith.mulf %310, %322 : vector<2x48xf32>
    %333 = arith.addf %331, %332 : vector<2x48xf32>
    %334 = math.tanh %333 : vector<2x48xf32>
    %335 = arith.mulf %330, %334 : vector<2x48xf32>
    %336 = vector.extract_strided_slice %335 {offsets = [0, 0], sizes = [1, 48], strides = [1, 1]} : vector<2x48xf32> to vector<1x48xf32>
    %c7 = arith.constant 7 : index
    %c0_118 = arith.constant 0 : index
    %337 = vector.load %arg26[%c7, %c0_118] : memref<16x48xf32, #tpu.memory_space<vmem>>, vector<1x48xf32>
    tpu.vector_store %arg26[%c7, %c0_118], %336 {strides = array<i32>} : memref<16x48xf32, #tpu.memory_space<vmem>>, vector<1x48xf32>,
    %338 = vector.extract_strided_slice %335 {offsets = [1, 0], sizes = [1, 48], strides = [1, 1]} : vector<2x48xf32> to vector<1x48xf32>
    %c15 = arith.constant 15 : index
    %c0_119 = arith.constant 0 : index
    %339 = vector.load %arg26[%c15, %c0_119] : memref<16x48xf32, #tpu.memory_space<vmem>>, vector<1x48xf32>
    tpu.vector_store %arg26[%c15, %c0_119], %338 {strides = array<i32>} : memref<16x48xf32, #tpu.memory_space<vmem>>, vector<1x48xf32>,
    %c0_120 = arith.constant 0 : index
    %c0_121 = arith.constant 0 : index
    %340 = vector.load %arg26[%c0_120, %c0_121] : memref<16x48xf32, #tpu.memory_space<vmem>>, vector<16x48xf32>
    %c0_122 = arith.constant 0 : index
    %c0_123 = arith.constant 0 : index
    %341 = vector.load %arg1[%c0_122, %c0_123] : memref<2x8xf32, #tpu.memory_space<vmem>>, vector<2x8xf32>
    %cst_124 = arith.constant 1.000000e+00 : f32
    %342 = vector.broadcast %cst_124 : f32 to vector<2x8xf32>
    %343 = arith.subf %342, %341 : vector<2x8xf32>
    %cst_125 = arith.constant -1.000000e+04 : f32
    %344 = vector.broadcast %cst_125 : f32 to vector<2x8xf32>
    %345 = arith.mulf %343, %344 : vector<2x8xf32>
    %346 = vector.shape_cast %345 : vector<2x8xf32> to vector<2x1x8xf32>
    %c0_126 = arith.constant 0 : index
    %c0_127 = arith.constant 0 : index
    %347 = vector.load %arg14[%c0_126, %c0_127] : memref<1x48xf32, #tpu.memory_space<vmem>>, vector<1x48xf32>
    %c0_128 = arith.constant 0 : index
    %c0_129 = arith.constant 0 : index
    %c0_130 = arith.constant 0 : index
    %348 = vector.load %arg7[%c0_128, %c0_129, %c0_130] : memref<4x48x12xf32, #tpu.memory_space<vmem>>, vector<1x48x12xf32>
    %349 = vector.shape_cast %348 : vector<1x48x12xf32> to vector<48x12xf32>
    %cst_131 = arith.constant dense<0.000000e+00> : vector<16x12xf32>
    %350 = tpu.matmul %340, %349, %cst_131 {dimension_numbers = #tpu.dot_dimension_numbers<[1], [0], [0], [1], [0, 0, 1, 1], [], []>} : vector<16x48xf32>, vector<48x12xf32>, vector<16x12xf32> -> vector<16x12xf32>
    %c0_132 = arith.constant 0 : index
    %c0_133 = arith.constant 0 : index
    %c0_134 = arith.constant 0 : index
    %351 = vector.load %arg8[%c0_132, %c0_133, %c0_134] : memref<4x1x12xf32, #tpu.memory_space<vmem>>, vector<1x1x12xf32>
    %352 = vector.shape_cast %351 : vector<1x1x12xf32> to vector<1x12xf32>
    %353 = vector.broadcast %352 : vector<1x12xf32> to vector<16x12xf32>
    %354 = arith.addf %350, %353 : vector<16x12xf32>
    %355 = vector.shape_cast %354 : vector<16x12xf32> to vector<2x8x12xf32>
    %c0_135 = arith.constant 0 : index
    %c0_136 = arith.constant 0 : index
    %c0_137 = arith.constant 0 : index
    %356 = vector.load %arg9[%c0_135, %c0_136, %c0_137] : memref<4x48x12xf32, #tpu.memory_space<vmem>>, vector<1x48x12xf32>
    %357 = vector.shape_cast %356 : vector<1x48x12xf32> to vector<48x12xf32>
    %cst_138 = arith.constant dense<0.000000e+00> : vector<16x12xf32>
    %358 = tpu.matmul %340, %357, %cst_138 {dimension_numbers = #tpu.dot_dimension_numbers<[1], [0], [0], [1], [0, 0, 1, 1], [], []>} : vector<16x48xf32>, vector<48x12xf32>, vector<16x12xf32> -> vector<16x12xf32>
    %c0_139 = arith.constant 0 : index
    %c0_140 = arith.constant 0 : index
    %c0_141 = arith.constant 0 : index
    %359 = vector.load %arg10[%c0_139, %c0_140, %c0_141] : memref<4x1x12xf32, #tpu.memory_space<vmem>>, vector<1x1x12xf32>
    %360 = vector.shape_cast %359 : vector<1x1x12xf32> to vector<1x12xf32>
    %361 = vector.broadcast %360 : vector<1x12xf32> to vector<16x12xf32>
    %362 = arith.addf %358, %361 : vector<16x12xf32>
    %363 = vector.shape_cast %362 : vector<16x12xf32> to vector<2x8x12xf32>
    %c0_142 = arith.constant 0 : index
    %c0_143 = arith.constant 0 : index
    %c0_144 = arith.constant 0 : index
    %364 = vector.load %arg11[%c0_142, %c0_143, %c0_144] : memref<4x48x12xf32, #tpu.memory_space<vmem>>, vector<1x48x12xf32>
    %365 = vector.shape_cast %364 : vector<1x48x12xf32> to vector<48x12xf32>
    %cst_145 = arith.constant dense<0.000000e+00> : vector<16x12xf32>
    %366 = tpu.matmul %340, %365, %cst_145 {dimension_numbers = #tpu.dot_dimension_numbers<[1], [0], [0], [1], [0, 0, 1, 1], [], []>} : vector<16x48xf32>, vector<48x12xf32>, vector<16x12xf32> -> vector<16x12xf32>
    %c0_146 = arith.constant 0 : index
    %c0_147 = arith.constant 0 : index
    %c0_148 = arith.constant 0 : index
    %367 = vector.load %arg12[%c0_146, %c0_147, %c0_148] : memref<4x1x12xf32, #tpu.memory_space<vmem>>, vector<1x1x12xf32>
    %368 = vector.shape_cast %367 : vector<1x1x12xf32> to vector<1x12xf32>
    %369 = vector.broadcast %368 : vector<1x12xf32> to vector<16x12xf32>
    %370 = arith.addf %366, %369 : vector<16x12xf32>
    %371 = vector.shape_cast %370 : vector<16x12xf32> to vector<2x8x12xf32>
    "tpu.trace_start"() <{level = 10 : i32, message = "bqd,bkd->bqk"}> : () -> ()
    %cst_149 = arith.constant dense<0.000000e+00> : vector<2x8x8xf32>
    %372 = tpu.matmul %355, %363, %cst_149 {dimension_numbers = #tpu.dot_dimension_numbers<[2], [2], [1], [1], [0, 0, 0, 1, 1, 1], [0], [0]>} : vector<2x8x12xf32>, vector<2x8x12xf32>, vector<2x8x8xf32> -> vector<2x8x8xf32>
    "tpu.trace_stop"() : () -> ()
    %cst_150 = arith.constant 0.288675129 : f32
    %373 = vector.broadcast %cst_150 : f32 to vector<2x8x8xf32>
    %374 = arith.mulf %372, %373 : vector<2x8x8xf32>
    %375 = vector.broadcast %346 : vector<2x1x8xf32> to vector<2x8x8xf32>
    %376 = arith.addf %374, %375 : vector<2x8x8xf32>
    %cst_151 = arith.constant dense<0xFF800000> : vector<2x8xf32>
    %377 = vector.multi_reduction <maximumf>, %376, %cst_151 [2] : vector<2x8x8xf32> to vector<2x8xf32>
    %378 = vector.shape_cast %377 : vector<2x8xf32> to vector<2x8x1xf32>
    %379 = vector.broadcast %378 : vector<2x8x1xf32> to vector<2x8x8xf32>
    %380 = arith.subf %376, %379 : vector<2x8x8xf32>
    %381 = math.exp %380 : vector<2x8x8xf32>
    %cst_152 = arith.constant dense<0.000000e+00> : vector<2x8xf32>
    %382 = vector.multi_reduction <add>, %381, %cst_152 [2] : vector<2x8x8xf32> to vector<2x8xf32>
    %383 = vector.shape_cast %382 : vector<2x8xf32> to vector<2x8x1xf32>
    %384 = tpu.reciprocal %383 {approx = true} : vector<2x8x1xf32> -> vector<2x8x1xf32>
    %385 = vector.broadcast %384 : vector<2x8x1xf32> to vector<2x8x8xf32>
    %386 = arith.mulf %381, %385 : vector<2x8x8xf32>
    "tpu.trace_start"() <{level = 10 : i32, message = "bqk,bkd->bqd"}> : () -> ()
    %cst_153 = arith.constant dense<0.000000e+00> : vector<2x8x12xf32>
    %387 = tpu.matmul %386, %371, %cst_153 {dimension_numbers = #tpu.dot_dimension_numbers<[2], [1], [1], [2], [0, 0, 0, 1, 1, 2], [0], [0]>} : vector<2x8x8xf32>, vector<2x8x12xf32>, vector<2x8x12xf32> -> vector<2x8x12xf32>
    "tpu.trace_stop"() : () -> ()
    %388 = vector.shape_cast %387 : vector<2x8x12xf32> to vector<16x12xf32>
    %c0_154 = arith.constant 0 : index
    %c0_155 = arith.constant 0 : index
    %c0_156 = arith.constant 0 : index
    %389 = vector.load %arg13[%c0_154, %c0_155, %c0_156] : memref<4x12x48xf32, #tpu.memory_space<vmem>>, vector<1x12x48xf32>
    %390 = vector.shape_cast %389 : vector<1x12x48xf32> to vector<12x48xf32>
    %cst_157 = arith.constant dense<0.000000e+00> : vector<16x48xf32>
    %391 = tpu.matmul %388, %390, %cst_157 {dimension_numbers = #tpu.dot_dimension_numbers<[1], [0], [0], [1], [0, 0, 1, 1], [], []>} : vector<16x12xf32>, vector<12x48xf32>, vector<16x48xf32> -> vector<16x48xf32>
    %392 = vector.broadcast %347 : vector<1x48xf32> to vector<16x48xf32>
    %393 = arith.addf %392, %391 : vector<16x48xf32>
    %c1_158 = arith.constant 1 : index
    %c0_159 = arith.constant 0 : index
    %c0_160 = arith.constant 0 : index
    %394 = vector.load %arg7[%c1_158, %c0_159, %c0_160] : memref<4x48x12xf32, #tpu.memory_space<vmem>>, vector<1x48x12xf32>
    %395 = vector.shape_cast %394 : vector<1x48x12xf32> to vector<48x12xf32>
    %cst_161 = arith.constant dense<0.000000e+00> : vector<16x12xf32>
    %396 = tpu.matmul %340, %395, %cst_161 {dimension_numbers = #tpu.dot_dimension_numbers<[1], [0], [0], [1], [0, 0, 1, 1], [], []>} : vector<16x48xf32>, vector<48x12xf32>, vector<16x12xf32> -> vector<16x12xf32>
    %c1_162 = arith.constant 1 : index
    %c0_163 = arith.constant 0 : index
    %c0_164 = arith.constant 0 : index
    %397 = vector.load %arg8[%c1_162, %c0_163, %c0_164] : memref<4x1x12xf32, #tpu.memory_space<vmem>>, vector<1x1x12xf32>
    %398 = vector.shape_cast %397 : vector<1x1x12xf32> to vector<1x12xf32>
    %399 = vector.broadcast %398 : vector<1x12xf32> to vector<16x12xf32>
    %400 = arith.addf %396, %399 : vector<16x12xf32>
    %401 = vector.shape_cast %400 : vector<16x12xf32> to vector<2x8x12xf32>
    %c1_165 = arith.constant 1 : index
    %c0_166 = arith.constant 0 : index
    %c0_167 = arith.constant 0 : index
    %402 = vector.load %arg9[%c1_165, %c0_166, %c0_167] : memref<4x48x12xf32, #tpu.memory_space<vmem>>, vector<1x48x12xf32>
    %403 = vector.shape_cast %402 : vector<1x48x12xf32> to vector<48x12xf32>
    %cst_168 = arith.constant dense<0.000000e+00> : vector<16x12xf32>
    %404 = tpu.matmul %340, %403, %cst_168 {dimension_numbers = #tpu.dot_dimension_numbers<[1], [0], [0], [1], [0, 0, 1, 1], [], []>} : vector<16x48xf32>, vector<48x12xf32>, vector<16x12xf32> -> vector<16x12xf32>
    %c1_169 = arith.constant 1 : index
    %c0_170 = arith.constant 0 : index
    %c0_171 = arith.constant 0 : index
    %405 = vector.load %arg10[%c1_169, %c0_170, %c0_171] : memref<4x1x12xf32, #tpu.memory_space<vmem>>, vector<1x1x12xf32>
    %406 = vector.shape_cast %405 : vector<1x1x12xf32> to vector<1x12xf32>
    %407 = vector.broadcast %406 : vector<1x12xf32> to vector<16x12xf32>
    %408 = arith.addf %404, %407 : vector<16x12xf32>
    %409 = vector.shape_cast %408 : vector<16x12xf32> to vector<2x8x12xf32>
    %c1_172 = arith.constant 1 : index
    %c0_173 = arith.constant 0 : index
    %c0_174 = arith.constant 0 : index
    %410 = vector.load %arg11[%c1_172, %c0_173, %c0_174] : memref<4x48x12xf32, #tpu.memory_space<vmem>>, vector<1x48x12xf32>
    %411 = vector.shape_cast %410 : vector<1x48x12xf32> to vector<48x12xf32>
    %cst_175 = arith.constant dense<0.000000e+00> : vector<16x12xf32>
    %412 = tpu.matmul %340, %411, %cst_175 {dimension_numbers = #tpu.dot_dimension_numbers<[1], [0], [0], [1], [0, 0, 1, 1], [], []>} : vector<16x48xf32>, vector<48x12xf32>, vector<16x12xf32> -> vector<16x12xf32>
    %c1_176 = arith.constant 1 : index
    %c0_177 = arith.constant 0 : index
    %c0_178 = arith.constant 0 : index
    %413 = vector.load %arg12[%c1_176, %c0_177, %c0_178] : memref<4x1x12xf32, #tpu.memory_space<vmem>>, vector<1x1x12xf32>
    %414 = vector.shape_cast %413 : vector<1x1x12xf32> to vector<1x12xf32>
    %415 = vector.broadcast %414 : vector<1x12xf32> to vector<16x12xf32>
    %416 = arith.addf %412, %415 : vector<16x12xf32>
    %417 = vector.shape_cast %416 : vector<16x12xf32> to vector<2x8x12xf32>
    "tpu.trace_start"() <{level = 10 : i32, message = "bqd,bkd->bqk"}> : () -> ()
    %cst_179 = arith.constant dense<0.000000e+00> : vector<2x8x8xf32>
    %418 = tpu.matmul %401, %409, %cst_179 {dimension_numbers = #tpu.dot_dimension_numbers<[2], [2], [1], [1], [0, 0, 0, 1, 1, 1], [0], [0]>} : vector<2x8x12xf32>, vector<2x8x12xf32>, vector<2x8x8xf32> -> vector<2x8x8xf32>
    "tpu.trace_stop"() : () -> ()
    %cst_180 = arith.constant 0.288675129 : f32
    %419 = vector.broadcast %cst_180 : f32 to vector<2x8x8xf32>
    %420 = arith.mulf %418, %419 : vector<2x8x8xf32>
    %421 = vector.broadcast %346 : vector<2x1x8xf32> to vector<2x8x8xf32>
    %422 = arith.addf %420, %421 : vector<2x8x8xf32>
    %cst_181 = arith.constant dense<0xFF800000> : vector<2x8xf32>
    %423 = vector.multi_reduction <maximumf>, %422, %cst_181 [2] : vector<2x8x8xf32> to vector<2x8xf32>
    %424 = vector.shape_cast %423 : vector<2x8xf32> to vector<2x8x1xf32>
    %425 = vector.broadcast %424 : vector<2x8x1xf32> to vector<2x8x8xf32>
    %426 = arith.subf %422, %425 : vector<2x8x8xf32>
    %427 = math.exp %426 : vector<2x8x8xf32>
    %cst_182 = arith.constant dense<0.000000e+00> : vector<2x8xf32>
    %428 = vector.multi_reduction <add>, %427, %cst_182 [2] : vector<2x8x8xf32> to vector<2x8xf32>
    %429 = vector.shape_cast %428 : vector<2x8xf32> to vector<2x8x1xf32>
    %430 = tpu.reciprocal %429 {approx = true} : vector<2x8x1xf32> -> vector<2x8x1xf32>
    %431 = vector.broadcast %430 : vector<2x8x1xf32> to vector<2x8x8xf32>
    %432 = arith.mulf %427, %431 : vector<2x8x8xf32>
    "tpu.trace_start"() <{level = 10 : i32, message = "bqk,bkd->bqd"}> : () -> ()
    %cst_183 = arith.constant dense<0.000000e+00> : vector<2x8x12xf32>
    %433 = tpu.matmul %432, %417, %cst_183 {dimension_numbers = #tpu.dot_dimension_numbers<[2], [1], [1], [2], [0, 0, 0, 1, 1, 2], [0], [0]>} : vector<2x8x8xf32>, vector<2x8x12xf32>, vector<2x8x12xf32> -> vector<2x8x12xf32>
    "tpu.trace_stop"() : () -> ()
    %434 = vector.shape_cast %433 : vector<2x8x12xf32> to vector<16x12xf32>
    %c1_184 = arith.constant 1 : index
    %c0_185 = arith.constant 0 : index
    %c0_186 = arith.constant 0 : index
    %435 = vector.load %arg13[%c1_184, %c0_185, %c0_186] : memref<4x12x48xf32, #tpu.memory_space<vmem>>, vector<1x12x48xf32>
    %436 = vector.shape_cast %435 : vector<1x12x48xf32> to vector<12x48xf32>
    %cst_187 = arith.constant dense<0.000000e+00> : vector<16x48xf32>
    %437 = tpu.matmul %434, %436, %cst_187 {dimension_numbers = #tpu.dot_dimension_numbers<[1], [0], [0], [1], [0, 0, 1, 1], [], []>} : vector<16x12xf32>, vector<12x48xf32>, vector<16x48xf32> -> vector<16x48xf32>
    %438 = arith.addf %393, %437 : vector<16x48xf32>
    %c2_188 = arith.constant 2 : index
    %c0_189 = arith.constant 0 : index
    %c0_190 = arith.constant 0 : index
    %439 = vector.load %arg7[%c2_188, %c0_189, %c0_190] : memref<4x48x12xf32, #tpu.memory_space<vmem>>, vector<1x48x12xf32>
    %440 = vector.shape_cast %439 : vector<1x48x12xf32> to vector<48x12xf32>
    %cst_191 = arith.constant dense<0.000000e+00> : vector<16x12xf32>
    %441 = tpu.matmul %340, %440, %cst_191 {dimension_numbers = #tpu.dot_dimension_numbers<[1], [0], [0], [1], [0, 0, 1, 1], [], []>} : vector<16x48xf32>, vector<48x12xf32>, vector<16x12xf32> -> vector<16x12xf32>
    %c2_192 = arith.constant 2 : index
    %c0_193 = arith.constant 0 : index
    %c0_194 = arith.constant 0 : index
    %442 = vector.load %arg8[%c2_192, %c0_193, %c0_194] : memref<4x1x12xf32, #tpu.memory_space<vmem>>, vector<1x1x12xf32>
    %443 = vector.shape_cast %442 : vector<1x1x12xf32> to vector<1x12xf32>
    %444 = vector.broadcast %443 : vector<1x12xf32> to vector<16x12xf32>
    %445 = arith.addf %441, %444 : vector<16x12xf32>
    %446 = vector.shape_cast %445 : vector<16x12xf32> to vector<2x8x12xf32>
    %c2_195 = arith.constant 2 : index
    %c0_196 = arith.constant 0 : index
    %c0_197 = arith.constant 0 : index
    %447 = vector.load %arg9[%c2_195, %c0_196, %c0_197] : memref<4x48x12xf32, #tpu.memory_space<vmem>>, vector<1x48x12xf32>
    %448 = vector.shape_cast %447 : vector<1x48x12xf32> to vector<48x12xf32>
    %cst_198 = arith.constant dense<0.000000e+00> : vector<16x12xf32>
    %449 = tpu.matmul %340, %448, %cst_198 {dimension_numbers = #tpu.dot_dimension_numbers<[1], [0], [0], [1], [0, 0, 1, 1], [], []>} : vector<16x48xf32>, vector<48x12xf32>, vector<16x12xf32> -> vector<16x12xf32>
    %c2_199 = arith.constant 2 : index
    %c0_200 = arith.constant 0 : index
    %c0_201 = arith.constant 0 : index
    %450 = vector.load %arg10[%c2_199, %c0_200, %c0_201] : memref<4x1x12xf32, #tpu.memory_space<vmem>>, vector<1x1x12xf32>
    %451 = vector.shape_cast %450 : vector<1x1x12xf32> to vector<1x12xf32>
    %452 = vector.broadcast %451 : vector<1x12xf32> to vector<16x12xf32>
    %453 = arith.addf %449, %452 : vector<16x12xf32>
    %454 = vector.shape_cast %453 : vector<16x12xf32> to vector<2x8x12xf32>
    %c2_202 = arith.constant 2 : index
    %c0_203 = arith.constant 0 : index
    %c0_204 = arith.constant 0 : index
    %455 = vector.load %arg11[%c2_202, %c0_203, %c0_204] : memref<4x48x12xf32, #tpu.memory_space<vmem>>, vector<1x48x12xf32>
    %456 = vector.shape_cast %455 : vector<1x48x12xf32> to vector<48x12xf32>
    %cst_205 = arith.constant dense<0.000000e+00> : vector<16x12xf32>
    %457 = tpu.matmul %340, %456, %cst_205 {dimension_numbers = #tpu.dot_dimension_numbers<[1], [0], [0], [1], [0, 0, 1, 1], [], []>} : vector<16x48xf32>, vector<48x12xf32>, vector<16x12xf32> -> vector<16x12xf32>
    %c2_206 = arith.constant 2 : index
    %c0_207 = arith.constant 0 : index
    %c0_208 = arith.constant 0 : index
    %458 = vector.load %arg12[%c2_206, %c0_207, %c0_208] : memref<4x1x12xf32, #tpu.memory_space<vmem>>, vector<1x1x12xf32>
    %459 = vector.shape_cast %458 : vector<1x1x12xf32> to vector<1x12xf32>
    %460 = vector.broadcast %459 : vector<1x12xf32> to vector<16x12xf32>
    %461 = arith.addf %457, %460 : vector<16x12xf32>
    %462 = vector.shape_cast %461 : vector<16x12xf32> to vector<2x8x12xf32>
    "tpu.trace_start"() <{level = 10 : i32, message = "bqd,bkd->bqk"}> : () -> ()
    %cst_209 = arith.constant dense<0.000000e+00> : vector<2x8x8xf32>
    %463 = tpu.matmul %446, %454, %cst_209 {dimension_numbers = #tpu.dot_dimension_numbers<[2], [2], [1], [1], [0, 0, 0, 1, 1, 1], [0], [0]>} : vector<2x8x12xf32>, vector<2x8x12xf32>, vector<2x8x8xf32> -> vector<2x8x8xf32>
    "tpu.trace_stop"() : () -> ()
    %cst_210 = arith.constant 0.288675129 : f32
    %464 = vector.broadcast %cst_210 : f32 to vector<2x8x8xf32>
    %465 = arith.mulf %463, %464 : vector<2x8x8xf32>
    %466 = vector.broadcast %346 : vector<2x1x8xf32> to vector<2x8x8xf32>
    %467 = arith.addf %465, %466 : vector<2x8x8xf32>
    %cst_211 = arith.constant dense<0xFF800000> : vector<2x8xf32>
    %468 = vector.multi_reduction <maximumf>, %467, %cst_211 [2] : vector<2x8x8xf32> to vector<2x8xf32>
    %469 = vector.shape_cast %468 : vector<2x8xf32> to vector<2x8x1xf32>
    %470 = vector.broadcast %469 : vector<2x8x1xf32> to vector<2x8x8xf32>
    %471 = arith.subf %467, %470 : vector<2x8x8xf32>
    %472 = math.exp %471 : vector<2x8x8xf32>
    %cst_212 = arith.constant dense<0.000000e+00> : vector<2x8xf32>
    %473 = vector.multi_reduction <add>, %472, %cst_212 [2] : vector<2x8x8xf32> to vector<2x8xf32>
    %474 = vector.shape_cast %473 : vector<2x8xf32> to vector<2x8x1xf32>
    %475 = tpu.reciprocal %474 {approx = true} : vector<2x8x1xf32> -> vector<2x8x1xf32>
    %476 = vector.broadcast %475 : vector<2x8x1xf32> to vector<2x8x8xf32>
    %477 = arith.mulf %472, %476 : vector<2x8x8xf32>
    "tpu.trace_start"() <{level = 10 : i32, message = "bqk,bkd->bqd"}> : () -> ()
    %cst_213 = arith.constant dense<0.000000e+00> : vector<2x8x12xf32>
    %478 = tpu.matmul %477, %462, %cst_213 {dimension_numbers = #tpu.dot_dimension_numbers<[2], [1], [1], [2], [0, 0, 0, 1, 1, 2], [0], [0]>} : vector<2x8x8xf32>, vector<2x8x12xf32>, vector<2x8x12xf32> -> vector<2x8x12xf32>
    "tpu.trace_stop"() : () -> ()
    %479 = vector.shape_cast %478 : vector<2x8x12xf32> to vector<16x12xf32>
    %c2_214 = arith.constant 2 : index
    %c0_215 = arith.constant 0 : index
    %c0_216 = arith.constant 0 : index
    %480 = vector.load %arg13[%c2_214, %c0_215, %c0_216] : memref<4x12x48xf32, #tpu.memory_space<vmem>>, vector<1x12x48xf32>
    %481 = vector.shape_cast %480 : vector<1x12x48xf32> to vector<12x48xf32>
    %cst_217 = arith.constant dense<0.000000e+00> : vector<16x48xf32>
    %482 = tpu.matmul %479, %481, %cst_217 {dimension_numbers = #tpu.dot_dimension_numbers<[1], [0], [0], [1], [0, 0, 1, 1], [], []>} : vector<16x12xf32>, vector<12x48xf32>, vector<16x48xf32> -> vector<16x48xf32>
    %483 = arith.addf %438, %482 : vector<16x48xf32>
    %c3_218 = arith.constant 3 : index
    %c0_219 = arith.constant 0 : index
    %c0_220 = arith.constant 0 : index
    %484 = vector.load %arg7[%c3_218, %c0_219, %c0_220] : memref<4x48x12xf32, #tpu.memory_space<vmem>>, vector<1x48x12xf32>
    %485 = vector.shape_cast %484 : vector<1x48x12xf32> to vector<48x12xf32>
    %cst_221 = arith.constant dense<0.000000e+00> : vector<16x12xf32>
    %486 = tpu.matmul %340, %485, %cst_221 {dimension_numbers = #tpu.dot_dimension_numbers<[1], [0], [0], [1], [0, 0, 1, 1], [], []>} : vector<16x48xf32>, vector<48x12xf32>, vector<16x12xf32> -> vector<16x12xf32>
    %c3_222 = arith.constant 3 : index
    %c0_223 = arith.constant 0 : index
    %c0_224 = arith.constant 0 : index
    %487 = vector.load %arg8[%c3_222, %c0_223, %c0_224] : memref<4x1x12xf32, #tpu.memory_space<vmem>>, vector<1x1x12xf32>
    %488 = vector.shape_cast %487 : vector<1x1x12xf32> to vector<1x12xf32>
    %489 = vector.broadcast %488 : vector<1x12xf32> to vector<16x12xf32>
    %490 = arith.addf %486, %489 : vector<16x12xf32>
    %491 = vector.shape_cast %490 : vector<16x12xf32> to vector<2x8x12xf32>
    %c3_225 = arith.constant 3 : index
    %c0_226 = arith.constant 0 : index
    %c0_227 = arith.constant 0 : index
    %492 = vector.load %arg9[%c3_225, %c0_226, %c0_227] : memref<4x48x12xf32, #tpu.memory_space<vmem>>, vector<1x48x12xf32>
    %493 = vector.shape_cast %492 : vector<1x48x12xf32> to vector<48x12xf32>
    %cst_228 = arith.constant dense<0.000000e+00> : vector<16x12xf32>
    %494 = tpu.matmul %340, %493, %cst_228 {dimension_numbers = #tpu.dot_dimension_numbers<[1], [0], [0], [1], [0, 0, 1, 1], [], []>} : vector<16x48xf32>, vector<48x12xf32>, vector<16x12xf32> -> vector<16x12xf32>
    %c3_229 = arith.constant 3 : index
    %c0_230 = arith.constant 0 : index
    %c0_231 = arith.constant 0 : index
    %495 = vector.load %arg10[%c3_229, %c0_230, %c0_231] : memref<4x1x12xf32, #tpu.memory_space<vmem>>, vector<1x1x12xf32>
    %496 = vector.shape_cast %495 : vector<1x1x12xf32> to vector<1x12xf32>
    %497 = vector.broadcast %496 : vector<1x12xf32> to vector<16x12xf32>
    %498 = arith.addf %494, %497 : vector<16x12xf32>
    %499 = vector.shape_cast %498 : vector<16x12xf32> to vector<2x8x12xf32>
    %c3_232 = arith.constant 3 : index
    %c0_233 = arith.constant 0 : index
    %c0_234 = arith.constant 0 : index
    %500 = vector.load %arg11[%c3_232, %c0_233, %c0_234] : memref<4x48x12xf32, #tpu.memory_space<vmem>>, vector<1x48x12xf32>
    %501 = vector.shape_cast %500 : vector<1x48x12xf32> to vector<48x12xf32>
    %cst_235 = arith.constant dense<0.000000e+00> : vector<16x12xf32>
    %502 = tpu.matmul %340, %501, %cst_235 {dimension_numbers = #tpu.dot_dimension_numbers<[1], [0], [0], [1], [0, 0, 1, 1], [], []>} : vector<16x48xf32>, vector<48x12xf32>, vector<16x12xf32> -> vector<16x12xf32>
    %c3_236 = arith.constant 3 : index
    %c0_237 = arith.constant 0 : index
    %c0_238 = arith.constant 0 : index
    %503 = vector.load %arg12[%c3_236, %c0_237, %c0_238] : memref<4x1x12xf32, #tpu.memory_space<vmem>>, vector<1x1x12xf32>
    %504 = vector.shape_cast %503 : vector<1x1x12xf32> to vector<1x12xf32>
    %505 = vector.broadcast %504 : vector<1x12xf32> to vector<16x12xf32>
    %506 = arith.addf %502, %505 : vector<16x12xf32>
    %507 = vector.shape_cast %506 : vector<16x12xf32> to vector<2x8x12xf32>
    "tpu.trace_start"() <{level = 10 : i32, message = "bqd,bkd->bqk"}> : () -> ()
    %cst_239 = arith.constant dense<0.000000e+00> : vector<2x8x8xf32>
    %508 = tpu.matmul %491, %499, %cst_239 {dimension_numbers = #tpu.dot_dimension_numbers<[2], [2], [1], [1], [0, 0, 0, 1, 1, 1], [0], [0]>} : vector<2x8x12xf32>, vector<2x8x12xf32>, vector<2x8x8xf32> -> vector<2x8x8xf32>
    "tpu.trace_stop"() : () -> ()
    %cst_240 = arith.constant 0.288675129 : f32
    %509 = vector.broadcast %cst_240 : f32 to vector<2x8x8xf32>
    %510 = arith.mulf %508, %509 : vector<2x8x8xf32>
    %511 = vector.broadcast %346 : vector<2x1x8xf32> to vector<2x8x8xf32>
    %512 = arith.addf %510, %511 : vector<2x8x8xf32>
    %cst_241 = arith.constant dense<0xFF800000> : vector<2x8xf32>
    %513 = vector.multi_reduction <maximumf>, %512, %cst_241 [2] : vector<2x8x8xf32> to vector<2x8xf32>
    %514 = vector.shape_cast %513 : vector<2x8xf32> to vector<2x8x1xf32>
    %515 = vector.broadcast %514 : vector<2x8x1xf32> to vector<2x8x8xf32>
    %516 = arith.subf %512, %515 : vector<2x8x8xf32>
    %517 = math.exp %516 : vector<2x8x8xf32>
    %cst_242 = arith.constant dense<0.000000e+00> : vector<2x8xf32>
    %518 = vector.multi_reduction <add>, %517, %cst_242 [2] : vector<2x8x8xf32> to vector<2x8xf32>
    %519 = vector.shape_cast %518 : vector<2x8xf32> to vector<2x8x1xf32>
    %520 = tpu.reciprocal %519 {approx = true} : vector<2x8x1xf32> -> vector<2x8x1xf32>
    %521 = vector.broadcast %520 : vector<2x8x1xf32> to vector<2x8x8xf32>
    %522 = arith.mulf %517, %521 : vector<2x8x8xf32>
    "tpu.trace_start"() <{level = 10 : i32, message = "bqk,bkd->bqd"}> : () -> ()
    %cst_243 = arith.constant dense<0.000000e+00> : vector<2x8x12xf32>
    %523 = tpu.matmul %522, %507, %cst_243 {dimension_numbers = #tpu.dot_dimension_numbers<[2], [1], [1], [2], [0, 0, 0, 1, 1, 2], [0], [0]>} : vector<2x8x8xf32>, vector<2x8x12xf32>, vector<2x8x12xf32> -> vector<2x8x12xf32>
    "tpu.trace_stop"() : () -> ()
    %524 = vector.shape_cast %523 : vector<2x8x12xf32> to vector<16x12xf32>
    %c3_244 = arith.constant 3 : index
    %c0_245 = arith.constant 0 : index
    %c0_246 = arith.constant 0 : index
    %525 = vector.load %arg13[%c3_244, %c0_245, %c0_246] : memref<4x12x48xf32, #tpu.memory_space<vmem>>, vector<1x12x48xf32>
    %526 = vector.shape_cast %525 : vector<1x12x48xf32> to vector<12x48xf32>
    %cst_247 = arith.constant dense<0.000000e+00> : vector<16x48xf32>
    %527 = tpu.matmul %524, %526, %cst_247 {dimension_numbers = #tpu.dot_dimension_numbers<[1], [0], [0], [1], [0, 0, 1, 1], [], []>} : vector<16x12xf32>, vector<12x48xf32>, vector<16x48xf32> -> vector<16x48xf32>
    %528 = arith.addf %483, %527 : vector<16x48xf32>
    %529 = arith.addf %528, %340 : vector<16x48xf32>
    %c0_248 = arith.constant 0 : index
    %c0_249 = arith.constant 0 : index
    %530 = vector.load %arg15[%c0_248, %c0_249] : memref<1x48xf32, #tpu.memory_space<vmem>>, vector<1x48xf32>
    %c0_250 = arith.constant 0 : index
    %c0_251 = arith.constant 0 : index
    %531 = vector.load %arg16[%c0_250, %c0_251] : memref<1x48xf32, #tpu.memory_space<vmem>>, vector<1x48xf32>
    %cst_252 = arith.constant dense<0.000000e+00> : vector<16xf32>
    %532 = vector.multi_reduction <add>, %529, %cst_252 [1] : vector<16x48xf32> to vector<16xf32>
    %533 = vector.shape_cast %532 : vector<16xf32> to vector<16x1xf32>
    %cst_253 = arith.constant 4.800000e+01 : f32
    %534 = vector.broadcast %cst_253 : f32 to vector<16x1xf32>
    %535 = arith.divf %533, %534 : vector<16x1xf32>
    %536 = vector.broadcast %535 : vector<16x1xf32> to vector<16x48xf32>
    %537 = arith.subf %529, %536 : vector<16x48xf32>
    %538 = arith.mulf %537, %537 : vector<16x48xf32>
    %cst_254 = arith.constant dense<0.000000e+00> : vector<16xf32>
    %539 = vector.multi_reduction <add>, %538, %cst_254 [1] : vector<16x48xf32> to vector<16xf32>
    %540 = vector.shape_cast %539 : vector<16xf32> to vector<16x1xf32>
    %cst_255 = arith.constant 4.800000e+01 : f32
    %541 = vector.broadcast %cst_255 : f32 to vector<16x1xf32>
    %542 = arith.divf %540, %541 : vector<16x1xf32>
    %543 = vector.broadcast %535 : vector<16x1xf32> to vector<16x48xf32>
    %544 = arith.subf %529, %543 : vector<16x48xf32>
    %cst_256 = arith.constant 9.99999996E-13 : f32
    %545 = vector.broadcast %cst_256 : f32 to vector<16x1xf32>
    %546 = arith.addf %542, %545 : vector<16x1xf32>
    %547 = math.rsqrt %546 : vector<16x1xf32>
    %548 = vector.broadcast %547 : vector<16x1xf32> to vector<16x48xf32>
    %549 = arith.mulf %544, %548 : vector<16x48xf32>
    %550 = vector.broadcast %530 : vector<1x48xf32> to vector<16x48xf32>
    %551 = arith.mulf %549, %550 : vector<16x48xf32>
    %552 = vector.broadcast %531 : vector<1x48xf32> to vector<16x48xf32>
    %553 = arith.addf %551, %552 : vector<16x48xf32>
    %c0_257 = arith.constant 0 : index
    %c0_258 = arith.constant 0 : index
    %554 = vector.load %arg17[%c0_257, %c0_258] : memref<48x48xf32, #tpu.memory_space<vmem>>, vector<48x48xf32>
    %cst_259 = arith.constant dense<0.000000e+00> : vector<16x48xf32>
    %555 = tpu.matmul %553, %554, %cst_259 {dimension_numbers = #tpu.dot_dimension_numbers<[1], [0], [0], [1], [0, 0, 1, 1], [], []>} : vector<16x48xf32>, vector<48x48xf32>, vector<16x48xf32> -> vector<16x48xf32>
    %c0_260 = arith.constant 0 : index
    %c0_261 = arith.constant 0 : index
    %556 = vector.load %arg18[%c0_260, %c0_261] : memref<1x48xf32, #tpu.memory_space<vmem>>, vector<1x48xf32>
    %557 = vector.broadcast %556 : vector<1x48xf32> to vector<16x48xf32>
    %558 = arith.addf %555, %557 : vector<16x48xf32>
    %cst_262 = arith.constant 5.000000e-01 : f32
    %559 = vector.broadcast %cst_262 : f32 to vector<16x48xf32>
    %560 = arith.mulf %559, %558 : vector<16x48xf32>
    %cst_263 = arith.constant 0.707106769 : f32
    %561 = vector.broadcast %cst_263 : f32 to vector<16x48xf32>
    %562 = arith.mulf %558, %561 : vector<16x48xf32>
    %cst_264 = arith.constant 0.000000e+00 : f32
    %563 = vector.broadcast %cst_264 : f32 to vector<16x48xf32>
    %564 = arith.cmpf oge, %562, %563 : vector<16x48xf32>
    %cst_265 = arith.constant 1.000000e+00 : f32
    %cst_266 = arith.constant -1.000000e+00 : f32
    %565 = vector.broadcast %cst_265 : f32 to vector<16x48xf32>
    %566 = vector.broadcast %cst_266 : f32 to vector<16x48xf32>
    %567 = arith.select %564, %565, %566 : vector<16x48xi1>, vector<16x48xf32>
    %568 = math.absf %562 : vector<16x48xf32>
    %cst_267 = arith.constant 0.327591091 : f32
    %569 = vector.broadcast %cst_267 : f32 to vector<16x48xf32>
    %570 = arith.mulf %569, %568 : vector<16x48xf32>
    %cst_268 = arith.constant 1.000000e+00 : f32
    %571 = vector.broadcast %cst_268 : f32 to vector<16x48xf32>
    %572 = arith.addf %571, %570 : vector<16x48xf32>
    %cst_269 = arith.constant 1.000000e+00 : f32
    %573 = vector.broadcast %cst_269 : f32 to vector<16x48xf32>
    %574 = arith.divf %573, %572 : vector<16x48xf32>
    %cst_270 = arith.constant 1.06140542 : f32
    %575 = vector.broadcast %cst_270 : f32 to vector<16x48xf32>
    %576 = arith.mulf %575, %574 : vector<16x48xf32>
    %cst_271 = arith.constant -1.45315206 : f32
    %577 = vector.broadcast %cst_271 : f32 to vector<16x48xf32>
    %578 = arith.addf %576, %577 : vector<16x48xf32>
    %579 = arith.mulf %578, %574 : vector<16x48xf32>
    %cst_272 = arith.constant 1.42141378 : f32
    %580 = vector.broadcast %cst_272 : f32 to vector<16x48xf32>
    %581 = arith.addf %579, %580 : vector<16x48xf32>
    %582 = arith.mulf %581, %574 : vector<16x48xf32>
    %cst_273 = arith.constant -0.284496725 : f32
    %583 = vector.broadcast %cst_273 : f32 to vector<16x48xf32>
    %584 = arith.addf %582, %583 : vector<16x48xf32>
    %585 = arith.mulf %584, %574 : vector<16x48xf32>
    %cst_274 = arith.constant 0.254829586 : f32
    %586 = vector.broadcast %cst_274 : f32 to vector<16x48xf32>
    %587 = arith.addf %585, %586 : vector<16x48xf32>
    %588 = arith.mulf %587, %574 : vector<16x48xf32>
    %cst_275 = arith.constant 0.000000e+00 : f32
    %589 = vector.broadcast %cst_275 : f32 to vector<16x48xf32>
    %590 = arith.subf %589, %568 : vector<16x48xf32>
    %591 = arith.mulf %590, %568 : vector<16x48xf32>
    %592 = math.exp %591 : vector<16x48xf32>
    %593 = arith.mulf %588, %592 : vector<16x48xf32>
    %cst_276 = arith.constant 1.000000e+00 : f32
    %594 = vector.broadcast %cst_276 : f32 to vector<16x48xf32>
    %595 = arith.subf %594, %593 : vector<16x48xf32>
    %596 = arith.mulf %567, %595 : vector<16x48xf32>
    %cst_277 = arith.constant 1.000000e+00 : f32
    %597 = vector.broadcast %cst_277 : f32 to vector<16x48xf32>
    %598 = arith.addf %597, %596 : vector<16x48xf32>
    %599 = arith.mulf %560, %598 : vector<16x48xf32>
    %c0_278 = arith.constant 0 : index
    %c0_279 = arith.constant 0 : index
    %600 = vector.load %arg19[%c0_278, %c0_279] : memref<48x48xf32, #tpu.memory_space<vmem>>, vector<48x48xf32>
    %cst_280 = arith.constant dense<0.000000e+00> : vector<16x48xf32>
    %601 = tpu.matmul %599, %600, %cst_280 {dimension_numbers = #tpu.dot_dimension_numbers<[1], [0], [0], [1], [0, 0, 1, 1], [], []>} : vector<16x48xf32>, vector<48x48xf32>, vector<16x48xf32> -> vector<16x48xf32>
    %c0_281 = arith.constant 0 : index
    %c0_282 = arith.constant 0 : index
    %602 = vector.load %arg20[%c0_281, %c0_282] : memref<1x48xf32, #tpu.memory_space<vmem>>, vector<1x48xf32>
    %603 = vector.broadcast %602 : vector<1x48xf32> to vector<16x48xf32>
    %604 = arith.addf %601, %603 : vector<16x48xf32>
    %605 = arith.addf %604, %553 : vector<16x48xf32>
    %c0_283 = arith.constant 0 : index
    %c0_284 = arith.constant 0 : index
    %606 = vector.load %arg21[%c0_283, %c0_284] : memref<1x48xf32, #tpu.memory_space<vmem>>, vector<1x48xf32>
    %c0_285 = arith.constant 0 : index
    %c0_286 = arith.constant 0 : index
    %607 = vector.load %arg22[%c0_285, %c0_286] : memref<1x48xf32, #tpu.memory_space<vmem>>, vector<1x48xf32>
    %cst_287 = arith.constant dense<0.000000e+00> : vector<16xf32>
    %608 = vector.multi_reduction <add>, %605, %cst_287 [1] : vector<16x48xf32> to vector<16xf32>
    %609 = vector.shape_cast %608 : vector<16xf32> to vector<16x1xf32>
    %cst_288 = arith.constant 4.800000e+01 : f32
    %610 = vector.broadcast %cst_288 : f32 to vector<16x1xf32>
    %611 = arith.divf %609, %610 : vector<16x1xf32>
    %612 = vector.broadcast %611 : vector<16x1xf32> to vector<16x48xf32>
    %613 = arith.subf %605, %612 : vector<16x48xf32>
    %614 = arith.mulf %613, %613 : vector<16x48xf32>
    %cst_289 = arith.constant dense<0.000000e+00> : vector<16xf32>
    %615 = vector.multi_reduction <add>, %614, %cst_289 [1] : vector<16x48xf32> to vector<16xf32>
    %616 = vector.shape_cast %615 : vector<16xf32> to vector<16x1xf32>
    %cst_290 = arith.constant 4.800000e+01 : f32
    %617 = vector.broadcast %cst_290 : f32 to vector<16x1xf32>
    %618 = arith.divf %616, %617 : vector<16x1xf32>
    %619 = vector.broadcast %611 : vector<16x1xf32> to vector<16x48xf32>
    %620 = arith.subf %605, %619 : vector<16x48xf32>
    %cst_291 = arith.constant 9.99999996E-13 : f32
    %621 = vector.broadcast %cst_291 : f32 to vector<16x1xf32>
    %622 = arith.addf %618, %621 : vector<16x1xf32>
    %623 = math.rsqrt %622 : vector<16x1xf32>
    %624 = vector.broadcast %623 : vector<16x1xf32> to vector<16x48xf32>
    %625 = arith.mulf %620, %624 : vector<16x48xf32>
    %626 = vector.broadcast %606 : vector<1x48xf32> to vector<16x48xf32>
    %627 = arith.mulf %625, %626 : vector<16x48xf32>
    %628 = vector.broadcast %607 : vector<1x48xf32> to vector<16x48xf32>
    %629 = arith.addf %627, %628 : vector<16x48xf32>
    %630 = vector.shape_cast %629 : vector<16x48xf32> to vector<2x8x48xf32>
    %c0_292 = arith.constant 0 : index
    %c0_293 = arith.constant 0 : index
    %c0_294 = arith.constant 0 : index
    %631 = vector.load %arg23[%c0_292, %c0_293, %c0_294] : memref<1x1x48xf32, #tpu.memory_space<vmem>>, vector<1x1x48xf32>
    %632 = vector.broadcast %631 : vector<1x1x48xf32> to vector<2x8x48xf32>
    %633 = arith.mulf %630, %632 : vector<2x8x48xf32>
    %cst_295 = arith.constant dense<0.000000e+00> : vector<2x8xf32>
    %634 = vector.multi_reduction <add>, %633, %cst_295 [2] : vector<2x8x48xf32> to vector<2x8xf32>
    %c0_296 = arith.constant 0 : index
    %c0_297 = arith.constant 0 : index
    %635 = vector.load %arg24[%c0_296, %c0_297] : memref<1x1xf32, #tpu.memory_space<vmem>>, vector<1x1xf32>
    %636 = vector.broadcast %635 : vector<1x1xf32> to vector<2x8xf32>
    %637 = arith.addf %634, %636 : vector<2x8xf32>
    %c0_298 = arith.constant 0 : index
    %c0_299 = arith.constant 0 : index
    %638 = vector.load %arg25[%c0_298, %c0_299] : memref<2x8xf32, #tpu.memory_space<vmem>>, vector<2x8xf32>
    tpu.vector_store %arg25[%c0_298, %c0_299], %637 {strides = array<i32>} : memref<2x8xf32, #tpu.memory_space<vmem>>, vector<2x8xf32>,
    return
  }
}

</mosaic_0001>

<bundles_post_ra>
// kernel: lstmattn_forward.1
= control target key start
LH: loop header
LB: loop body
LE: loop exit
PB: predicated region body
PF: predicated region fallthrough
CT: control target
= control target key end

     0   :  { %s9992_s0 = inlined_call_operand.vmem [shape: f32[16,64], index: 0, kind: input, shape index: {}]   ;;  %s9993_s1 = inlined_call_operand.vmem [shape: f32[2,8], index: 1, kind: input, shape index: {}]   ;;  %s9994_s2 = inlined_call_operand.vmem [shape: f32[64,48], index: 2, kind: input, shape index: {}]   ;;  %s9995_s3 = inlined_call_operand.vmem [shape: f32[1,48], index: 3, kind: input, shape index: {}]   ;;  %s9996_s4 = inlined_call_operand.vmem [shape: f32[4,48,48], index: 4, kind: input, shape index: {}]   ;;  %s9997_s5 = inlined_call_operand.vmem [shape: f32[4,48,48], index: 5, kind: input, shape index: {}]   ;;  %s9998_s6 = inlined_call_operand.vmem [shape: f32[4,1,48], index: 6, kind: input, shape index: {}]   ;;  %s9999_s7 = inlined_call_operand.vmem [shape: f32[4,48,12], index: 7, kind: input, shape index: {}]   ;;  %s10000_s8 = inlined_call_operand.vmem [shape: f32[4,1,12], index: 8, kind: input, shape index: {}]   ;;  %s10001_s9 = inlined_call_operand.vmem [shape: f32[4,48,12], index: 9, kind: input, shape index: {}]   ;;  %s10002_s10 = inlined_call_operand.vmem [shape: f32[4,1,12], index: 10, kind: input, shape index: {}]   ;;  %s10003_s11 = inlined_call_operand.vmem [shape: f32[4,48,12], index: 11, kind: input, shape index: {}]   ;;  %s10004_s12 = inlined_call_operand.vmem [shape: f32[4,1,12], index: 12, kind: input, shape index: {}]   ;;  %s10005_s13 = inlined_call_operand.vmem [shape: f32[4,12,48], index: 13, kind: input, shape index: {}]   ;;  %s10006_s14 = inlined_call_operand.vmem [shape: f32[1,48], index: 14, kind: input, shape index: {}]   ;;  %s10007_s15 = inlined_call_operand.vmem [shape: f32[1,48], index: 15, kind: input, shape index: {}]   ;;  %s10008_s16 = inlined_call_operand.vmem [shape: f32[1,48], index: 16, kind: input, shape index: {}]   ;;  %s10009_s17 = inlined_call_operand.vmem [shape: f32[48,48], index: 17, kind: input, shape index: {}]   ;;  %s10010_s18 = inlined_call_operand.vmem [shape: f32[1,48], index: 18, kind: input, shape index: {}]   ;;  %s10011_s19 = inlined_call_operand.vmem [shape: f32[48,48], index: 19, kind: input, shape index: {}]   ;;  %s10012_s20 = inlined_call_operand.vmem [shape: f32[1,48], index: 20, kind: input, shape index: {}]   ;;  %s10013_s21 = inlined_call_operand.vmem [shape: f32[1,48], index: 21, kind: input, shape index: {}]   ;;  %s10014_s22 = inlined_call_operand.vmem [shape: f32[1,48], index: 22, kind: input, shape index: {}]   ;;  %s10015_s23 = inlined_call_operand.vmem [shape: f32[1,1,48], index: 23, kind: input, shape index: {}]   ;;  %s10016_s24 = inlined_call_operand.<no memory space> [shape: f32[1,1], index: 24, kind: input, shape index: {}]   ;;  %s10017_s25 = inlined_call_operand.hbm [shape: f32[2,8], index: 25, kind: output, shape index: {}]  }
   0x1   :  { %10026 = sst [smem:[#allocation7_spill]] %s9992_s0  ;;  %v30_v0 = vstv %s10016_s24 }
   0x2   :  { %10027 = sst [smem:[#allocation8_spill]] %s9993_s1  ;;  %31 = vst [vmem:[#allocation3] sm:$0x1] %v30_v0 }
   0x3   :  { %10028 = sst [smem:[#allocation9_spill]] %s9994_s2 }
   0x4   :  { %10029 = sst [smem:[#allocation10_spill]] %s9995_s3 }
   0x5   :  { %10030 = sst [smem:[#allocation11_spill]] %s9996_s4 }
   0x6   :  { %10031 = sst [smem:[#allocation12_spill]] %s9997_s5 }
   0x7   :  { %10032 = sst [smem:[#allocation13_spill]] %s9998_s6 }
   0x8   :  { %10033 = sst [smem:[#allocation14_spill]] %s9999_s7 }
   0x9   :  { %10034 = sst [smem:[#allocation15_spill]] %s10000_s8 }
   0xa   :  { %10035 = sst [smem:[#allocation16_spill]] %s10001_s9 }
   0xb   :  { %s10036_s7 = sld [smem:[#allocation9_spill]]  ;;  %vm100_vm0 = vcmask 523264   ;;  %s10037_s2 = sld [smem:[#allocation7_spill]] }
   0xc   :  { %s10038_s3 = sld [smem:[#allocation11_spill]] }
  0x11   :  { %v85_v1 = vld [vmem:[%s10036_s7] sm:$0xff]  ;;  %v86_v2 = vld [vmem:[%s10036_s7 + $0x8] sm:$0xff]  ;;  %v87_v3 = vld [vmem:[%s10036_s7 + $0x10] sm:$0xff] }
  0x12   :  { %v7919_v4 = vpack.c.bf16 %v86_v2, %v85_v1  ;;  %v88_v5 = vld [vmem:[%s10036_s7 + $0x18] sm:$0xff]  ;;  %v89_v7 = vld [vmem:[%s10036_s7 + $0x20] sm:$0xff]  ;;  %v90_v8 = vld [vmem:[%s10036_s7 + $0x28] sm:$0xff] }
  0x13   :  { %v7923_v6 = vpack.c.bf16 %v88_v5, %v87_v3  ;;  %v83_v9 = vld [vmem:[%s10037_s2] sm:$0xff]  ;;  %v210_v11 = vld [vmem:[%s10038_s3 + $0x8] sm:$0xff]  ;;  %v211_v13 = vld [vmem:[%s10038_s3 + $0x10] sm:$0xff]  ;;  %v7927_v14 = vpack.c.bf16 %v90_v8, %v89_v7 }
  0x14   :  { %7920 = vmatprep.subr.bf16.mxu0 %v7919_v4  ;;  %7058 = vmatprep.mubr.msk.f32.mxu0 %vm100_vm0, %v83_v9  ;;  %v209_v10 = vld [vmem:[%s10038_s3] sm:$0xff]  ;;  %v212_v15 = vld [vmem:[%s10038_s3 + $0x18] sm:$0xff]  ;;  %v91_v16 = vld [vmem:[%s10036_s7 + $0x30] sm:$0xff] }
  0x15   :  { %7922 = vmatpush3.bf16.msra.mxu0 %v7919_v4  ;;  %v7935_v12 = vpack.c.bf16 %v210_v11, %v209_v10  ;;  %v92_v17 = vld [vmem:[%s10036_s7 + $0x38] sm:$0xff]  ;;  %v7939_v18 = vpack.c.bf16 %v212_v15, %v211_v13 }
  0x16   :  { %7924 = vmatprep.subr.bf16.mxu0 %v7923_v6 }
  0x17   :  { %7936 = vmatprep.subr.bf16.mxu1 %v7935_v12 }
  0x18   :  { %32 = vsyncpa [#allocation5], 0  ;;  %7938 = vmatpush3.bf16.msra.mxu1 %v7935_v12  ;;  %v7931_v19 = vpack.c.bf16 %v92_v17, %v91_v16  ;;  %v6390_v20 = vld [vmem:[%s10038_s3 + $0x60] sm:$0xff]  ;;  %v6391_v21 = vld [vmem:[%s10038_s3 + $0x68] sm:$0xff]  ;;  %v8680_v36 = vmov 0.0|0.0   ;;  %s10039_s24 = sld [smem:[#allocation10_spill]] }
  0x19   :  { %7926 = vmatpush3.bf16.msra.mxu0 %v7923_v6  ;;  %7940 = vmatprep.subr.bf16.mxu1 %v7939_v18  ;;  %v7959_v22 = vpack.c.bf16 %v6391_v21, %v6390_v20  ;;  %v6392_v23 = vld [vmem:[%s10038_s3 + $0x70] sm:$0xff]  ;;  %v6393_v24 = vld [vmem:[%s10038_s3 + $0x78] sm:$0xff]  ;;  %v84_v25 = vld [vmem:[%s10037_s2 + $0x8] sm:$0xff]  ;;  %s10040_s5 = sld [smem:[#allocation12_spill]]  ;;  %vm222_vm1 = vcmask 392192   ;;  %vm8681_vm2 = vmmov 0  }
  0x1a   :  { %7928 = vmatprep.subr.bf16.mxu0 %v7927_v14  ;;  %v7963_v26 = vpack.c.bf16 %v6393_v24, %v6392_v23  ;;  %v213_v27 = vld [vmem:[%s10038_s3 + $0x20] sm:$0xff]  ;;  %v214_v28 = vld [vmem:[%s10038_s3 + $0x28] sm:$0xff]  ;;  %v6380_v33 = vld [vmem:[%s10038_s3 + $0x30] sm:$0xff]  ;;  %v8682_v56 = vmov 0.0   ;;  %s10041_s27 = sld [smem:[#allocation13_spill]]  ;;  %vm885_vm3 = vcmask 385024  }
  0x1b   :  { %v6394_v29 = vld [vmem:[%s10038_s3 + $0x80] sm:$0xff]  ;;  %v7943_v30 = vpack.c.bf16 %v214_v28, %v213_v27  ;;  %v6395_v31 = vld [vmem:[%s10038_s3 + $0x88] sm:$0xff]  ;;  %v6381_v34 = vld [vmem:[%s10038_s3 + $0x38] sm:$0xff]  ;;  %vm887_vm4 = vcmask 386049   ;;  %vm1215_vm5 = vcmask 387074   ;;  %vm1217_vm6 = vcmask 388099  }
  0x1c   :  { %7942 = vmatpush3.bf16.msra.mxu1 %v7939_v18  ;;  %v7967_v32 = vpack.c.bf16 %v6395_v31, %v6394_v29  ;;  %v7947_v35 = vpack.c.bf16 %v6381_v34, %v6380_v33  ;;  %v6382_v41 = vld [vmem:[%s10038_s3 + $0x40] sm:$0xff]  ;;  %v6383_v42 = vld [vmem:[%s10038_s3 + $0x48] sm:$0xff]  ;;  %v6384_v50 = vld [vmem:[%s10038_s3 + $0x50] sm:$0xff]  ;;  %vm1546_vm7 = vcmask 389124   ;;  %vm1548_vm8 = vcmask 390149   ;;  %s10042_s2 = sld [smem:[#allocation14_spill]] }
  0x1d   :  { %7930 = vmatpush3.bf16.msra.mxu0 %v7927_v14  ;;  %7944 = vmatprep.subr.bf16.mxu1 %v7943_v30  ;;  %v7951_v47 = vpack.c.bf16 %v6383_v42, %v6382_v41  ;;  %v6385_v51 = vld [vmem:[%s10038_s3 + $0x58] sm:$0xff]  ;;  %v6400_v57 = vld [vmem:[%s10038_s3 + $0x90] sm:$0xff]  ;;  %v6402_v63 = vld [vmem:[%s10038_s3 + $0xa0] sm:$0xff]  ;;  %vm1877_vm9 = vcmask 391174   ;;  %vm1879_vm10 = vcmask 392199   ;;  %vm3483_vm11 = vcmask 97280  }
  0x1e   :  { %7932 = vmatprep.subr.bf16.mxu0 %v7931_v19  ;;  %v6356_v37 = vld [vmem:[%s10039_s24] ss:$0 sm:$0xff]  ;;  %v7955_v53 = vpack.c.bf16 %v6385_v51, %v6384_v50  ;;  %v6401_v58 = vld [vmem:[%s10038_s3 + $0x98] sm:$0xff]  ;;  %v6403_v0 = vld [vmem:[%s10038_s3 + $0xa8] sm:$0xff]  ;;  %s10044_s9 = sld [smem:[#allocation15_spill]]  ;;  %s10045_s26 = sld [smem:[#allocation8_spill]] }
  0x1f   :  { %v182_v38 = vld [vmem:[%s10040_s5] sm:$0xff]  ;;  %v183_v39 = vld [vmem:[%s10040_s5 + $0x8] sm:$0xff]  ;;  %v184_v48 = vld [vmem:[%s10040_s5 + $0x10] sm:$0xff]  ;;  %v7971_v60 = vpack.c.bf16 %v6401_v58, %v6400_v57  ;;  %v7975_v2 = vpack.c.bf16 %v6403_v0, %v6402_v63  ;;  %vm3650_vm12 = vcmask 64512   ;;  %vm3827_vm13 = vcmask 1043456  }
  0x20   :  { %7946 = vmatpush3.bf16.msra.mxu1 %v7943_v30  ;;  %v8911_v45 = vpack.c.bf16 %v183_v39, %v182_v38  ;;  %v185_v49 = vld [vmem:[%s10040_s5 + $0x18] sm:$0xff]  ;;  %v186_v54 = vld [vmem:[%s10040_s5 + $0x20] sm:$0xff]  ;;  %v187_v55 = vld [vmem:[%s10040_s5 + $0x28] sm:$0xff]  ;;  %vm8684_vm14 = vmmov 1  }
  0x21   :  { %7934 = vmatpush3.bf16.msra.mxu0 %v7931_v19  ;;  %7948 = vmatprep.subr.bf16.mxu1 %v7947_v35  ;;  %v8934_v52 = vpack.c.bf16 %v185_v49, %v184_v48  ;;  %v8953_v59 = vpack.c.bf16 %v187_v55, %v186_v54  ;;  %v6365_v61 = vld [vmem:[%s10040_s5 + $0x60] sm:$0xff]  ;;  %v6366_v62 = vld [vmem:[%s10040_s5 + $0x68] sm:$0xff]  ;;  %v6367_v3 = vld [vmem:[%s10040_s5 + $0x70] sm:$0xff] }
  0x22   :  { %7960 = vmatprep.subr.bf16.mxu0 %v7959_v22  ;;  %v8970_v1 = vpack.c.bf16 %v6366_v62, %v6365_v61  ;;  %v6368_v4 = vld [vmem:[%s10040_s5 + $0x78] sm:$0xff]  ;;  %v6404_v5 = vld [vmem:[%s10038_s3 + $0xb0] sm:$0xff]  ;;  %v6369_v9 = vld [vmem:[%s10040_s5 + $0x80] sm:$0xff] }
  0x23   :  { %v6405_v6 = vld [vmem:[%s10038_s3 + $0xb8] sm:$0xff]  ;;  %v8989_v7 = vpack.c.bf16 %v6368_v4, %v6367_v3  ;;  %v6370_v10 = vld [vmem:[%s10040_s5 + $0x88] sm:$0xff]  ;;  %v6359_v12 = vld [vmem:[%s10040_s5 + $0x30] sm:$0xff] }
  0x24   :  { %7059 = vmatmul.mubr.msk.f32.vlgmr.msra.gmra.mrb[0].mxu0 %vm100_vm0, %v84_v25  ;;  %v7979_v8 = vpack.c.bf16 %v6405_v6, %v6404_v5  ;;  %v9001_v11 = vpack.c.bf16 %v6370_v10, %v6369_v9  ;;  %v6360_v13 = vld [vmem:[%s10040_s5 + $0x38] sm:$0xff]  ;;  %v6361_v15 = vld [vmem:[%s10040_s5 + $0x40] sm:$0xff]  ;;  %v6362_v16 = vld [vmem:[%s10040_s5 + $0x48] sm:$0xff] }
  0x25   :  { %7962 = vmatpush3.bf16.msra.mxu0 %v7959_v22  ;;  %v9010_v14 = vpack.c.bf16 %v6360_v13, %v6359_v12  ;;  %v9025_v17 = vpack.c.bf16 %v6362_v16, %v6361_v15  ;;  %v6363_v18 = vld [vmem:[%s10040_s5 + $0x50] sm:$0xff]  ;;  %v6364_v19 = vld [vmem:[%s10040_s5 + $0x58] sm:$0xff]  ;;  %v6373_v24 = vld [vmem:[%s10040_s5 + $0xa0] sm:$0xff] }
  0x26   :  { %7964 = vmatprep.subr.bf16.mxu0 %v7963_v26  ;;  %v9041_v20 = vpack.c.bf16 %v6364_v19, %v6363_v18  ;;  %v6371_v21 = vld [vmem:[%s10040_s5 + $0x90] sm:$0xff]  ;;  %v6372_v22 = vld [vmem:[%s10040_s5 + $0x98] sm:$0xff]  ;;  %v6374_v25 = vld [vmem:[%s10040_s5 + $0xa8] sm:$0xff] }
  0x27   :  { %v9053_v23 = vpack.c.bf16 %v6372_v22, %v6371_v21  ;;  %v6375_v27 = vld [vmem:[%s10040_s5 + $0xb0] sm:$0xff]  ;;  %v6376_v28 = vld [vmem:[%s10040_s5 + $0xb8] sm:$0xff]  ;;  %v6377_v30 = vld [vmem:[%s10041_s27] ss:$0 sm:$0xff]  ;;  %s10043_s5 = sld [smem:[#allocation16_spill]] }
  0x28   :  { %v9078_v29 = vpack.c.bf16 %v6376_v28, %v6375_v27  ;;  %v6397_v31 = vld [vmem:[%s10041_s27 + $0x2] ss:$0 sm:$0xff]  ;;  %v6387_v39 = vld [vmem:[%s10041_s27 + $0x1] ss:$0 sm:$0xff]  ;;  %v6407_v49 = vld [vmem:[%s10041_s27 + $0x3] ss:$0 sm:$0xff] }
  0x29   :  { %7966 = vmatpush3.bf16.msra.mxu0 %v7963_v26  ;;  %v9066_v26 = vpack.c.bf16 %v6374_v25, %v6373_v24  ;;  %vm9598_vm15 = vmpackc.low %vm3827_vm13, %vm8684_vm14 }
  0x2a   :  { %7968 = vmatprep.subr.bf16.mxu0 %v7967_v32 }
  0x2d   :  { %7970 = vmatpush3.bf16.msra.mxu0 %v7967_v32 }
  0x2e   :  { %7983 = vmatprep.subr.bf16.mxu0 %v8680_v36 }
  0xf7   :  { %v7060_v40 = vpop.f32.mrb[0].mxu0 }
  0xf8   :  { %v173_v43 = vpop.f32.mrb[1].mxu0  ;;  %v8913_v46 = vadd.f32 %v7060_v40, %v6356_v37 }
  0xf9   :  { %v174_v44 = vadd.f32 %v6356_v37, %v173_v43 }
  0xfb   :  { %7073 = vmatprep.mubr.msk.f32.mxu1 %vm222_vm1, %v174_v44  ;;  %7103 = vmatprep.mubr.msk.f32.mxu0 %vm222_vm1, %v174_v44 }
  0xfc   :  { %7074 = vmatmul.mubr.msk.f32.vlgmr.msra.gmra.mrb[0].mxu1 %vm222_vm1, %v8913_v46  ;;  %7104 = vmatmul.mubr.msk.f32.vlgmr.msra.gmra.mrb[2].mxu0 %vm222_vm1, %v8913_v46 }
  0xfd   :  { %7950 = vmatpush3.bf16.msra.mxu1 %v7947_v35  ;;  %7985 = vmatpush3.bf16.msra.mxu0 %v8911_v45 }
  0xfe   :  { %7088 = vmatprep.mubr.msk.f32.mxu1 %vm222_vm1, %v174_v44  ;;  %7952 = vmatprep.subr.bf16.mxu1 %v7951_v47 }
  0xff   :  { %7986 = vmatprep.subr.bf16.mxu0 %v8680_v36  ;;  %7133 = vmatprep.mubr.msk.f32.mxu0 %vm8681_vm2, %v8682_v56 }
 0x101   :  { %7954 = vmatpush3.bf16.msra.mxu1 %v7951_v47  ;;  %7988 = vmatpush3.bf16.msra.mxu0 %v8934_v52 }
 0x102   :  { %7956 = vmatprep.subr.bf16.mxu1 %v7955_v53  ;;  %7989 = vmatprep.subr.bf16.mxu0 %v8680_v36 }
 0x105   :  { %7958 = vmatpush3.bf16.msra.mxu1 %v7955_v53  ;;  %7991 = vmatpush3.bf16.msra.mxu0 %v8953_v59 }
 0x106   :  { %7972 = vmatprep.subr.bf16.mxu1 %v7971_v60  ;;  %8001 = vmatprep.subr.bf16.mxu0 %v8680_v36 }
 0x108   :  { %7089 = vmatmul.mubr.msk.f32.vlgmr.msra.gmra.mrb[2].mxu1 %vm222_vm1, %v8913_v46  ;;  %7134 = vmatmul.mubr.f32.vlgmr.msra.gmra.mrb[4].mxu0 %v8682_v56 }
 0x109   :  { %7974 = vmatpush3.bf16.msra.mxu1 %v7971_v60  ;;  %7118 = vmatprep.mubr.msk.f32.mxu1 %vm222_vm1, %v174_v44 }
 0x10a   :  { %8003 = vmatpush3.bf16.msra.mxu0 %v8970_v1  ;;  %7976 = vmatprep.subr.bf16.mxu1 %v7975_v2 }
 0x10b   :  { %8004 = vmatprep.subr.bf16.mxu0 %v8680_v36  ;;  %7163 = vmatprep.mubr.msk.f32.mxu0 %vm8681_vm2, %v8682_v56 }
 0x10d   :  { %7978 = vmatpush3.bf16.msra.mxu1 %v7975_v2 }
 0x10e   :  { %8006 = vmatpush3.bf16.msra.mxu0 %v8989_v7  ;;  %7980 = vmatprep.subr.bf16.mxu1 %v7979_v8 }
 0x10f   :  { %8007 = vmatprep.subr.bf16.mxu0 %v8680_v36 }
 0x111   :  { %7982 = vmatpush3.bf16.msra.mxu1 %v7979_v8 }
 0x112   :  { %8009 = vmatpush3.bf16.msra.mxu0 %v9001_v11  ;;  %7992 = vmatprep.subr.bf16.mxu1 %v8680_v36 }
 0x113   :  { %8019 = vmatprep.subr.bf16.mxu0 %v8680_v36 }
 0x114   :  { %7119 = vmatmul.mubr.msk.f32.vlgmr.msra.gmra.mrb[4].mxu1 %vm222_vm1, %v8913_v46 }
 0x115   :  { %7164 = vmatmul.mubr.f32.vlgmr.msra.gmra.mrb[6].mxu0 %v8682_v56  ;;  %7994 = vmatpush3.bf16.msra.mxu1 %v9010_v14 }
 0x116   :  { %7995 = vmatprep.subr.bf16.mxu1 %v8680_v36  ;;  %7148 = vmatprep.mubr.msk.f32.mxu1 %vm8681_vm2, %v8682_v56 }
 0x117   :  { %8021 = vmatpush3.bf16.msra.mxu0 %v8911_v45  ;;  %7193 = vmatprep.mubr.msk.f32.mxu0 %vm8681_vm2, %v8682_v56 }
 0x118   :  { %8022 = vmatprep.subr.bf16.mxu0 %v8680_v36 }
 0x119   :  { %7997 = vmatpush3.bf16.msra.mxu1 %v9025_v17 }
 0x11a   :  { %7998 = vmatprep.subr.bf16.mxu1 %v8680_v36 }
 0x11b   :  { %8024 = vmatpush3.bf16.msra.mxu0 %v8934_v52 }
 0x11c   :  { %8025 = vmatprep.subr.bf16.mxu0 %v8680_v36 }
 0x11d   :  { %8000 = vmatpush3.bf16.msra.mxu1 %v9041_v20 }
 0x11e   :  { %8010 = vmatprep.subr.bf16.mxu1 %v8680_v36 }
 0x11f   :  { %8027 = vmatpush3.bf16.msra.mxu0 %v8953_v59 }
 0x120   :  { %7149 = vmatmul.mubr.f32.vlgmr.msra.gmra.mrb[6].mxu1 %v8682_v56  ;;  %8037 = vmatprep.subr.bf16.mxu0 %v8680_v36 }
 0x121   :  { %8012 = vmatpush3.bf16.msra.mxu1 %v9053_v23  ;;  %7178 = vmatprep.mubr.msk.f32.mxu1 %vm8681_vm2, %v8682_v56 }
 0x122   :  { %8013 = vmatprep.subr.bf16.mxu1 %v8680_v36 }
 0x125   :  { %8015 = vmatpush3.bf16.msra.mxu1 %v9066_v26 }
 0x126   :  { %8016 = vmatprep.subr.bf16.mxu1 %v8680_v36 }
 0x129   :  { %8018 = vmatpush3.bf16.msra.mxu1 %v9078_v29 }
 0x12a   :  { %8028 = vmatprep.subr.bf16.mxu1 %v8680_v36 }
 0x12c   :  { %7179 = vmatmul.mubr.f32.vlgmr.msra.gmra.mrb[8].mxu1 %v8682_v56 }
 0x12d   :  { %8030 = vmatpush3.bf16.msra.mxu1 %v9010_v14  ;;  %7208 = vmatprep.mubr.msk.f32.mxu1 %vm8681_vm2, %v8682_v56 }
 0x12e   :  { %8031 = vmatprep.subr.bf16.mxu1 %v8680_v36 }
 0x131   :  { %8033 = vmatpush3.bf16.msra.mxu1 %v9025_v17 }
 0x132   :  { %8034 = vmatprep.subr.bf16.mxu1 %v8680_v36 }
 0x135   :  { %8036 = vmatpush3.bf16.msra.mxu1 %v9041_v20 }
 0x136   :  { %8046 = vmatprep.subr.bf16.mxu1 %v8680_v36 }
 0x1cf   :  { %v7075_v32 = vpop.f32.mrb[0].mxu1  ;;  %v7105_v33 = vpop.f32.mrb[2].mxu0 }
 0x1d0   :  { %v9098_v34 = vadd.f32 %v7075_v32, %v6377_v30  ;;  %v9100_v35 = vadd.f32 %v7105_v33, %v6397_v31  ;;  %v295_v37 = vpop.f32.mrb[1].mxu1  ;;  %v475_v38 = vpop.f32.mrb[3].mxu0 }
 0x1d1   :  { %v9105_v40 = vadd.f32 %v6377_v30, %v295_v37  ;;  %v9113_v50 = vadd.f32 %v6397_v31, %v475_v38 }
 0x1db   :  { %v7090_v41 = vpop.f32.mrb[2].mxu1  ;;  %v643_v42 = vpop.f32.mrb[4].mxu0 }
 0x1dc   :  { %v9107_v43 = vadd.f32 %v7090_v41, %v6387_v39  ;;  %v647_v44 = vadd.f32 %v643_v42, %v9105_v40  ;;  %v385_v46 = vpop.f32.mrb[3].mxu1  ;;  %v7135_v47 = vpop.f32.mrb[5].mxu0 }
 0x1dd   :  { %v9118_v62 = vadd.f32 %v6387_v39, %v385_v46 }
 0x1de   :  { %v6410_v48 = vmul.f32 -1.442695, %v647_v44 }
 0x1e0   :  { %8480 = vpow2.f32 %v6410_v48 }
 0x1e7   :  { %v7120_v51 = vpop.f32.mrb[4].mxu1 }
 0x1e8   :  { %v9115_v53 = vadd.f32 %v7120_v51, %v6407_v49  ;;  %v797_v54 = vpop.f32.mrb[6].mxu0  ;;  %v565_v55 = vpop.f32.mrb[5].mxu1 }
 0x1e9   :  { %v801_v57 = vadd.f32 %v797_v54, %v9113_v50  ;;  %v7165_v58 = vpop.f32.mrb[7].mxu0  ;;  %v9121_v8 = vadd.f32 %v6407_v49, %v565_v55 }
 0x1ea   :  { %v8481_v60 = vpop.eup %8480 }
 0x1eb   :  { %v651_v61 = vadd.f32 1.0, %v8481_v60  ;;  %8482 = vtanh.f32 %v801_v57 }
 0x1ed   :  { %8484 = vrcp.f32 %v651_v61 }
 0x1f3   :  { %v720_v63 = vpop.f32.mrb[6].mxu1 }
 0x1f4   :  { %v724_v0 = vadd.f32 %v720_v63, %v9118_v62  ;;  %v7150_v2 = vpop.f32.mrb[7].mxu1 }
 0x1f5   :  { %v8483_v3 = vpop.eup %8482 }
 0x1f6   :  { %v6411_v4 = vmul.f32 -1.442695, %v724_v0 }
 0x1f7   :  { %v8485_v5 = vpop.eup %8484 }
 0x1f8   :  { %8486 = vpow2.f32 %v6411_v4  ;;  %v881_v6 = vmul.f32 %v8485_v5, %v8483_v3 }
 0x1ff   :  { %v869_v9 = vpop.f32.mrb[8].mxu1 }
 0x200   :  { %v873_v10 = vadd.f32 %v869_v9, %v9121_v8  ;;  %v7180_v12 = vpop.f32.mrb[9].mxu1 }
 0x202   :  { %v8487_v13 = vpop.eup %8486  ;;  %v6412_v15 = vmul.f32 -1.442695, %v873_v10 }
 0x203   :  { %v728_v16 = vadd.f32 1.0, %v8487_v13 }
 0x204   :  { %8488 = vpow2.f32 %v6412_v15 }
 0x205   :  { %8490 = vrcp.f32 %v728_v16 }
 0x20e   :  { %v8489_v18 = vpop.eup %8488 }
 0x20f   :  { %v8491_v19 = vpop.eup %8490  ;;  %v877_v21 = vadd.f32 1.0, %v8489_v18 }
 0x210   :  { %v880_v22 = vmul.f32 0.0, %v8491_v19 }
 0x211   :  { %8492 = vrcp.f32 %v877_v21 }
 0x212   :  { %v9124_v24 = vadd.f32 %v881_v6, %v880_v22 }
 0x214   :  { %8494 = vtanh.f32 %v9124_v24  ;;  %v1208_v5 = vrot.slane %v9124_v24, 6 }
 0x21b   :  { %v8493_v25 = vpop.eup %8492 }
 0x21e   :  { %v8495_v27 = vpop.eup %8494 }
 0x21f   :  { %v884_v28 = vmul.f32 %v8495_v27, %v8493_v25 }
 0x221   :  { %886 = vst.msk [vmem:[#allocation2] sm:$0x1] %vm885_vm3, %v884_v28  ;;  %7194 = vmatmul.mubr.msk.f32.vlgmr.msra.gmra.mrb[8].mxu0 %vm222_vm1, %v884_v28  ;;  %7209 = vmatmul.mubr.msk.f32.vlgmr.msra.gmra.mrb[10].mxu1 %vm222_vm1, %v884_v28 }
 0x222   :  { %888 = vst.msk [vmem:[#allocation2 + $0x7] sm:$0x2] %vm887_vm4, %v884_v28  ;;  %8039 = vmatpush3.bf16.msra.mxu0 %v8970_v1  ;;  %8048 = vmatpush3.bf16.msra.mxu1 %v9053_v23 }
 0x223   :  { %8040 = vmatprep.subr.bf16.mxu0 %v8680_v36  ;;  %8049 = vmatprep.subr.bf16.mxu1 %v8680_v36 }
 0x224   :  { %7223 = vmatprep.mubr.msk.f32.mxu0 %vm8681_vm2, %v8682_v56  ;;  %7238 = vmatprep.mubr.msk.f32.mxu1 %vm8681_vm2, %v8682_v56 }
 0x226   :  { %8042 = vmatpush3.bf16.msra.mxu0 %v8989_v7  ;;  %8051 = vmatpush3.bf16.msra.mxu1 %v9066_v26 }
 0x227   :  { %8043 = vmatprep.subr.bf16.mxu0 %v8680_v36  ;;  %8052 = vmatprep.subr.bf16.mxu1 %v8680_v36 }
 0x22a   :  { %8045 = vmatpush3.bf16.msra.mxu0 %v9001_v11  ;;  %8054 = vmatpush3.bf16.msra.mxu1 %v9078_v29 }
 0x22b   :  { %8055 = vmatprep.subr.bf16.mxu0 %v8680_v36  ;;  %8064 = vmatprep.subr.bf16.mxu1 %v8680_v36 }
 0x22d   :  { %7224 = vmatmul.mubr.msk.f32.vlgmr.msra.gmra.mrb[10].mxu0 %vm222_vm1, %v884_v28  ;;  %7239 = vmatmul.mubr.msk.f32.vlgmr.msra.gmra.mrb[12].mxu1 %vm222_vm1, %v884_v28 }
 0x22e   :  { %8057 = vmatpush3.bf16.msra.mxu0 %v8911_v45  ;;  %8066 = vmatpush3.bf16.msra.mxu1 %v9010_v14 }
 0x22f   :  { %8058 = vmatprep.subr.bf16.mxu0 %v8680_v36  ;;  %8067 = vmatprep.subr.bf16.mxu1 %v8680_v36 }
 0x230   :  { %7253 = vmatprep.mubr.msk.f32.mxu0 %vm8681_vm2, %v8682_v56  ;;  %7268 = vmatprep.mubr.msk.f32.mxu1 %vm8681_vm2, %v8682_v56 }
 0x232   :  { %8060 = vmatpush3.bf16.msra.mxu0 %v8934_v52  ;;  %8069 = vmatpush3.bf16.msra.mxu1 %v9025_v17 }
 0x233   :  { %8061 = vmatprep.subr.bf16.mxu0 %v8680_v36  ;;  %8070 = vmatprep.subr.bf16.mxu1 %v8680_v36 }
 0x236   :  { %8063 = vmatpush3.bf16.msra.mxu0 %v8953_v59  ;;  %8072 = vmatpush3.bf16.msra.mxu1 %v9041_v20 }
 0x237   :  { %8073 = vmatprep.subr.bf16.mxu0 %v8680_v36  ;;  %8082 = vmatprep.subr.bf16.mxu1 %v8680_v36 }
 0x2f4   :  { %v958_v30 = vpop.f32.mrb[8].mxu0  ;;  %v1038_v31 = vpop.f32.mrb[10].mxu1 }
 0x2f5   :  { %v963_v32 = vrot.slane %v958_v30, 6  ;;  %v1043_v33 = vrot.slane %v1038_v31, 6  ;;  %v7195_v37 = vpop.f32.mrb[9].mxu0  ;;  %v7210_v38 = vpop.f32.mrb[11].mxu1 }
 0x2f7   :  { %v965_v39 = vadd.f32 %v963_v32, %v9105_v40  ;;  %v1045_v41 = vadd.f32 %v1043_v33, %v9118_v62 }
 0x2f9   :  { %v6414_v42 = vmul.f32 -1.442695, %v965_v39  ;;  %v6416_v44 = vmul.f32 -1.442695, %v1045_v41 }
 0x2fb   :  { %8496 = vpow2.f32 %v6414_v42 }
 0x2fc   :  { %8498 = vpow2.f32 %v6416_v44 }
 0x300   :  { %v1118_v46 = vpop.f32.mrb[10].mxu0  ;;  %v1193_v47 = vpop.f32.mrb[12].mxu1 }
 0x301   :  { %v1123_v48 = vrot.slane %v1118_v46, 6  ;;  %v1198_v49 = vrot.slane %v1193_v47, 6  ;;  %v7225_v51 = vpop.f32.mrb[11].mxu0  ;;  %v7240_v54 = vpop.f32.mrb[13].mxu1 }
 0x303   :  { %v1125_v55 = vadd.f32 %v1123_v48, %v9113_v50  ;;  %v1200_v57 = vadd.f32 %v1198_v49, %v9121_v8 }
 0x305   :  { %v8497_v58 = vpop.eup %8496  ;;  %v6419_v60 = vmul.f32 -1.442695, %v1200_v57  ;;  %8500 = vtanh.f32 %v1125_v55 }
 0x306   :  { %v8499_v61 = vpop.eup %8498  ;;  %v969_v63 = vadd.f32 1.0, %v8497_v58 }
 0x307   :  { %v1049_v0 = vadd.f32 1.0, %v8499_v61  ;;  %8502 = vpow2.f32 %v6419_v60 }
 0x308   :  { %8504 = vrcp.f32 %v969_v63 }
 0x309   :  { %8506 = vrcp.f32 %v1049_v0 }
 0x30f   :  { %v8501_v2 = vpop.eup %8500 }
 0x311   :  { %v8503_v3 = vpop.eup %8502 }
 0x312   :  { %v8505_v4 = vpop.eup %8504  ;;  %v1204_v10 = vadd.f32 1.0, %v8503_v3 }
 0x313   :  { %v8507_v6 = vpop.eup %8506  ;;  %v1211_v9 = vmul.f32 %v8505_v4, %v8501_v2 }
 0x314   :  { %v1210_v12 = vmul.f32 %v8507_v6, %v1208_v5  ;;  %8508 = vrcp.f32 %v1204_v10 }
 0x316   :  { %v9170_v13 = vadd.f32 %v1211_v9, %v1210_v12 }
 0x318   :  { %8510 = vtanh.f32 %v9170_v13  ;;  %v1539_v61 = vrot.slane %v9170_v13, 6 }
 0x31e   :  { %v8509_v15 = vpop.eup %8508 }
 0x322   :  { %v8511_v16 = vpop.eup %8510 }
 0x323   :  { %v1214_v18 = vmul.f32 %v8511_v16, %v8509_v15 }
 0x325   :  { %1216 = vst.msk [vmem:[#allocation2 - $0x1] sm:$0x4] %vm1215_vm5, %v1214_v18  ;;  %v1220_v19 = vrot.slane %v1214_v18, 2 }
 0x326   :  { %1218 = vst.msk [vmem:[#allocation2 + $0x6] sm:$0x8] %vm1217_vm6, %v1214_v18 }
 0x327   :  { %7254 = vmatmul.mubr.msk.f32.vlgmr.msra.gmra.mrb[12].mxu0 %vm222_vm1, %v1220_v19  ;;  %7269 = vmatmul.mubr.msk.f32.vlgmr.msra.gmra.mrb[14].mxu1 %vm222_vm1, %v1220_v19 }
 0x328   :  { %8075 = vmatpush3.bf16.msra.mxu0 %v8970_v1  ;;  %8084 = vmatpush3.bf16.msra.mxu1 %v9053_v23 }
 0x329   :  { %8076 = vmatprep.subr.bf16.mxu0 %v8680_v36  ;;  %8085 = vmatprep.subr.bf16.mxu1 %v8680_v36 }
 0x32a   :  { %7283 = vmatprep.mubr.msk.f32.mxu0 %vm8681_vm2, %v8682_v56  ;;  %7298 = vmatprep.mubr.msk.f32.mxu1 %vm8681_vm2, %v8682_v56 }
 0x32c   :  { %8078 = vmatpush3.bf16.msra.mxu0 %v8989_v7  ;;  %8087 = vmatpush3.bf16.msra.mxu1 %v9066_v26 }
 0x32d   :  { %8079 = vmatprep.subr.bf16.mxu0 %v8680_v36  ;;  %8088 = vmatprep.subr.bf16.mxu1 %v8680_v36 }
 0x330   :  { %8081 = vmatpush3.bf16.msra.mxu0 %v9001_v11  ;;  %8090 = vmatpush3.bf16.msra.mxu1 %v9078_v29 }
 0x331   :  { %8091 = vmatprep.subr.bf16.mxu0 %v8680_v36  ;;  %8100 = vmatprep.subr.bf16.mxu1 %v8680_v36 }
 0x333   :  { %7284 = vmatmul.mubr.msk.f32.vlgmr.msra.gmra.mrb[14].mxu0 %vm222_vm1, %v1220_v19  ;;  %7299 = vmatmul.mubr.msk.f32.vlgmr.msra.gmra.mrb[16].mxu1 %vm222_vm1, %v1220_v19 }
 0x334   :  { %8093 = vmatpush3.bf16.msra.mxu0 %v8911_v45  ;;  %8102 = vmatpush3.bf16.msra.mxu1 %v9010_v14 }
 0x335   :  { %8094 = vmatprep.subr.bf16.mxu0 %v8680_v36  ;;  %8103 = vmatprep.subr.bf16.mxu1 %v8680_v36 }
 0x336   :  { %7313 = vmatprep.mubr.msk.f32.mxu0 %vm8681_vm2, %v8682_v56  ;;  %7328 = vmatprep.mubr.msk.f32.mxu1 %vm8681_vm2, %v8682_v56 }
 0x338   :  { %8096 = vmatpush3.bf16.msra.mxu0 %v8934_v52  ;;  %8105 = vmatpush3.bf16.msra.mxu1 %v9025_v17 }
 0x339   :  { %8097 = vmatprep.subr.bf16.mxu0 %v8680_v36  ;;  %8106 = vmatprep.subr.bf16.mxu1 %v8680_v36 }
 0x33c   :  { %8099 = vmatpush3.bf16.msra.mxu0 %v8953_v59  ;;  %8108 = vmatpush3.bf16.msra.mxu1 %v9041_v20 }
 0x33d   :  { %8109 = vmatprep.subr.bf16.mxu0 %v8680_v36  ;;  %8118 = vmatprep.subr.bf16.mxu1 %v8680_v36 }
 0x3fa   :  { %v1289_v21 = vpop.f32.mrb[12].mxu0  ;;  %v1369_v22 = vpop.f32.mrb[14].mxu1 }
 0x3fb   :  { %v1294_v24 = vrot.slane %v1289_v21, 4  ;;  %v1374_v25 = vrot.slane %v1369_v22, 4  ;;  %v7255_v27 = vpop.f32.mrb[13].mxu0  ;;  %v7270_v28 = vpop.f32.mrb[15].mxu1 }
 0x3fd   :  { %v1296_v30 = vadd.f32 %v1294_v24, %v9105_v40  ;;  %v1376_v31 = vadd.f32 %v1374_v25, %v9118_v62 }
 0x3ff   :  { %v6421_v32 = vmul.f32 -1.442695, %v1296_v30  ;;  %v6423_v33 = vmul.f32 -1.442695, %v1376_v31 }
 0x401   :  { %8512 = vpow2.f32 %v6421_v32 }
 0x402   :  { %8514 = vpow2.f32 %v6423_v33 }
 0x406   :  { %v1449_v37 = vpop.f32.mrb[14].mxu0  ;;  %v1524_v38 = vpop.f32.mrb[16].mxu1 }
 0x407   :  { %v1454_v39 = vrot.slane %v1449_v37, 4  ;;  %v1529_v41 = vrot.slane %v1524_v38, 4  ;;  %v7285_v42 = vpop.f32.mrb[15].mxu0  ;;  %v7300_v44 = vpop.f32.mrb[17].mxu1 }
 0x409   :  { %v1456_v46 = vadd.f32 %v1454_v39, %v9113_v50  ;;  %v1531_v47 = vadd.f32 %v1529_v41, %v9121_v8 }
 0x40b   :  { %v8513_v48 = vpop.eup %8512  ;;  %v6426_v49 = vmul.f32 -1.442695, %v1531_v47  ;;  %8516 = vtanh.f32 %v1456_v46 }
 0x40c   :  { %v8515_v51 = vpop.eup %8514  ;;  %v1300_v54 = vadd.f32 1.0, %v8513_v48 }
 0x40d   :  { %v1380_v55 = vadd.f32 1.0, %v8515_v51  ;;  %8518 = vpow2.f32 %v6426_v49 }
 0x40e   :  { %8520 = vrcp.f32 %v1300_v54 }
 0x40f   :  { %8522 = vrcp.f32 %v1380_v55 }
 0x415   :  { %v8517_v57 = vpop.eup %8516 }
 0x417   :  { %v8519_v58 = vpop.eup %8518 }
 0x418   :  { %v8521_v60 = vpop.eup %8520  ;;  %v1535_v2 = vadd.f32 1.0, %v8519_v58 }
 0x419   :  { %v8523_v63 = vpop.eup %8522  ;;  %v1542_v0 = vmul.f32 %v8521_v60, %v8517_v57 }
 0x41a   :  { %v1541_v3 = vmul.f32 %v8523_v63, %v1539_v61  ;;  %8524 = vrcp.f32 %v1535_v2 }
 0x41c   :  { %v9216_v4 = vadd.f32 %v1542_v0, %v1541_v3 }
 0x41e   :  { %8526 = vtanh.f32 %v9216_v4  ;;  %v1870_v48 = vrot.slane %v9216_v4, 6 }
 0x424   :  { %v8525_v5 = vpop.eup %8524 }
 0x428   :  { %v8527_v6 = vpop.eup %8526 }
 0x429   :  { %v1545_v9 = vmul.f32 %v8527_v6, %v8525_v5 }
 0x42b   :  { %1547 = vst.msk [vmem:[#allocation2 - $0x2] sm:$0x10] %vm1546_vm7, %v1545_v9  ;;  %v1551_v10 = vrot.slane %v1545_v9, 4 }
 0x42c   :  { %1549 = vst.msk [vmem:[#allocation2 + $0x5] sm:$0x20] %vm1548_vm8, %v1545_v9 }
 0x42d   :  { %7314 = vmatmul.mubr.msk.f32.vlgmr.msra.gmra.mrb[16].mxu0 %vm222_vm1, %v1551_v10  ;;  %7329 = vmatmul.mubr.msk.f32.vlgmr.msra.gmra.mrb[18].mxu1 %vm222_vm1, %v1551_v10 }
 0x42e   :  { %8111 = vmatpush3.bf16.msra.mxu0 %v8970_v1  ;;  %8120 = vmatpush3.bf16.msra.mxu1 %v9053_v23 }
 0x42f   :  { %8112 = vmatprep.subr.bf16.mxu0 %v8680_v36  ;;  %8121 = vmatprep.subr.bf16.mxu1 %v8680_v36 }
 0x430   :  { %7343 = vmatprep.mubr.msk.f32.mxu0 %vm8681_vm2, %v8682_v56  ;;  %7358 = vmatprep.mubr.msk.f32.mxu1 %vm8681_vm2, %v8682_v56 }
 0x432   :  { %8114 = vmatpush3.bf16.msra.mxu0 %v8989_v7  ;;  %8123 = vmatpush3.bf16.msra.mxu1 %v9066_v26 }
 0x433   :  { %8115 = vmatprep.subr.bf16.mxu0 %v8680_v36  ;;  %8124 = vmatprep.subr.bf16.mxu1 %v8680_v36 }
 0x436   :  { %8117 = vmatpush3.bf16.msra.mxu0 %v9001_v11  ;;  %8126 = vmatpush3.bf16.msra.mxu1 %v9078_v29 }
 0x437   :  { %8127 = vmatprep.subr.bf16.mxu0 %v8680_v36  ;;  %8136 = vmatprep.subr.bf16.mxu1 %v8680_v36 }
 0x439   :  { %7344 = vmatmul.mubr.msk.f32.vlgmr.msra.gmra.mrb[18].mxu0 %vm222_vm1, %v1551_v10  ;;  %7359 = vmatmul.mubr.msk.f32.vlgmr.msra.gmra.mrb[20].mxu1 %vm222_vm1, %v1551_v10 }
 0x43a   :  { %8129 = vmatpush3.bf16.msra.mxu0 %v8911_v45  ;;  %8138 = vmatpush3.bf16.msra.mxu1 %v9010_v14 }
 0x43b   :  { %8130 = vmatprep.subr.bf16.mxu0 %v8680_v36  ;;  %8139 = vmatprep.subr.bf16.mxu1 %v8680_v36 }
 0x43c   :  { %7373 = vmatprep.mubr.msk.f32.mxu0 %vm8681_vm2, %v8682_v56  ;;  %7388 = vmatprep.mubr.msk.f32.mxu1 %vm8681_vm2, %v8682_v56 }
 0x43e   :  { %8132 = vmatpush3.bf16.msra.mxu0 %v8934_v52  ;;  %8141 = vmatpush3.bf16.msra.mxu1 %v9025_v17 }
 0x43f   :  { %8133 = vmatprep.subr.bf16.mxu0 %v8680_v36  ;;  %8142 = vmatprep.subr.bf16.mxu1 %v8680_v36 }
 0x442   :  { %8135 = vmatpush3.bf16.msra.mxu0 %v8953_v59  ;;  %8144 = vmatpush3.bf16.msra.mxu1 %v9041_v20 }
 0x443   :  { %8145 = vmatprep.subr.bf16.mxu0 %v8680_v36  ;;  %8154 = vmatprep.subr.bf16.mxu1 %v8680_v36 }
 0x500   :  { %v1620_v12 = vpop.f32.mrb[16].mxu0  ;;  %v1700_v13 = vpop.f32.mrb[18].mxu1 }
 0x501   :  { %v1625_v15 = vrot.slane %v1620_v12, 2  ;;  %v1705_v16 = vrot.slane %v1700_v13, 2  ;;  %v7315_v18 = vpop.f32.mrb[17].mxu0  ;;  %v7330_v19 = vpop.f32.mrb[19].mxu1 }
 0x503   :  { %v1627_v21 = vadd.f32 %v1625_v15, %v9105_v40  ;;  %v1707_v22 = vadd.f32 %v1705_v16, %v9118_v62 }
 0x505   :  { %v6428_v24 = vmul.f32 -1.442695, %v1627_v21  ;;  %v6430_v25 = vmul.f32 -1.442695, %v1707_v22 }
 0x507   :  { %8528 = vpow2.f32 %v6428_v24 }
 0x508   :  { %8530 = vpow2.f32 %v6430_v25 }
 0x50c   :  { %v1780_v27 = vpop.f32.mrb[18].mxu0  ;;  %v1855_v28 = vpop.f32.mrb[20].mxu1 }
 0x50d   :  { %v1785_v30 = vrot.slane %v1780_v27, 2  ;;  %v1860_v31 = vrot.slane %v1855_v28, 2  ;;  %v7345_v32 = vpop.f32.mrb[19].mxu0  ;;  %v7360_v33 = vpop.f32.mrb[21].mxu1 }
 0x50f   :  { %v1787_v37 = vadd.f32 %v1785_v30, %v9113_v50  ;;  %v1862_v38 = vadd.f32 %v1860_v31, %v9121_v8 }
 0x511   :  { %v8529_v39 = vpop.eup %8528  ;;  %v6433_v41 = vmul.f32 -1.442695, %v1862_v38  ;;  %8532 = vtanh.f32 %v1787_v37 }
 0x512   :  { %v8531_v42 = vpop.eup %8530  ;;  %v1631_v40 = vadd.f32 1.0, %v8529_v39 }
 0x513   :  { %v1711_v62 = vadd.f32 1.0, %v8531_v42  ;;  %8534 = vpow2.f32 %v6433_v41 }
 0x514   :  { %8536 = vrcp.f32 %v1631_v40 }
 0x515   :  { %8538 = vrcp.f32 %v1711_v62 }
 0x51b   :  { %v8533_v44 = vpop.eup %8532 }
 0x51d   :  { %v8535_v46 = vpop.eup %8534 }
 0x51e   :  { %v8537_v47 = vpop.eup %8536  ;;  %v1866_v54 = vadd.f32 1.0, %v8535_v46 }
 0x51f   :  { %v8539_v49 = vpop.eup %8538  ;;  %v1873_v51 = vmul.f32 %v8537_v47, %v8533_v44 }
 0x520   :  { %v1872_v50 = vmul.f32 %v8539_v49, %v1870_v48  ;;  %8540 = vrcp.f32 %v1866_v54 }
 0x522   :  { %v9262_v55 = vadd.f32 %v1873_v51, %v1872_v50 }
 0x524   :  { %8542 = vtanh.f32 %v9262_v55  ;;  %v2189_v30 = vrot.slane %v9262_v55, 6 }
 0x52a   :  { %v8541_v8 = vpop.eup %8540 }
 0x52e   :  { %v8543_v57 = vpop.eup %8542 }
 0x52f   :  { %v1876_v58 = vmul.f32 %v8543_v57, %v8541_v8 }
 0x531   :  { %v1882_v60 = vrot.slane %v1876_v58, 6  ;;  %1878 = vst.msk [vmem:[#allocation2 - $0x3] sm:$0x40] %vm1877_vm9, %v1876_v58 }
 0x532   :  { %1880 = vst.msk [vmem:[#allocation2 + $0x4] sm:$0x80] %vm1879_vm10, %v1876_v58 }
 0x533   :  { %7374 = vmatmul.mubr.msk.f32.vlgmr.msra.gmra.mrb[20].mxu0 %vm222_vm1, %v1882_v60  ;;  %7389 = vmatmul.mubr.msk.f32.vlgmr.msra.gmra.mrb[22].mxu1 %vm222_vm1, %v1882_v60 }
 0x534   :  { %8147 = vmatpush3.bf16.msra.mxu0 %v8970_v1  ;;  %8156 = vmatpush3.bf16.msra.mxu1 %v9053_v23 }
 0x535   :  { %8148 = vmatprep.subr.bf16.mxu0 %v8680_v36  ;;  %8157 = vmatprep.subr.bf16.mxu1 %v8680_v36 }
 0x536   :  { %7403 = vmatprep.mubr.msk.f32.mxu0 %vm8681_vm2, %v8682_v56  ;;  %7418 = vmatprep.mubr.msk.f32.mxu1 %vm8681_vm2, %v8682_v56 }
 0x538   :  { %8150 = vmatpush3.bf16.msra.mxu0 %v8989_v7  ;;  %8159 = vmatpush3.bf16.msra.mxu1 %v9066_v26 }
 0x539   :  { %8151 = vmatprep.subr.bf16.mxu0 %v8680_v36  ;;  %8160 = vmatprep.subr.bf16.mxu1 %v8680_v36 }
 0x53c   :  { %8153 = vmatpush3.bf16.msra.mxu0 %v9001_v11  ;;  %8162 = vmatpush3.bf16.msra.mxu1 %v9078_v29 }
 0x53d   :  { %8163 = vmatprep.subr.bf16.mxu0 %v8680_v36  ;;  %8172 = vmatprep.subr.bf16.mxu1 %v8680_v36 }
 0x53f   :  { %7404 = vmatmul.mubr.msk.f32.vlgmr.msra.gmra.mrb[22].mxu0 %vm222_vm1, %v1882_v60  ;;  %7419 = vmatmul.mubr.msk.f32.vlgmr.msra.gmra.mrb[24].mxu1 %vm222_vm1, %v1882_v60 }
 0x540   :  { %8165 = vmatpush3.bf16.msra.mxu0 %v8911_v45  ;;  %8174 = vmatpush3.bf16.msra.mxu1 %v9010_v14 }
 0x541   :  { %8166 = vmatprep.subr.bf16.mxu0 %v8680_v36  ;;  %8175 = vmatprep.subr.bf16.mxu1 %v8680_v36 }
 0x542   :  { %7433 = vmatprep.mubr.msk.f32.mxu0 %vm8681_vm2, %v8682_v56  ;;  %7448 = vmatprep.mubr.msk.f32.mxu1 %vm8681_vm2, %v8682_v56 }
 0x544   :  { %8168 = vmatpush3.bf16.msra.mxu0 %v8934_v52  ;;  %8177 = vmatpush3.bf16.msra.mxu1 %v9025_v17 }
 0x545   :  { %8169 = vmatprep.subr.bf16.mxu0 %v8680_v36  ;;  %8178 = vmatprep.subr.bf16.mxu1 %v8680_v36 }
 0x548   :  { %8171 = vmatpush3.bf16.msra.mxu0 %v8953_v59  ;;  %8180 = vmatpush3.bf16.msra.mxu1 %v9041_v20 }
 0x549   :  { %8181 = vmatprep.subr.bf16.mxu0 %v8680_v36  ;;  %8190 = vmatprep.subr.bf16.mxu1 %v8680_v36 }
 0x606   :  { %v1951_v61 = vpop.f32.mrb[20].mxu0  ;;  %v2028_v63 = vpop.f32.mrb[22].mxu1 }
 0x607   :  { %v1955_v0 = vadd.f32 %v1951_v61, %v9098_v34  ;;  %v2032_v2 = vadd.f32 %v2028_v63, %v9107_v43  ;;  %v7375_v3 = vpop.f32.mrb[21].mxu0  ;;  %v7390_v4 = vpop.f32.mrb[23].mxu1 }
 0x609   :  { %v6435_v5 = vmul.f32 -1.442695, %v1955_v0  ;;  %v6437_v6 = vmul.f32 -1.442695, %v2032_v2 }
 0x60b   :  { %8544 = vpow2.f32 %v6435_v5 }
 0x60c   :  { %8546 = vpow2.f32 %v6437_v6 }
 0x612   :  { %v2105_v9 = vpop.f32.mrb[22].mxu0  ;;  %v2177_v10 = vpop.f32.mrb[24].mxu1 }
 0x613   :  { %v2109_v12 = vadd.f32 %v2105_v9, %v9100_v35  ;;  %v2181_v13 = vadd.f32 %v2177_v10, %v9115_v53  ;;  %v7405_v15 = vpop.f32.mrb[23].mxu0  ;;  %v7420_v16 = vpop.f32.mrb[25].mxu1 }
 0x615   :  { %v8545_v18 = vpop.eup %8544  ;;  %v6440_v19 = vmul.f32 -1.442695, %v2181_v13  ;;  %8548 = vtanh.f32 %v2109_v12 }
 0x616   :  { %v8547_v21 = vpop.eup %8546  ;;  %v1959_v22 = vadd.f32 1.0, %v8545_v18 }
 0x617   :  { %v2036_v24 = vadd.f32 1.0, %v8547_v21  ;;  %8550 = vpow2.f32 %v6440_v19 }
 0x618   :  { %8552 = vrcp.f32 %v1959_v22 }
 0x619   :  { %8554 = vrcp.f32 %v2036_v24 }
 0x61f   :  { %v8549_v25 = vpop.eup %8548 }
 0x621   :  { %v8551_v27 = vpop.eup %8550 }
 0x622   :  { %v8553_v28 = vpop.eup %8552  ;;  %v2185_v33 = vadd.f32 1.0, %v8551_v27 }
 0x623   :  { %v8555_v31 = vpop.eup %8554  ;;  %v2192_v32 = vmul.f32 %v8553_v28, %v8549_v25 }
 0x624   :  { %v2191_v37 = vmul.f32 %v8555_v31, %v2189_v30  ;;  %8556 = vrcp.f32 %v2185_v33 }
 0x626   :  { %v9308_v38 = vadd.f32 %v2192_v32, %v2191_v37 }
 0x628   :  { %8558 = vtanh.f32 %v9308_v38  ;;  %v2517_v13 = vrot.slane %v9308_v38, 6 }
 0x62e   :  { %v8557_v39 = vpop.eup %8556 }
 0x632   :  { %v8559_v41 = vpop.eup %8558 }
 0x633   :  { %v2195_v42 = vmul.f32 %v8559_v41, %v8557_v39 }
 0x635   :  { %2196 = vst.msk [vmem:[#allocation2 + $0x4] sm:$0x1] %vm885_vm3, %v2195_v42  ;;  %7434 = vmatmul.mubr.msk.f32.vlgmr.msra.gmra.mrb[24].mxu0 %vm222_vm1, %v2195_v42  ;;  %7449 = vmatmul.mubr.msk.f32.vlgmr.msra.gmra.mrb[26].mxu1 %vm222_vm1, %v2195_v42  ;;  %vm6337_vm3 = vcmask 1041409  }
 0x636   :  { %2197 = vst.msk [vmem:[#allocation2 + $0xb] sm:$0x2] %vm887_vm4, %v2195_v42  ;;  %8183 = vmatpush3.bf16.msra.mxu0 %v8970_v1  ;;  %8192 = vmatpush3.bf16.msra.mxu1 %v9053_v23  ;;  %vm6340_vm4 = vcmask 58368  }
 0x637   :  { %8184 = vmatprep.subr.bf16.mxu0 %v8680_v36  ;;  %8193 = vmatprep.subr.bf16.mxu1 %v8680_v36 }
 0x638   :  { %7463 = vmatprep.mubr.msk.f32.mxu0 %vm8681_vm2, %v8682_v56  ;;  %7478 = vmatprep.mubr.msk.f32.mxu1 %vm8681_vm2, %v8682_v56 }
 0x63a   :  { %8186 = vmatpush3.bf16.msra.mxu0 %v8989_v7  ;;  %8195 = vmatpush3.bf16.msra.mxu1 %v9066_v26 }
 0x63b   :  { %8187 = vmatprep.subr.bf16.mxu0 %v8680_v36  ;;  %8196 = vmatprep.subr.bf16.mxu1 %v8680_v36 }
 0x63e   :  { %8189 = vmatpush3.bf16.msra.mxu0 %v9001_v11  ;;  %8198 = vmatpush3.bf16.msra.mxu1 %v9078_v29 }
 0x63f   :  { %8199 = vmatprep.subr.bf16.mxu0 %v8680_v36  ;;  %8208 = vmatprep.subr.bf16.mxu1 %v8680_v36 }
 0x641   :  { %7464 = vmatmul.mubr.msk.f32.vlgmr.msra.gmra.mrb[26].mxu0 %vm222_vm1, %v2195_v42  ;;  %7479 = vmatmul.mubr.msk.f32.vlgmr.msra.gmra.mrb[28].mxu1 %vm222_vm1, %v2195_v42 }
 0x642   :  { %8201 = vmatpush3.bf16.msra.mxu0 %v8911_v45  ;;  %8210 = vmatpush3.bf16.msra.mxu1 %v9010_v14 }
 0x643   :  { %8202 = vmatprep.subr.bf16.mxu0 %v8680_v36  ;;  %8211 = vmatprep.subr.bf16.mxu1 %v8680_v36 }
 0x644   :  { %7493 = vmatprep.mubr.msk.f32.mxu0 %vm8681_vm2, %v8682_v56  ;;  %7508 = vmatprep.mubr.msk.f32.mxu1 %vm8681_vm2, %v8682_v56 }
 0x646   :  { %8204 = vmatpush3.bf16.msra.mxu0 %v8934_v52  ;;  %8213 = vmatpush3.bf16.msra.mxu1 %v9025_v17 }
 0x647   :  { %8205 = vmatprep.subr.bf16.mxu0 %v8680_v36  ;;  %8214 = vmatprep.subr.bf16.mxu1 %v8680_v36 }
 0x64a   :  { %8207 = vmatpush3.bf16.msra.mxu0 %v8953_v59  ;;  %8216 = vmatpush3.bf16.msra.mxu1 %v9041_v20 }
 0x64b   :  { %8217 = vmatprep.subr.bf16.mxu0 %v8680_v36  ;;  %8226 = vmatprep.subr.bf16.mxu1 %v8680_v36 }
 0x708   :  { %v2267_v40 = vpop.f32.mrb[24].mxu0  ;;  %v2347_v62 = vpop.f32.mrb[26].mxu1 }
 0x709   :  { %v2272_v44 = vrot.slane %v2267_v40, 6  ;;  %v2352_v46 = vrot.slane %v2347_v62, 6  ;;  %v7435_v47 = vpop.f32.mrb[25].mxu0  ;;  %v7450_v48 = vpop.f32.mrb[27].mxu1 }
 0x70b   :  { %v2274_v49 = vadd.f32 %v2272_v44, %v9098_v34  ;;  %v2354_v51 = vadd.f32 %v2352_v46, %v9107_v43 }
 0x70d   :  { %v6442_v54 = vmul.f32 -1.442695, %v2274_v49  ;;  %v6444_v50 = vmul.f32 -1.442695, %v2354_v51 }
 0x70f   :  { %8560 = vpow2.f32 %v6442_v54 }
 0x710   :  { %8562 = vpow2.f32 %v6444_v50 }
 0x714   :  { %v2427_v55 = vpop.f32.mrb[26].mxu0  ;;  %v2502_v8 = vpop.f32.mrb[28].mxu1 }
 0x715   :  { %v2432_v57 = vrot.slane %v2427_v55, 6  ;;  %v2507_v58 = vrot.slane %v2502_v8, 6  ;;  %v7465_v60 = vpop.f32.mrb[27].mxu0  ;;  %v7480_v61 = vpop.f32.mrb[29].mxu1 }
 0x717   :  { %v2434_v63 = vadd.f32 %v2432_v57, %v9100_v35  ;;  %v2509_v0 = vadd.f32 %v2507_v58, %v9115_v53 }
 0x719   :  { %v8561_v2 = vpop.eup %8560  ;;  %v6447_v3 = vmul.f32 -1.442695, %v2509_v0  ;;  %8564 = vtanh.f32 %v2434_v63 }
 0x71a   :  { %v8563_v4 = vpop.eup %8562  ;;  %v2278_v5 = vadd.f32 1.0, %v8561_v2 }
 0x71b   :  { %v2358_v6 = vadd.f32 1.0, %v8563_v4  ;;  %8566 = vpow2.f32 %v6447_v3  ;;  %v3216_v4 = vld [vmem:[%s10042_s2 + $0x18] sm:$0xff] }
 0x71c   :  { %8568 = vrcp.f32 %v2278_v5 }
 0x71d   :  { %8570 = vrcp.f32 %v2358_v6  ;;  %v3309_v6 = vld [vmem:[%s10043_s5 + $0x10] sm:$0xff] }
 0x723   :  { %v8565_v9 = vpop.eup %8564 }
 0x725   :  { %v8567_v10 = vpop.eup %8566 }
 0x726   :  { %v8569_v12 = vpop.eup %8568  ;;  %v2513_v18 = vadd.f32 1.0, %v8567_v10 }
 0x727   :  { %v8571_v15 = vpop.eup %8570  ;;  %v2520_v16 = vmul.f32 %v8569_v12, %v8565_v9  ;;  %v3310_v9 = vld [vmem:[%s10043_s5 + $0x18] sm:$0xff]  ;;  %v3217_v12 = vld [vmem:[%s10042_s2 + $0x20] sm:$0xff] }
 0x728   :  { %v2519_v19 = vmul.f32 %v8571_v15, %v2517_v13  ;;  %8572 = vrcp.f32 %v2513_v18  ;;  %v8287_v10 = vpack.c.bf16 %v3310_v9, %v3309_v6  ;;  %v3218_v13 = vld [vmem:[%s10042_s2 + $0x28] sm:$0xff]  ;;  %v3311_v15 = vld [vmem:[%s10043_s5 + $0x20] sm:$0xff] }
 0x729   :  { %v3312_v18 = vld [vmem:[%s10043_s5 + $0x28] sm:$0xff] }
 0x72a   :  { %v9354_v21 = vadd.f32 %v2520_v16, %v2519_v19  ;;  %v8279_v16 = vpack.c.bf16 %v3218_v13, %v3217_v12  ;;  %v8291_v19 = vpack.c.bf16 %v3312_v18, %v3311_v15  ;;  %v8683_v18 = vmov 1966171168  }
 0x72c   :  { %8574 = vtanh.f32 %v9354_v21  ;;  %v2846_v55 = vrot.slane %v9354_v21, 6  ;;  %v3395_v21 = vld [vmem:[%s10003_s11] sm:$0xff] }
 0x732   :  { %v8573_v22 = vpop.eup %8572 }
 0x736   :  { %v8575_v24 = vpop.eup %8574 }
 0x737   :  { %v2523_v25 = vmul.f32 %v8575_v24, %v8573_v22  ;;  %v3396_v22 = vld [vmem:[%s10003_s11 + $0x8] sm:$0xff] }
 0x738   :  { %v8295_v24 = vpack.c.bf16 %v3396_v22, %v3395_v21  ;;  %v3193_v21 = vlaneseq  ;;  %v3186_v22 = vld [vmem:[%s10045_s26] sm:$0x3] }
 0x739   :  { %2524 = vst.msk [vmem:[#allocation2 + $0x3] sm:$0x4] %vm1215_vm5, %v2523_v25  ;;  %v2527_v27 = vrot.slane %v2523_v25, 2 }
 0x73a   :  { %2525 = vst.msk [vmem:[#allocation2 + $0xa] sm:$0x8] %vm1217_vm6, %v2523_v25 }
 0x73b   :  { %7494 = vmatmul.mubr.msk.f32.vlgmr.msra.gmra.mrb[28].mxu0 %vm222_vm1, %v2527_v27  ;;  %7509 = vmatmul.mubr.msk.f32.vlgmr.msra.gmra.mrb[30].mxu1 %vm222_vm1, %v2527_v27 }
 0x73c   :  { %8219 = vmatpush3.bf16.msra.mxu0 %v8970_v1  ;;  %8228 = vmatpush3.bf16.msra.mxu1 %v9053_v23 }
 0x73d   :  { %8220 = vmatprep.subr.bf16.mxu0 %v8680_v36  ;;  %8229 = vmatprep.subr.bf16.mxu1 %v8680_v36 }
 0x73e   :  { %7523 = vmatprep.mubr.msk.f32.mxu0 %vm8681_vm2, %v8682_v56  ;;  %7538 = vmatprep.mubr.msk.f32.mxu1 %vm8681_vm2, %v8682_v56 }
 0x740   :  { %8222 = vmatpush3.bf16.msra.mxu0 %v8989_v7  ;;  %8231 = vmatpush3.bf16.msra.mxu1 %v9066_v26 }
 0x741   :  { %8223 = vmatprep.subr.bf16.mxu0 %v8680_v36  ;;  %8232 = vmatprep.subr.bf16.mxu1 %v8680_v36 }
 0x744   :  { %8225 = vmatpush3.bf16.msra.mxu0 %v9001_v11  ;;  %8234 = vmatpush3.bf16.msra.mxu1 %v9078_v29 }
 0x745   :  { %8235 = vmatprep.subr.bf16.mxu0 %v8680_v36  ;;  %8244 = vmatprep.subr.bf16.mxu1 %v8680_v36 }
 0x747   :  { %7524 = vmatmul.mubr.msk.f32.vlgmr.msra.gmra.mrb[30].mxu0 %vm222_vm1, %v2527_v27  ;;  %7539 = vmatmul.mubr.msk.f32.vlgmr.msra.gmra.mrb[32].mxu1 %vm222_vm1, %v2527_v27 }
 0x748   :  { %8237 = vmatpush3.bf16.msra.mxu0 %v8911_v45  ;;  %8246 = vmatpush3.bf16.msra.mxu1 %v9010_v14 }
 0x749   :  { %8238 = vmatprep.subr.bf16.mxu0 %v8680_v36  ;;  %8247 = vmatprep.subr.bf16.mxu1 %v8680_v36 }
 0x74a   :  { %7553 = vmatprep.mubr.msk.f32.mxu0 %vm8681_vm2, %v8682_v56  ;;  %7568 = vmatprep.mubr.msk.f32.mxu1 %vm8681_vm2, %v8682_v56 }
 0x74c   :  { %8240 = vmatpush3.bf16.msra.mxu0 %v8934_v52  ;;  %8249 = vmatpush3.bf16.msra.mxu1 %v9025_v17 }
 0x74d   :  { %8241 = vmatprep.subr.bf16.mxu0 %v8680_v36  ;;  %8250 = vmatprep.subr.bf16.mxu1 %v8680_v36 }
 0x750   :  { %8243 = vmatpush3.bf16.msra.mxu0 %v8953_v59  ;;  %8252 = vmatpush3.bf16.msra.mxu1 %v9041_v20 }
 0x751   :  { %8253 = vmatprep.subr.bf16.mxu0 %v8680_v36  ;;  %8262 = vmatprep.subr.bf16.mxu1 %v8680_v36 }
 0x80e   :  { %v2596_v45 = vpop.f32.mrb[28].mxu0  ;;  %v2676_v14 = vpop.f32.mrb[30].mxu1 }
 0x80f   :  { %v2601_v28 = vrot.slane %v2596_v45, 4  ;;  %v2681_v30 = vrot.slane %v2676_v14, 4  ;;  %v7495_v31 = vpop.f32.mrb[29].mxu0  ;;  %v7510_v52 = vpop.f32.mrb[31].mxu1 }
 0x811   :  { %v2603_v17 = vadd.f32 %v2601_v28, %v9098_v34  ;;  %v2683_v32 = vadd.f32 %v2681_v30, %v9107_v43 }
 0x813   :  { %v6449_v33 = vmul.f32 -1.442695, %v2603_v17  ;;  %v6451_v37 = vmul.f32 -1.442695, %v2683_v32 }
 0x815   :  { %8576 = vpow2.f32 %v6449_v33 }
 0x816   :  { %8578 = vpow2.f32 %v6451_v37 }
 0x81a   :  { %v2756_v59 = vpop.f32.mrb[30].mxu0  ;;  %v2831_v20 = vpop.f32.mrb[32].mxu1 }
 0x81b   :  { %v2761_v38 = vrot.slane %v2756_v59, 4  ;;  %v2836_v39 = vrot.slane %v2831_v20, 4  ;;  %v7525_v41 = vpop.f32.mrb[31].mxu0  ;;  %v7540_v42 = vpop.f32.mrb[33].mxu1 }
 0x81d   :  { %v2763_v40 = vadd.f32 %v2761_v38, %v9100_v35  ;;  %v2838_v62 = vadd.f32 %v2836_v39, %v9115_v53 }
 0x81f   :  { %v8577_v44 = vpop.eup %8576  ;;  %v6454_v46 = vmul.f32 -1.442695, %v2838_v62  ;;  %8580 = vtanh.f32 %v2763_v40 }
 0x820   :  { %v8579_v47 = vpop.eup %8578  ;;  %v2607_v48 = vadd.f32 1.0, %v8577_v44 }
 0x821   :  { %v2687_v49 = vadd.f32 1.0, %v8579_v47  ;;  %8582 = vpow2.f32 %v6454_v46 }
 0x822   :  { %8584 = vrcp.f32 %v2607_v48 }
 0x823   :  { %8586 = vrcp.f32 %v2687_v49 }
 0x829   :  { %v8581_v51 = vpop.eup %8580 }
 0x82b   :  { %v8583_v54 = vpop.eup %8582 }
 0x82c   :  { %v8585_v50 = vpop.eup %8584  ;;  %v2842_v58 = vadd.f32 1.0, %v8583_v54 }
 0x82d   :  { %v8587_v8 = vpop.eup %8586  ;;  %v2849_v57 = vmul.f32 %v8585_v50, %v8581_v51 }
 0x82e   :  { %v2848_v60 = vmul.f32 %v8587_v8, %v2846_v55  ;;  %8588 = vrcp.f32 %v2842_v58  ;;  %v3397_v58 = vld [vmem:[%s10003_s11 + $0x10] sm:$0xff] }
 0x830   :  { %v9400_v61 = vadd.f32 %v2849_v57, %v2848_v60  ;;  %v3398_v60 = vld [vmem:[%s10003_s11 + $0x18] sm:$0xff] }
 0x832   :  { %8590 = vtanh.f32 %v9400_v61  ;;  %v3175_v49 = vrot.slane %v9400_v61, 6 }
 0x838   :  { %v8589_v63 = vpop.eup %8588 }
 0x83c   :  { %v8591_v0 = vpop.eup %8590 }
 0x83d   :  { %v2852_v2 = vmul.f32 %v8591_v0, %v8589_v63  ;;  %v8299_v0 = vpack.c.bf16 %v3398_v60, %v3397_v58 }
 0x83f   :  { %2853 = vst.msk [vmem:[#allocation2 + $0x2] sm:$0x10] %vm1546_vm7, %v2852_v2  ;;  %v2856_v3 = vrot.slane %v2852_v2, 4 }
 0x840   :  { %2854 = vst.msk [vmem:[#allocation2 + $0x9] sm:$0x20] %vm1548_vm8, %v2852_v2  ;;  %v3399_v2 = vld [vmem:[%s10003_s11 + $0x20] sm:$0xff] }
 0x841   :  { %7554 = vmatmul.mubr.msk.f32.vlgmr.msra.gmra.mrb[32].mxu0 %vm222_vm1, %v2856_v3  ;;  %7569 = vmatmul.mubr.msk.f32.vlgmr.msra.gmra.mrb[34].mxu1 %vm222_vm1, %v2856_v3 }
 0x842   :  { %8255 = vmatpush3.bf16.msra.mxu0 %v8970_v1  ;;  %8264 = vmatpush3.bf16.msra.mxu1 %v9053_v23  ;;  %v3213_v1 = vld [vmem:[%s10042_s2] sm:$0xff] }
 0x843   :  { %8256 = vmatprep.subr.bf16.mxu0 %v8680_v36  ;;  %8265 = vmatprep.subr.bf16.mxu1 %v8680_v36 }
 0x844   :  { %7583 = vmatprep.mubr.msk.f32.mxu0 %vm8681_vm2, %v8682_v56  ;;  %7598 = vmatprep.mubr.msk.f32.mxu1 %vm8681_vm2, %v8682_v56 }
 0x846   :  { %8258 = vmatpush3.bf16.msra.mxu0 %v8989_v7  ;;  %8267 = vmatpush3.bf16.msra.mxu1 %v9066_v26  ;;  %v3214_v7 = vld [vmem:[%s10042_s2 + $0x8] sm:$0xff] }
 0x847   :  { %8259 = vmatprep.subr.bf16.mxu0 %v8680_v36  ;;  %8268 = vmatprep.subr.bf16.mxu1 %v8680_v36  ;;  %v8271_v23 = vpack.c.bf16 %v3214_v7, %v3213_v1  ;;  %v3307_v36 = vld [vmem:[%s10043_s5] sm:$0xff] }
 0x848   :  { %v6465_v7 = vld [vmem:[%s10002_s10] ss:$0 sm:$0xff] }
 0x84a   :  { %8261 = vmatpush3.bf16.msra.mxu0 %v9001_v11  ;;  %8270 = vmatpush3.bf16.msra.mxu1 %v9078_v29  ;;  %v3308_v11 = vld [vmem:[%s10043_s5 + $0x8] sm:$0xff]  ;;  %v3215_v29 = vld [vmem:[%s10042_s2 + $0x10] sm:$0xff] }
 0x84b   :  { %v8283_v26 = vpack.c.bf16 %v3308_v11, %v3307_v36  ;;  %8272 = vmatprep.subr.bf16.mxu0 %v8271_v23  ;;  %v8275_v5 = vpack.c.bf16 %v3216_v4, %v3215_v29  ;;  %v6462_v11 = vld [vmem:[%s10044_s9] ss:$0 sm:$0xff] }
 0x84d   :  { %7584 = vmatmul.mubr.msk.f32.vlgmr.msra.gmra.mrb[34].mxu0 %vm222_vm1, %v2856_v3  ;;  %7599 = vmatmul.mubr.msk.f32.vlgmr.msra.gmra.mrb[36].mxu1 %vm222_vm1, %v2856_v3  ;;  %v3400_v3 = vld [vmem:[%s10003_s11 + $0x28] sm:$0xff] }
 0x84e   :  { %8274 = vmatpush3.bf16.msra.mxu0 %v8271_v23  ;;  %8284 = vmatprep.subr.bf16.mxu1 %v8283_v26  ;;  %v8303_v1 = vpack.c.bf16 %v3400_v3, %v3399_v2  ;;  %v6483_v2 = vld [vmem:[%s10042_s2 + $0x40] sm:$0xff]  ;;  %v6484_v3 = vld [vmem:[%s10042_s2 + $0x48] sm:$0xff] }
 0x84f   :  { %8286 = vmatpush3.bf16.msra.mxu1 %v8283_v26  ;;  %8276 = vmatprep.subr.bf16.mxu0 %v8275_v5 }
 0x850   :  { %8288 = vmatprep.subr.bf16.mxu1 %v8287_v10 }
 0x852   :  { %8278 = vmatpush3.bf16.msra.mxu0 %v8275_v5 }
 0x853   :  { %8290 = vmatpush3.bf16.msra.mxu1 %v8287_v10  ;;  %8280 = vmatprep.subr.bf16.mxu0 %v8279_v16  ;;  %v6468_v10 = vld [vmem:[%s10004_s12] ss:$0 sm:$0xff] }
 0x854   :  { %8292 = vmatprep.subr.bf16.mxu1 %v8291_v19 }
 0x856   :  { %8282 = vmatpush3.bf16.msra.mxu0 %v8279_v16 }
 0x857   :  { %8294 = vmatpush3.bf16.msra.mxu1 %v8291_v19  ;;  %8296 = vmatprep.subr.bf16.mxu0 %v8295_v24  ;;  %v3191_v19 = vunpack.c.l.s4 %v8683_v18  ;;  %v3820_v18 = vld [vmem:[%s10005_s13 + $0x8] sm:$0xf] }
 0x858   :  { %7646 = vmatprep.subr.mxu1 %v8682_v56 }
 0x914   :  { %v2925_v25 = vpop.f32.mrb[32].mxu0  ;;  %v3005_v27 = vpop.f32.mrb[34].mxu1 }
 0x915   :  { %v2930_v45 = vrot.slane %v2925_v25, 2  ;;  %v3010_v14 = vrot.slane %v3005_v27, 2  ;;  %v7555_v28 = vpop.f32.mrb[33].mxu0  ;;  %v7570_v30 = vpop.f32.mrb[35].mxu1  ;;  %v3192_v25 = vunpack.c.0.s8 %v3191_v19  ;;  %v9529_v27 = vshrl.u32 %v3193_v21, 7 }
 0x917   :  { %v2932_v31 = vadd.f32 %v2930_v45, %v9098_v34  ;;  %v3012_v52 = vadd.f32 %v3010_v14, %v9107_v43  ;;  %v3195_v14 = vsub.s32 %v3192_v25, %v9529_v27  ;;  %v6492_v25 = vld [vmem:[%s10043_s5 + $0x38] sm:$0xff] }
 0x919   :  { %v6456_v17 = vmul.f32 -1.442695, %v2932_v31  ;;  %v6458_v32 = vmul.f32 -1.442695, %v3012_v52  ;;  %v3640_v52 = vsub.s32 0, %v9529_v27 }
 0x91b   :  { %8592 = vpow2.f32 %v6456_v17 }
 0x91c   :  { %8594 = vpow2.f32 %v6458_v32 }
 0x920   :  { %v3085_v33 = vpop.f32.mrb[34].mxu0  ;;  %v3160_v37 = vpop.f32.mrb[36].mxu1 }
 0x921   :  { %v3090_v59 = vrot.slane %v3085_v33, 2  ;;  %v3165_v20 = vrot.slane %v3160_v37, 2  ;;  %v7585_v38 = vpop.f32.mrb[35].mxu0  ;;  %v7600_v39 = vpop.f32.mrb[37].mxu1 }
 0x923   :  { %v3092_v41 = vadd.f32 %v3090_v59, %v9100_v35  ;;  %v3167_v42 = vadd.f32 %v3165_v20, %v9115_v53 }
 0x925   :  { %v8593_v40 = vpop.eup %8592  ;;  %v6461_v62 = vmul.f32 -1.442695, %v3167_v42  ;;  %8596 = vtanh.f32 %v3092_v41 }
 0x926   :  { %v8595_v44 = vpop.eup %8594  ;;  %v2936_v34 = vadd.f32 1.0, %v8593_v40 }
 0x927   :  { %v3016_v43 = vadd.f32 1.0, %v8595_v44  ;;  %8598 = vpow2.f32 %v6461_v62 }
 0x928   :  { %8600 = vrcp.f32 %v2936_v34 }
 0x929   :  { %8602 = vrcp.f32 %v3016_v43 }
 0x92f   :  { %v8597_v46 = vpop.eup %8596 }
 0x931   :  { %v8599_v47 = vpop.eup %8598 }
 0x932   :  { %v8601_v48 = vpop.eup %8600  ;;  %v3171_v50 = vadd.f32 1.0, %v8599_v47 }
 0x933   :  { %v8603_v51 = vpop.eup %8602  ;;  %v3178_v54 = vmul.f32 %v8601_v48, %v8597_v46 }
 0x934   :  { %v3177_v35 = vmul.f32 %v8603_v51, %v3175_v49  ;;  %8604 = vrcp.f32 %v3171_v50 }
 0x936   :  { %v3179_v55 = vadd.f32 %v3178_v54, %v3177_v35 }
 0x938   :  { %8606 = vtanh.f32 %v3179_v55  ;;  %v6481_v55 = vld [vmem:[%s10042_s2 + $0x30] sm:$0xff] }
 0x93e   :  { %v8605_v53 = vpop.eup %8604 }
 0x942   :  { %v8607_v8 = vpop.eup %8606 }
 0x943   :  { %v3181_v57 = vmul.f32 %v8607_v8, %v8605_v53  ;;  %v6482_v53 = vld [vmem:[%s10042_s2 + $0x38] sm:$0xff] }
 0x944   :  { %v8313_v8 = vpack.c.bf16 %v6482_v53, %v6481_v55 }
 0x945   :  { %3182 = vst.msk [vmem:[#allocation2 + $0x1] sm:$0x40] %vm1877_vm9, %v3181_v57 }
 0x946   :  { %3183 = vst.msk [vmem:[#allocation2 + $0x8] sm:$0x80] %vm1879_vm10, %v3181_v57 }
 0x94c   :  { %v9479_v61 = vld [vmem:[#allocation2] sm:$0xff] }
 0x94d   :  { %v9481_v63 = vld [vmem:[#allocation2 + $0x8] sm:$0xff]  ;;  %7613 = vmatprep.mubr.msk.f32.mxu0 %vm222_vm1, %v9479_v61  ;;  %7628 = vmatprep.mubr.msk.f32.mxu1 %vm222_vm1, %v9479_v61 }
 0x94e   :  { %7614 = vmatmul.mubr.msk.f32.vlgmr.msra.gmra.mrb[36].mxu0 %vm222_vm1, %v9481_v63  ;;  %7629 = vmatmul.mubr.msk.f32.vlgmr.msra.gmra.mrb[38].mxu1 %vm222_vm1, %v9481_v63 }
 0x94f   :  { %8298 = vmatpush3.bf16.msra.mxu0 %v8295_v24  ;;  %7643 = vmatprep.mubr.msk.f32.mxu0 %vm222_vm1, %v9479_v61  ;;  %v3187_v24 = vsub.f32 1.0, %v3186_v22 }
 0x950   :  { %8300 = vmatprep.subr.bf16.mxu0 %v8299_v0  ;;  %7648 = vmatprep.mubr.msk.f32.mxu1 %vm8681_vm2, %v8682_v56 }
 0x951   :  { %v3188_v45 = vmul.f32 -10000.0, %v3187_v24  ;;  %v6491_v24 = vld [vmem:[%s10043_s5 + $0x30] sm:$0xff] }
 0x953   :  { %8302 = vmatpush3.bf16.msra.mxu0 %v8299_v0  ;;  %v3196_v28 = vrot.slane %v3188_v45, %v3195_v14  ;;  %v8325_v45 = vpack.c.bf16 %v6492_v25, %v6491_v24  ;;  %v6525_v24 = vld [vmem:[%s10042_s2 + $0x78] sm:$0xff] }
 0x954   :  { %8304 = vmatprep.subr.bf16.mxu0 %v8303_v1 }
 0x955   :  { %v3197_v30 = vcombine.high %v3196_v28, %v3196_v28  ;;  %v3204_v31 = vrot.slane %v3196_v28, %v3195_v14  ;;  %v6493_v28 = vld [vmem:[%s10043_s5 + $0x40] sm:$0xff] }
 0x957   :  { %8306 = vmatpush3.bf16.msra.mxu0 %v8303_v1  ;;  %v3211_v17 = vrot.slane %v3197_v30, %v3195_v14  ;;  %v9533_v33 = vrot.slane %v3204_v31, %v3640_v52  ;;  %v6494_v30 = vld [vmem:[%s10043_s5 + $0x48] sm:$0xff] }
 0x958   :  { %7651 = vmatprep.subr.mxu0 %v8682_v56 }
 0x959   :  { %v9535_v41 = vrot.slane %v3211_v17, %v3640_v52  ;;  %v8329_v52 = vpack.c.bf16 %v6494_v30, %v6493_v28  ;;  %v6526_v28 = vld [vmem:[%s10042_s2 + $0x80] sm:$0xff]  ;;  %v6527_v30 = vld [vmem:[%s10042_s2 + $0x88] sm:$0xff] }
 0x95a   :  { %7644 = vmatmul.mubr.msk.f32.vlgmr.msra.gmra.mrb[38].mxu0 %vm222_vm1, %v9481_v63 }
 0x95b   :  { %7653 = vmatprep.mubr.msk.f32.mxu0 %vm8681_vm2, %v8682_v56 }
 0xa21   :  { %v7615_v23 = vpop.f32.mrb[36].mxu0  ;;  %v7630_v36 = vpop.f32.mrb[38].mxu1 }
 0xa22   :  { %v3392_v26 = vadd.f32 %v7630_v36, %v6465_v7  ;;  %v3298_v29 = vpop.f32.mrb[37].mxu0  ;;  %v3386_v4 = vpop.f32.mrb[39].mxu1  ;;  %v3304_v6 = vadd.f32 %v7615_v23, %v6462_v11  ;;  %v8317_v23 = vpack.c.bf16 %v6484_v3, %v6483_v2  ;;  %v6485_v36 = vld [vmem:[%s10042_s2 + $0x50] sm:$0xff] }
 0xa23   :  { %v3387_v5 = vadd.f32 %v6465_v7, %v3386_v4  ;;  %v3299_v9 = vadd.f32 %v6462_v11, %v3298_v29  ;;  %v6486_v11 = vld [vmem:[%s10042_s2 + $0x58] sm:$0xff]  ;;  %v6501_v29 = vld [vmem:[%s10003_s11 + $0x30] sm:$0xff] }
 0xa24   :  { %7652 = vmatpush3.xpose.msk.msra.mxu0 %vm3483_vm11, %v3392_v26  ;;  %v8321_v26 = vpack.c.bf16 %v6486_v11, %v6485_v36  ;;  %v6502_v4 = vld [vmem:[%s10003_s11 + $0x38] sm:$0xff] }
 0xa25   :  { %7647 = vmatpush3.xpose.msk.msra.mxu1 %vm3483_vm11, %v3387_v5  ;;  %7661 = vmatprep.subr.mxu0 %v8682_v56  ;;  %v8337_v5 = vpack.c.bf16 %v6502_v4, %v6501_v29 }
 0xa26   :  { %7656 = vmatprep.subr.mxu1 %v8682_v56 }
 0xa27   :  { %7654 = vmatmul.mubr.msk.f32.vlgmr.msra.gmra.mrb[40].mxu0 %vm3483_vm11, %v3304_v6  ;;  %v6503_v6 = vld [vmem:[%s10003_s11 + $0x40] sm:$0xff] }
 0xa28   :  { %7649 = vmatmul.mubr.msk.f32.vlgmr.msra.gmra.mrb[40].mxu1 %vm3483_vm11, %v3299_v9  ;;  %7663 = vmatprep.mubr.msk.f32.mxu0 %vm8681_vm2, %v8682_v56  ;;  %v6504_v9 = vld [vmem:[%s10003_s11 + $0x48] sm:$0xff] }
 0xa29   :  { %7658 = vmatprep.mubr.msk.f32.mxu1 %vm8681_vm2, %v8682_v56 }
 0xa2d   :  { %v7645_v12 = vpop.f32.mrb[38].mxu0 }
 0xa2e   :  { %v3480_v13 = vadd.f32 %v7645_v12, %v6468_v10  ;;  %v3474_v15 = vpop.f32.mrb[39].mxu0  ;;  %v6505_v12 = vld [vmem:[%s10003_s11 + $0x50] sm:$0xff] }
 0xa2f   :  { %v3475_v16 = vadd.f32 %v6468_v10, %v3474_v15  ;;  %v8341_v10 = vpack.c.bf16 %v6504_v9, %v6503_v6  ;;  %v6522_v9 = vld [vmem:[%s10042_s2 + $0x60] sm:$0xff] }
 0xa30   :  { %7662 = vmatpush3.msra.mxu0 %v3480_v13  ;;  %v6506_v13 = vld [vmem:[%s10003_s11 + $0x58] sm:$0xff] }
 0xa31   :  { %7657 = vmatpush3.msra.mxu1 %v3475_v16  ;;  %8314 = vmatprep.subr.bf16.mxu0 %v8313_v8  ;;  %v8345_v15 = vpack.c.bf16 %v6506_v13, %v6505_v12  ;;  %v3819_v16 = vld [vmem:[%s10005_s13] sm:$0xff] }
 0xa32   :  { %v8307_v19 = vpack.c.bf16 %v3820_v18, %v3819_v16 }
 0xa34   :  { %8309 = vmatprep.subr.msk.bf16.mxu1 %vm9598_vm15, %v8307_v19 }
 0xafa   :  { %v3632_v32 = vpop.f32.mrb[40].mxu0 }
 0xafb   :  { %v3556_v37 = vpop.f32.mrb[40].mxu1  ;;  %v7655_v59 = vpop.f32.mrb[41].mxu0  ;;  %v3637_v20 = vmul.f32 0.28867513, %v3632_v32  ;;  %v6495_v32 = vld [vmem:[%s10043_s5 + $0x50] sm:$0xff] }
 0xafc   :  { %v3636_v38 = vmul.f32 0.28867513, %v3556_v37  ;;  %v7650_v39 = vpop.f32.mrb[41].mxu1  ;;  %v6496_v37 = vld [vmem:[%s10043_s5 + $0x58] sm:$0xff] }
 0xafd   :  { %v3649_v62 = vadd.f32 %v9535_v41, %v3637_v20  ;;  %v8333_v20 = vpack.c.bf16 %v6496_v37, %v6495_v32  ;;  %v6544_v37 = vld [vmem:[%s10003_s11 + $0x70] sm:$0xff] }
 0xafe   :  { %v3648_v42 = vadd.f32 %v9533_v33, %v3636_v38 }
 0xaff   :  { %v3654_v44 = vsel %vm3650_vm12, %v3649_v62, -inf }
 0xb00   :  { %v3651_v40 = vsel %vm3650_vm12, %v3648_v42, -inf }
 0xb01   :  { %3652 = vmax.xlane.f32.xlu0 %v3651_v40 }
 0xb05   :  { %3655 = vmax.xlane.f32.xlu0 %v3654_v44 }
 0xb8e   :  { %v3653_v34 = vpop.xlane.xlu0 %3652 }
 0xb8f   :  { %v3657_v43 = vsub.f32 %v3648_v42, %v3653_v34  ;;  %v6508_v42 = vld [vmem:[%s10004_s12 + $0x1] ss:$0 sm:$0xff] }
 0xb91   :  { %v3659_v46 = vmul.f32 1.442695, %v3657_v43  ;;  %v6498_v43 = vld [vmem:[%s10002_s10 + $0x1] ss:$0 sm:$0xff] }
 0xb92   :  { %v3656_v47 = vpop.xlane.xlu0 %3655 }
 0xb93   :  { %8608 = vpow2.f32 %v3659_v46  ;;  %v3658_v48 = vsub.f32 %v3649_v62, %v3656_v47 }
 0xb95   :  { %v3661_v49 = vmul.f32 1.442695, %v3658_v48  ;;  %v6488_v48 = vld [vmem:[%s10044_s9 + $0x1] ss:$0 sm:$0xff] }
 0xb97   :  { %8610 = vpow2.f32 %v3661_v49 }
 0xb9d   :  { %v8609_v51 = vpop.eup %8608 }
 0xb9e   :  { %v3663_v54 = vsel %vm3650_vm12, %v8609_v51, 0.0 }
 0xb9f   :  { %3664 = vadd.xlane.f32.xlu1 %v3663_v54 }
 0xba1   :  { %v8611_v50 = vpop.eup %8610 }
 0xba2   :  { %v3666_v35 = vsel %vm3650_vm12, %v8611_v50, 0.0 }
 0xba3   :  { %3667 = vadd.xlane.f32.xlu1 %v3666_v35 }
 0xc2c   :  { %v3665_v57 = vpop.xlane.xlu1 %3664 }
 0xc2d   :  { %8612 = vrcp.f32 %v3665_v57 }
 0xc30   :  { %v3668_v58 = vpop.xlane.xlu1 %3667 }
 0xc31   :  { %8614 = vrcp.f32 %v3668_v58 }
 0xc37   :  { %v8613_v60 = vpop.eup %8612 }
 0xc38   :  { %v3671_v0 = vmul.f32 %v8613_v60, %v8609_v51 }
 0xc3a   :  { %7659 = vmatmul.mubr.msk.f32.vlgmr.msra.gmra.mrb[42].mxu1 %vm3650_vm12, %v3671_v0 }
 0xc3b   :  { %v8615_v1 = vpop.eup %8614  ;;  %8312 = vmatpush3.bf16.msk.msra.mxu1 %vm9598_vm15, %v8307_v19  ;;  %v6524_v19 = vld [vmem:[%s10042_s2 + $0x70] sm:$0xff] }
 0xc3c   :  { %v3672_v7 = vmul.f32 %v8615_v1, %v8611_v50  ;;  %8326 = vmatprep.subr.bf16.mxu1 %v8325_v45 }
 0xc3e   :  { %7664 = vmatmul.mubr.msk.f32.vlgmr.msra.gmra.mrb[42].mxu0 %vm3650_vm12, %v3672_v7 }
 0xc3f   :  { %8316 = vmatpush3.bf16.msra.mxu0 %v8313_v8  ;;  %7685 = vmatprep.mubr.msk.f32.mxu0 %vm222_vm1, %v9479_v61 }
 0xc40   :  { %8318 = vmatprep.subr.bf16.mxu0 %v8317_v23 }
 0xc43   :  { %8320 = vmatpush3.bf16.msra.mxu0 %v8317_v23 }
 0xc44   :  { %8322 = vmatprep.subr.bf16.mxu0 %v8321_v26 }
 0xc47   :  { %8324 = vmatpush3.bf16.msra.mxu0 %v8321_v26 }
 0xc48   :  { %8338 = vmatprep.subr.bf16.mxu0 %v8337_v5 }
 0xc4a   :  { %7686 = vmatmul.mubr.msk.f32.vlgmr.msra.gmra.mrb[44].mxu0 %vm222_vm1, %v9481_v63 }
 0xc4b   :  { %8340 = vmatpush3.bf16.msra.mxu0 %v8337_v5  ;;  %7715 = vmatprep.mubr.msk.f32.mxu0 %vm222_vm1, %v9479_v61 }
 0xc4c   :  { %8342 = vmatprep.subr.bf16.mxu0 %v8341_v10 }
 0xc4f   :  { %8344 = vmatpush3.bf16.msra.mxu0 %v8341_v10  ;;  %v6523_v10 = vld [vmem:[%s10042_s2 + $0x68] sm:$0xff] }
 0xc50   :  { %8346 = vmatprep.subr.bf16.mxu0 %v8345_v15  ;;  %v8355_v12 = vpack.c.bf16 %v6523_v10, %v6522_v9 }
 0xc53   :  { %8348 = vmatpush3.bf16.msra.mxu0 %v8345_v15 }
 0xc54   :  { %7733 = vmatprep.subr.mxu0 %v8682_v56 }
 0xc56   :  { %7716 = vmatmul.mubr.msk.f32.vlgmr.msra.gmra.mrb[46].mxu0 %vm222_vm1, %v9481_v63 }
 0xc57   :  { %7735 = vmatprep.mubr.msk.f32.mxu0 %vm8681_vm2, %v8682_v56 }
 0xd0d   :  { %v3742_v14 = vpop.f32.mrb[42].mxu1 }
 0xd0e   :  { %v7660_v31 = vpop.f32.mrb[43].mxu1  ;;  %7670 = vmatprep.mubr.msk.f32.mxu1 %vm3483_vm11, %v3742_v14  ;;  %v8359_v14 = vpack.c.bf16 %v6525_v24, %v6524_v19 }
 0xd0f   :  { %v8363_v31 = vpack.c.bf16 %v6527_v30, %v6526_v28 }
 0xd11   :  { %v3815_v17 = vpop.f32.mrb[42].mxu0 }
 0xd12   :  { %v7665_v59 = vpop.f32.mrb[43].mxu0  ;;  %7671 = vmatmul.mubr.msk.f32.vlgmr.msra.gmra.mrb[44].mxu1 %vm3483_vm11, %v3815_v17  ;;  %v6543_v17 = vld [vmem:[%s10003_s11 + $0x68] sm:$0xff] }
 0xd13   :  { %8328 = vmatpush3.bf16.msra.mxu1 %v8325_v45  ;;  %7700 = vmatprep.mubr.msk.f32.mxu1 %vm222_vm1, %v9479_v61  ;;  %v6545_v59 = vld [vmem:[%s10003_s11 + $0x78] sm:$0xff] }
 0xd14   :  { %8330 = vmatprep.subr.bf16.mxu1 %v8329_v52 }
 0xd17   :  { %8332 = vmatpush3.bf16.msra.mxu1 %v8329_v52  ;;  %v6542_v52 = vld [vmem:[%s10003_s11 + $0x60] sm:$0xff] }
 0xd18   :  { %8334 = vmatprep.subr.bf16.mxu1 %v8333_v20  ;;  %v8379_v32 = vpack.c.bf16 %v6543_v17, %v6542_v52 }
 0xd1b   :  { %8336 = vmatpush3.bf16.msra.mxu1 %v8333_v20  ;;  %v8383_v20 = vpack.c.bf16 %v6545_v59, %v6544_v37  ;;  %v6563_v59 = vld [vmem:[%s10042_s2 + $0x90] sm:$0xff] }
 0xd1c   :  { %7718 = vmatprep.subr.mxu1 %v8682_v56 }
 0xd1d   :  { %v7687_v38 = vpop.f32.mrb[44].mxu0 }
 0xd1e   :  { %v3995_v39 = vpop.f32.mrb[45].mxu0  ;;  %7701 = vmatmul.mubr.msk.f32.vlgmr.msra.gmra.mrb[46].mxu1 %vm222_vm1, %v9481_v63  ;;  %v4001_v50 = vadd.f32 %v7687_v38, %v6488_v48  ;;  %v6546_v38 = vld [vmem:[%s10003_s11 + $0x80] sm:$0xff] }
 0xd1f   :  { %7720 = vmatprep.mubr.msk.f32.mxu1 %vm8681_vm2, %v8682_v56  ;;  %v3996_v51 = vadd.f32 %v6488_v48, %v3995_v39  ;;  %v6547_v39 = vld [vmem:[%s10003_s11 + $0x88] sm:$0xff]  ;;  %v6534_v48 = vld [vmem:[%s10043_s5 + $0x70] sm:$0xff] }
 0xd29   :  { %v7717_v40 = vpop.f32.mrb[46].mxu0 }
 0xd2a   :  { %v4181_v62 = vadd.f32 %v7717_v40, %v6508_v42  ;;  %v4175_v44 = vpop.f32.mrb[47].mxu0  ;;  %v6517_v40 = vld [vmem:[%s10005_s13 + $0x10] sm:$0xff] }
 0xd2b   :  { %v4176_v34 = vadd.f32 %v6508_v42, %v4175_v44  ;;  %v8387_v42 = vpack.c.bf16 %v6547_v39, %v6546_v38 }
 0xd2c   :  { %7734 = vmatpush3.msra.mxu0 %v4181_v62  ;;  %v6518_v62 = vld [vmem:[%s10005_s13 + $0x18] sm:$0xf] }
 0xd2d   :  { %8356 = vmatprep.subr.bf16.mxu0 %v8355_v12  ;;  %v8349_v44 = vpack.c.bf16 %v6518_v62, %v6517_v40 }
 0xdf1   :  { %v7702_v46 = vpop.f32.mrb[46].mxu1 }
 0xdf2   :  { %v4085_v47 = vpop.f32.mrb[47].mxu1  ;;  %v4091_v54 = vadd.f32 %v7702_v46, %v6498_v43 }
 0xdf3   :  { %v4086_v49 = vadd.f32 %v6498_v43, %v4085_v47  ;;  %v6533_v43 = vld [vmem:[%s10043_s5 + $0x68] sm:$0xff] }
 0xdf5   :  { %7719 = vmatpush3.xpose.msk.msra.mxu1 %vm3483_vm11, %v4086_v49  ;;  %v6535_v49 = vld [vmem:[%s10043_s5 + $0x78] sm:$0xff] }
 0xdf6   :  { %7723 = vmatprep.subr.mxu1 %v8682_v56 }
 0xdf8   :  { %7721 = vmatmul.mubr.msk.f32.vlgmr.msra.gmra.mrb[48].mxu1 %vm3483_vm11, %v3996_v51 }
 0xdf9   :  { %7724 = vmatpush3.xpose.msk.msra.mxu1 %vm3483_vm11, %v4091_v54  ;;  %7725 = vmatprep.mubr.msk.f32.mxu1 %vm8681_vm2, %v8682_v56  ;;  %v8371_v54 = vpack.c.bf16 %v6535_v49, %v6534_v48  ;;  %v6567_v48 = vld [vmem:[%s10042_s2 + $0xb0] sm:$0xff]  ;;  %v6568_v49 = vld [vmem:[%s10042_s2 + $0xb8] sm:$0xff] }
 0xdfa   :  { %7728 = vmatprep.subr.mxu1 %v8682_v56 }
 0xdfc   :  { %7726 = vmatmul.mubr.msk.f32.vlgmr.msra.gmra.mrb[50].mxu1 %vm3483_vm11, %v4001_v50 }
 0xdfd   :  { %7729 = vmatpush3.msra.mxu1 %v4176_v34  ;;  %7730 = vmatprep.mubr.msk.f32.mxu1 %vm8681_vm2, %v8682_v56  ;;  %v6532_v34 = vld [vmem:[%s10043_s5 + $0x60] sm:$0xff] }
 0xdfe   :  { %8351 = vmatprep.subr.msk.bf16.mxu1 %vm9598_vm15, %v8349_v44  ;;  %v8367_v46 = vpack.c.bf16 %v6533_v43, %v6532_v34  ;;  %v6566_v34 = vld [vmem:[%s10042_s2 + $0xa8] sm:$0xff] }
 0xecb   :  { %v4256_v35 = vpop.f32.mrb[48].mxu1 }
 0xecc   :  { %v4336_v55 = vmul.f32 0.28867513, %v4256_v35  ;;  %v7722_v53 = vpop.f32.mrb[49].mxu1  ;;  %v6536_v35 = vld [vmem:[%s10043_s5 + $0x80] sm:$0xff] }
 0xece   :  { %v4338_v8 = vadd.f32 %v4336_v55, %v9533_v33  ;;  %v6537_v55 = vld [vmem:[%s10043_s5 + $0x88] sm:$0xff] }
 0xecf   :  { %v4332_v57 = vpop.f32.mrb[50].mxu1 }
 0xed0   :  { %v4337_v58 = vmul.f32 0.28867513, %v4332_v57  ;;  %v7727_v60 = vpop.f32.mrb[51].mxu1  ;;  %v4340_v0 = vsel %vm3650_vm12, %v4338_v8, -inf }
 0xed1   :  { %4341 = vmax.xlane.f32.xlu0 %v4340_v0  ;;  %v6549_v60 = vld [vmem:[%s10004_s12 + $0x2] ss:$0 sm:$0xff] }
 0xed2   :  { %v4339_v2 = vadd.f32 %v4337_v58, %v9535_v41 }
 0xed4   :  { %v4343_v3 = vsel %vm3650_vm12, %v4339_v2, -inf }
 0xed5   :  { %4344 = vmax.xlane.f32.xlu1 %v4343_v3 }
 0xf5e   :  { %v4342_v1 = vpop.xlane.xlu0 %4341 }
 0xf5f   :  { %v4346_v7 = vsub.f32 %v4338_v8, %v4342_v1  ;;  %v8375_v8 = vpack.c.bf16 %v6537_v55, %v6536_v35  ;;  %v6585_v55 = vld [vmem:[%s10003_s11 + $0xa0] sm:$0xff] }
 0xf61   :  { %v4348_v23 = vmul.f32 1.442695, %v4346_v7  ;;  %v6539_v7 = vld [vmem:[%s10002_s10 + $0x2] ss:$0 sm:$0xff] }
 0xf62   :  { %v4345_v36 = vpop.xlane.xlu1 %4344 }
 0xf63   :  { %8616 = vpow2.f32 %v4348_v23  ;;  %v4347_v11 = vsub.f32 %v4339_v2, %v4345_v36 }
 0xf65   :  { %v4350_v26 = vmul.f32 1.442695, %v4347_v11  ;;  %v6529_v11 = vld [vmem:[%s10044_s9 + $0x2] ss:$0 sm:$0xff] }
 0xf67   :  { %8618 = vpow2.f32 %v4350_v26 }
 0xf6d   :  { %v8617_v29 = vpop.eup %8616 }
 0xf6e   :  { %v4352_v4 = vsel %vm3650_vm12, %v8617_v29, 0.0 }
 0xf6f   :  { %4353 = vadd.xlane.f32.xlu0 %v4352_v4 }
 0xf71   :  { %v8619_v5 = vpop.eup %8618 }
 0xf72   :  { %v4355_v6 = vsel %vm3650_vm12, %v8619_v5, 0.0 }
 0xf73   :  { %4356 = vadd.xlane.f32.xlu1 %v4355_v6 }
 0xffc   :  { %v4354_v13 = vpop.xlane.xlu0 %4353 }
 0xffd   :  { %8620 = vrcp.f32 %v4354_v13 }
0x1000   :  { %v4357_v15 = vpop.xlane.xlu1 %4356 }
0x1001   :  { %8622 = vrcp.f32 %v4357_v15 }
0x1007   :  { %v8621_v16 = vpop.eup %8620 }
0x1008   :  { %v4360_v18 = vmul.f32 %v8621_v16, %v8617_v29 }
0x100a   :  { %7731 = vmatmul.mubr.msk.f32.vlgmr.msra.gmra.mrb[52].mxu1 %vm3650_vm12, %v4360_v18 }
0x100b   :  { %v8623_v25 = vpop.eup %8622  ;;  %8354 = vmatpush3.bf16.msk.msra.mxu1 %vm9598_vm15, %v8349_v44  ;;  %v6565_v44 = vld [vmem:[%s10042_s2 + $0xa0] sm:$0xff] }
0x100c   :  { %v4361_v45 = vmul.f32 %v8623_v25, %v8619_v5  ;;  %8368 = vmatprep.subr.bf16.mxu1 %v8367_v46 }
0x100e   :  { %7736 = vmatmul.mubr.msk.f32.vlgmr.msra.gmra.mrb[48].mxu0 %vm3650_vm12, %v4361_v45 }
0x100f   :  { %8358 = vmatpush3.bf16.msra.mxu0 %v8355_v12  ;;  %7757 = vmatprep.mubr.msk.f32.mxu0 %vm222_vm1, %v9479_v61 }
0x1010   :  { %8360 = vmatprep.subr.bf16.mxu0 %v8359_v14 }
0x1013   :  { %8362 = vmatpush3.bf16.msra.mxu0 %v8359_v14 }
0x1014   :  { %8364 = vmatprep.subr.bf16.mxu0 %v8363_v31 }
0x1017   :  { %8366 = vmatpush3.bf16.msra.mxu0 %v8363_v31 }
0x1018   :  { %8380 = vmatprep.subr.bf16.mxu0 %v8379_v32 }
0x101a   :  { %7758 = vmatmul.mubr.msk.f32.vlgmr.msra.gmra.mrb[50].mxu0 %vm222_vm1, %v9481_v63 }
0x101b   :  { %8382 = vmatpush3.bf16.msra.mxu0 %v8379_v32  ;;  %7787 = vmatprep.mubr.msk.f32.mxu0 %vm222_vm1, %v9479_v61 }
0x101c   :  { %8384 = vmatprep.subr.bf16.mxu0 %v8383_v20 }
0x101f   :  { %8386 = vmatpush3.bf16.msra.mxu0 %v8383_v20  ;;  %v6564_v20 = vld [vmem:[%s10042_s2 + $0x98] sm:$0xff] }
0x1020   :  { %8388 = vmatprep.subr.bf16.mxu0 %v8387_v42  ;;  %v8397_v38 = vpack.c.bf16 %v6564_v20, %v6563_v59 }
0x1023   :  { %8390 = vmatpush3.bf16.msra.mxu0 %v8387_v42 }
0x1024   :  { %7805 = vmatprep.subr.mxu0 %v8682_v56 }
0x1026   :  { %7788 = vmatmul.mubr.msk.f32.vlgmr.msra.gmra.mrb[52].mxu0 %vm222_vm1, %v9481_v63 }
0x1027   :  { %7807 = vmatprep.mubr.msk.f32.mxu0 %vm8681_vm2, %v8682_v56 }
0x10dd   :  { %v4431_v47 = vpop.f32.mrb[52].mxu1 }
0x10de   :  { %v7732_v51 = vpop.f32.mrb[53].mxu1  ;;  %7742 = vmatprep.mubr.msk.f32.mxu1 %vm3483_vm11, %v4431_v47  ;;  %v8401_v47 = vpack.c.bf16 %v6566_v34, %v6565_v44 }
0x10df   :  { %v8405_v51 = vpack.c.bf16 %v6568_v49, %v6567_v48 }
0x10e1   :  { %v4504_v50 = vpop.f32.mrb[48].mxu0 }
0x10e2   :  { %v7737_v53 = vpop.f32.mrb[49].mxu0  ;;  %7743 = vmatmul.mubr.msk.f32.vlgmr.msra.gmra.mrb[44].mxu1 %vm3483_vm11, %v4504_v50  ;;  %v6584_v50 = vld [vmem:[%s10003_s11 + $0x98] sm:$0xff] }
0x10e3   :  { %8370 = vmatpush3.bf16.msra.mxu1 %v8367_v46  ;;  %7772 = vmatprep.mubr.msk.f32.mxu1 %vm222_vm1, %v9479_v61  ;;  %v6586_v53 = vld [vmem:[%s10003_s11 + $0xa8] sm:$0xff] }
0x10e4   :  { %8372 = vmatprep.subr.bf16.mxu1 %v8371_v54 }
0x10e7   :  { %8374 = vmatpush3.bf16.msra.mxu1 %v8371_v54  ;;  %v6583_v54 = vld [vmem:[%s10003_s11 + $0x90] sm:$0xff] }
0x10e8   :  { %8376 = vmatprep.subr.bf16.mxu1 %v8375_v8  ;;  %v8421_v35 = vpack.c.bf16 %v6584_v50, %v6583_v54 }
0x10eb   :  { %8378 = vmatpush3.bf16.msra.mxu1 %v8375_v8  ;;  %v8425_v8 = vpack.c.bf16 %v6586_v53, %v6585_v55 }
0x10ec   :  { %7790 = vmatprep.subr.mxu1 %v8682_v56 }
0x10ed   :  { %v7759_v57 = vpop.f32.mrb[50].mxu0 }
0x10ee   :  { %v4678_v58 = vpop.f32.mrb[51].mxu0  ;;  %7773 = vmatmul.mubr.msk.f32.vlgmr.msra.gmra.mrb[54].mxu1 %vm222_vm1, %v9481_v63  ;;  %v4684_v5 = vadd.f32 %v7759_v57, %v6529_v11  ;;  %v6587_v57 = vld [vmem:[%s10003_s11 + $0xb0] sm:$0xff] }
0x10ef   :  { %7792 = vmatprep.mubr.msk.f32.mxu1 %vm8681_vm2, %v8682_v56  ;;  %v4679_v29 = vadd.f32 %v6529_v11, %v4678_v58  ;;  %v6588_v58 = vld [vmem:[%s10003_s11 + $0xb8] sm:$0xff]  ;;  %v6575_v11 = vld [vmem:[%s10043_s5 + $0xa0] sm:$0xff] }
0x10f9   :  { %v7789_v0 = vpop.f32.mrb[52].mxu0 }
0x10fa   :  { %v4864_v2 = vadd.f32 %v7789_v0, %v6549_v60  ;;  %v4858_v3 = vpop.f32.mrb[53].mxu0  ;;  %v6558_v0 = vld [vmem:[%s10005_s13 + $0x20] sm:$0xff] }
0x10fb   :  { %v4859_v1 = vadd.f32 %v6549_v60, %v4858_v3  ;;  %v8429_v60 = vpack.c.bf16 %v6588_v58, %v6587_v57  ;;  %v6599_v58 = vld [vmem:[%s10005_s13 + $0x30] sm:$0xff] }
0x10fc   :  { %7806 = vmatpush3.msra.mxu0 %v4864_v2  ;;  %v6559_v2 = vld [vmem:[%s10005_s13 + $0x28] sm:$0xf] }
0x10fd   :  { %8398 = vmatprep.subr.bf16.mxu0 %v8397_v38  ;;  %v8391_v3 = vpack.c.bf16 %v6559_v2, %v6558_v0 }
0x11c1   :  { %v7774_v23 = vpop.f32.mrb[54].mxu1 }
0x11c2   :  { %v4768_v36 = vpop.f32.mrb[55].mxu1  ;;  %v4774_v4 = vadd.f32 %v7774_v23, %v6539_v7 }
0x11c3   :  { %v4769_v26 = vadd.f32 %v6539_v7, %v4768_v36  ;;  %v6574_v7 = vld [vmem:[%s10043_s5 + $0x98] sm:$0xff] }
0x11c5   :  { %7791 = vmatpush3.xpose.msk.msra.mxu1 %vm3483_vm11, %v4769_v26  ;;  %v6576_v26 = vld [vmem:[%s10043_s5 + $0xa8] sm:$0xff] }
0x11c6   :  { %7795 = vmatprep.subr.mxu1 %v8682_v56 }
0x11c8   :  { %7793 = vmatmul.mubr.msk.f32.vlgmr.msra.gmra.mrb[56].mxu1 %vm3483_vm11, %v4679_v29 }
0x11c9   :  { %7796 = vmatpush3.xpose.msk.msra.mxu1 %vm3483_vm11, %v4774_v4  ;;  %7797 = vmatprep.mubr.msk.f32.mxu1 %vm8681_vm2, %v8682_v56  ;;  %v8413_v4 = vpack.c.bf16 %v6576_v26, %v6575_v11 }
0x11ca   :  { %7800 = vmatprep.subr.mxu1 %v8682_v56 }
0x11cc   :  { %7798 = vmatmul.mubr.msk.f32.vlgmr.msra.gmra.mrb[58].mxu1 %vm3483_vm11, %v4684_v5 }
0x11cd   :  { %7801 = vmatpush3.msra.mxu1 %v4859_v1  ;;  %7802 = vmatprep.mubr.msk.f32.mxu1 %vm8681_vm2, %v8682_v56  ;;  %v6573_v1 = vld [vmem:[%s10043_s5 + $0x90] sm:$0xff] }
0x11ce   :  { %8393 = vmatprep.subr.msk.bf16.mxu1 %vm9598_vm15, %v8391_v3  ;;  %v8409_v23 = vpack.c.bf16 %v6574_v7, %v6573_v1 }
0x129b   :  { %v4939_v6 = vpop.f32.mrb[56].mxu1 }
0x129c   :  { %v5019_v9 = vmul.f32 0.28867513, %v4939_v6  ;;  %v7794_v10 = vpop.f32.mrb[57].mxu1  ;;  %v6577_v6 = vld [vmem:[%s10043_s5 + $0xb0] sm:$0xff] }
0x129e   :  { %v5021_v12 = vadd.f32 %v5019_v9, %v9533_v33  ;;  %v6578_v9 = vld [vmem:[%s10043_s5 + $0xb8] sm:$0xff] }
0x129f   :  { %v5015_v13 = vpop.f32.mrb[58].mxu1 }
0x12a0   :  { %v5020_v15 = vmul.f32 0.28867513, %v5015_v13  ;;  %v7799_v16 = vpop.f32.mrb[59].mxu1  ;;  %v5023_v18 = vsel %vm3650_vm12, %v5021_v12, -inf }
0x12a1   :  { %5024 = vmax.xlane.f32.xlu0 %v5023_v18  ;;  %v6590_v16 = vld [vmem:[%s10004_s12 + $0x3] ss:$0 sm:$0xff] }
0x12a2   :  { %v5022_v19 = vadd.f32 %v5020_v15, %v9535_v41 }
0x12a4   :  { %v5026_v24 = vsel %vm3650_vm12, %v5022_v19, -inf }
0x12a5   :  { %5027 = vmax.xlane.f32.xlu1 %v5026_v24 }
0x132e   :  { %v5025_v25 = vpop.xlane.xlu0 %5024 }
0x132f   :  { %v5029_v45 = vsub.f32 %v5021_v12, %v5025_v25  ;;  %v8417_v12 = vpack.c.bf16 %v6578_v9, %v6577_v6 }
0x1331   :  { %v5031_v14 = vmul.f32 1.442695, %v5029_v45  ;;  %v6580_v45 = vld [vmem:[%s10002_s10 + $0x3] ss:$0 sm:$0xff] }
0x1332   :  { %v5028_v28 = vpop.xlane.xlu1 %5027 }
0x1333   :  { %8624 = vpow2.f32 %v5031_v14  ;;  %v5030_v30 = vsub.f32 %v5022_v19, %v5028_v28 }
0x1335   :  { %v5033_v31 = vmul.f32 1.442695, %v5030_v30  ;;  %v6570_v30 = vld [vmem:[%s10044_s9 + $0x3] ss:$0 sm:$0xff] }
0x1337   :  { %8626 = vpow2.f32 %v5033_v31 }
0x133d   :  { %v8625_v52 = vpop.eup %8624 }
0x133e   :  { %v5035_v17 = vsel %vm3650_vm12, %v8625_v52, 0.0 }
0x133f   :  { %5036 = vadd.xlane.f32.xlu0 %v5035_v17 }
0x1341   :  { %v8627_v32 = vpop.eup %8626 }
0x1342   :  { %v5038_v37 = vsel %vm3650_vm12, %v8627_v32, 0.0 }
0x1343   :  { %5039 = vadd.xlane.f32.xlu1 %v5038_v37 }
0x13cc   :  { %v5037_v39 = vpop.xlane.xlu0 %5036 }
0x13cd   :  { %8628 = vrcp.f32 %v5037_v39 }
0x13d0   :  { %v5040_v42 = vpop.xlane.xlu1 %5039 }
0x13d1   :  { %8630 = vrcp.f32 %v5040_v42 }
0x13d7   :  { %v8629_v40 = vpop.eup %8628 }
0x13d8   :  { %v5043_v62 = vmul.f32 %v8629_v40, %v8625_v52 }
0x13da   :  { %7803 = vmatmul.mubr.msk.f32.vlgmr.msra.gmra.mrb[60].mxu1 %vm3650_vm12, %v5043_v62 }
0x13db   :  { %v8631_v43 = vpop.eup %8630  ;;  %8396 = vmatpush3.bf16.msk.msra.mxu1 %vm9598_vm15, %v8391_v3 }
0x13dc   :  { %v5044_v46 = vmul.f32 %v8631_v43, %v8627_v32  ;;  %8410 = vmatprep.subr.bf16.mxu1 %v8409_v23 }
0x13de   :  { %7808 = vmatmul.mubr.msk.f32.vlgmr.msra.gmra.mrb[54].mxu0 %vm3650_vm12, %v5044_v46 }
0x13df   :  { %8400 = vmatpush3.bf16.msra.mxu0 %v8397_v38  ;;  %7829 = vmatprep.mubr.msk.f32.mxu0 %vm222_vm1, %v9479_v61 }
0x13e0   :  { %8402 = vmatprep.subr.bf16.mxu0 %v8401_v47 }
0x13e3   :  { %8404 = vmatpush3.bf16.msra.mxu0 %v8401_v47 }
0x13e4   :  { %8406 = vmatprep.subr.bf16.mxu0 %v8405_v51 }
0x13e7   :  { %8408 = vmatpush3.bf16.msra.mxu0 %v8405_v51 }
0x13e8   :  { %8422 = vmatprep.subr.bf16.mxu0 %v8421_v35 }
0x13ea   :  { %7830 = vmatmul.mubr.msk.f32.vlgmr.msra.gmra.mrb[56].mxu0 %vm222_vm1, %v9481_v63 }
0x13eb   :  { %8424 = vmatpush3.bf16.msra.mxu0 %v8421_v35  ;;  %7859 = vmatprep.mubr.msk.f32.mxu0 %vm222_vm1, %v9479_v61 }
0x13ec   :  { %8426 = vmatprep.subr.bf16.mxu0 %v8425_v8 }
0x13ef   :  { %8428 = vmatpush3.bf16.msra.mxu0 %v8425_v8 }
0x13f0   :  { %8430 = vmatprep.subr.bf16.mxu0 %v8429_v60 }
0x13f3   :  { %8432 = vmatpush3.bf16.msra.mxu0 %v8429_v60  ;;  %v6600_v60 = vld [vmem:[%s10005_s13 + $0x38] sm:$0xf] }
0x13f4   :  { %7877 = vmatprep.subr.mxu0 %v8682_v56  ;;  %v8433_v0 = vpack.c.bf16 %v6600_v60, %v6599_v58 }
0x13f6   :  { %7860 = vmatmul.mubr.msk.f32.vlgmr.msra.gmra.mrb[58].mxu0 %vm222_vm1, %v9481_v63 }
0x13f7   :  { %7879 = vmatprep.mubr.msk.f32.mxu0 %vm8681_vm2, %v8682_v56 }
0x14ad   :  { %v5114_v36 = vpop.f32.mrb[60].mxu1 }
0x14ae   :  { %v7804_v29 = vpop.f32.mrb[61].mxu1  ;;  %7814 = vmatprep.mubr.msk.f32.mxu1 %vm3483_vm11, %v5114_v36 }
0x14b1   :  { %v5187_v5 = vpop.f32.mrb[54].mxu0 }
0x14b2   :  { %v7809_v10 = vpop.f32.mrb[55].mxu0  ;;  %7815 = vmatmul.mubr.msk.f32.vlgmr.msra.gmra.mrb[44].mxu1 %vm3483_vm11, %v5187_v5 }
0x14b3   :  { %8412 = vmatpush3.bf16.msra.mxu1 %v8409_v23  ;;  %7844 = vmatprep.mubr.msk.f32.mxu1 %vm222_vm1, %v9479_v61  ;;  %v6480_v23 = vld [vmem:[%s10006_s14] ss:$0 sm:$0xff] }
0x14b4   :  { %8414 = vmatprep.subr.bf16.mxu1 %v8413_v4 }
0x14b7   :  { %8416 = vmatpush3.bf16.msra.mxu1 %v8413_v4 }
0x14b8   :  { %8418 = vmatprep.subr.bf16.mxu1 %v8417_v12 }
0x14bb   :  { %8420 = vmatpush3.bf16.msra.mxu1 %v8417_v12 }
0x14bc   :  { %7862 = vmatprep.subr.mxu1 %v8682_v56 }
0x14bd   :  { %v7831_v13 = vpop.f32.mrb[56].mxu0 }
0x14be   :  { %v5361_v15 = vpop.f32.mrb[57].mxu0  ;;  %7845 = vmatmul.mubr.msk.f32.vlgmr.msra.gmra.mrb[62].mxu1 %vm222_vm1, %v9481_v63  ;;  %v5367_v32 = vadd.f32 %v7831_v13, %v6570_v30 }
0x14bf   :  { %7864 = vmatprep.mubr.msk.f32.mxu1 %vm8681_vm2, %v8682_v56  ;;  %v5362_v52 = vadd.f32 %v6570_v30, %v5361_v15 }
0x14c9   :  { %v7861_v18 = vpop.f32.mrb[58].mxu0 }
0x14ca   :  { %v5547_v19 = vadd.f32 %v7861_v18, %v6590_v16  ;;  %v5541_v24 = vpop.f32.mrb[59].mxu0 }
0x14cb   :  { %v5542_v25 = vadd.f32 %v6590_v16, %v5541_v24 }
0x14cc   :  { %7878 = vmatpush3.msra.mxu0 %v5547_v19 }
0x1591   :  { %v7846_v14 = vpop.f32.mrb[62].mxu1 }
0x1592   :  { %v5451_v28 = vpop.f32.mrb[63].mxu1  ;;  %v5457_v17 = vadd.f32 %v7846_v14, %v6580_v45  ;;  %v6012_v14 = vld [vmem:[%s10009_s17 + $0x10] sm:$0xff] }
0x1593   :  { %v5452_v31 = vadd.f32 %v6580_v45, %v5451_v28  ;;  %v6013_v28 = vld [vmem:[%s10009_s17 + $0x18] sm:$0xff] }
0x1594   :  { %v8443_v30 = vpack.c.bf16 %v6013_v28, %v6012_v14 }
0x1595   :  { %7863 = vmatpush3.xpose.msk.msra.mxu1 %vm3483_vm11, %v5452_v31  ;;  %v6014_v31 = vld [vmem:[%s10009_s17 + $0x20] sm:$0xff] }
0x1596   :  { %7867 = vmatprep.subr.mxu1 %v8682_v56 }
0x1598   :  { %7865 = vmatmul.mubr.msk.f32.vlgmr.msra.gmra.mrb[64].mxu1 %vm3483_vm11, %v5362_v52  ;;  %v6015_v52 = vld [vmem:[%s10009_s17 + $0x28] sm:$0xff] }
0x1599   :  { %7868 = vmatpush3.xpose.msk.msra.mxu1 %vm3483_vm11, %v5457_v17  ;;  %7869 = vmatprep.mubr.msk.f32.mxu1 %vm8681_vm2, %v8682_v56  ;;  %v8447_v17 = vpack.c.bf16 %v6015_v52, %v6014_v31 }
0x159a   :  { %7872 = vmatprep.subr.mxu1 %v8682_v56 }
0x159c   :  { %7870 = vmatmul.mubr.msk.f32.vlgmr.msra.gmra.mrb[66].mxu1 %vm3483_vm11, %v5367_v32 }
0x159d   :  { %7873 = vmatpush3.msra.mxu1 %v5542_v25  ;;  %7874 = vmatprep.mubr.msk.f32.mxu1 %vm8681_vm2, %v8682_v56  ;;  %v6011_v25 = vld [vmem:[%s10009_s17 + $0x8] sm:$0xff] }
0x159e   :  { %8435 = vmatprep.subr.msk.bf16.mxu1 %vm9598_vm15, %v8433_v0 }
0x166b   :  { %v5622_v37 = vpop.f32.mrb[64].mxu1 }
0x166c   :  { %v5702_v59 = vmul.f32 0.28867513, %v5622_v37  ;;  %v7866_v20 = vpop.f32.mrb[65].mxu1 }
0x166e   :  { %v5704_v38 = vadd.f32 %v5702_v59, %v9533_v33 }
0x166f   :  { %v5698_v39 = vpop.f32.mrb[66].mxu1 }
0x1670   :  { %v5703_v42 = vmul.f32 0.28867513, %v5698_v39  ;;  %v7871_v40 = vpop.f32.mrb[67].mxu1  ;;  %v5706_v62 = vsel %vm3650_vm12, %v5704_v38, -inf }
0x1671   :  { %5707 = vmax.xlane.f32.xlu0 %v5706_v62  ;;  %v6604_v40 = vld [vmem:[%s10007_s15] ss:$0 sm:$0xff] }
0x1672   :  { %v5705_v44 = vadd.f32 %v5703_v42, %v9535_v41 }
0x1674   :  { %v5709_v34 = vsel %vm3650_vm12, %v5705_v44, -inf }
0x1675   :  { %5710 = vmax.xlane.f32.xlu1 %v5709_v34 }
0x16fe   :  { %v5708_v43 = vpop.xlane.xlu0 %5707 }
0x16ff   :  { %v5712_v46 = vsub.f32 %v5704_v38, %v5708_v43  ;;  %v6605_v43 = vld [vmem:[%s10008_s16] ss:$0 sm:$0xff] }
0x1701   :  { %v5714_v47 = vmul.f32 1.442695, %v5712_v46 }
0x1702   :  { %v5711_v56 = vpop.xlane.xlu1 %5710 }
0x1703   :  { %8632 = vpow2.f32 %v5714_v47  ;;  %v5713_v48 = vsub.f32 %v5705_v44, %v5711_v56 }
0x1705   :  { %v5716_v49 = vmul.f32 1.442695, %v5713_v48 }
0x1707   :  { %8634 = vpow2.f32 %v5716_v49  ;;  %v6158_v49 = vld [vmem:[%s10011_s19] sm:$0xff] }
0x170d   :  { %v8633_v33 = vpop.eup %8632 }
0x170e   :  { %v5718_v51 = vsel %vm3650_vm12, %v8633_v33, 0.0 }
0x170f   :  { %5719 = vadd.xlane.f32.xlu0 %v5718_v51 }
0x1711   :  { %v8635_v54 = vpop.eup %8634 }
0x1712   :  { %v5721_v50 = vsel %vm3650_vm12, %v8635_v54, 0.0 }
0x1713   :  { %5722 = vadd.xlane.f32.xlu1 %v5721_v50  ;;  %v6161_v50 = vld [vmem:[%s10011_s19 + $0x18] sm:$0xff] }
0x179c   :  { %v5720_v41 = vpop.xlane.xlu0 %5719 }
0x179d   :  { %8636 = vrcp.f32 %v5720_v41 }
0x17a0   :  { %v5723_v35 = vpop.xlane.xlu1 %5722 }
0x17a1   :  { %8638 = vrcp.f32 %v5723_v35  ;;  %v6162_v35 = vld [vmem:[%s10011_s19 + $0x20] sm:$0xff] }
0x17a7   :  { %v8637_v55 = vpop.eup %8636 }
0x17a8   :  { %v5726_v53 = vmul.f32 %v8637_v55, %v8633_v33  ;;  %v6159_v33 = vld [vmem:[%s10011_s19 + $0x8] sm:$0xff] }
0x17a9   :  { %v8451_v51 = vpack.c.bf16 %v6159_v33, %v6158_v49  ;;  %v6163_v55 = vld [vmem:[%s10011_s19 + $0x28] sm:$0xff] }
0x17aa   :  { %7875 = vmatmul.mubr.msk.f32.vlgmr.msra.gmra.mrb[68].mxu1 %vm3650_vm12, %v5726_v53  ;;  %v8459_v53 = vpack.c.bf16 %v6163_v55, %v6162_v35 }
0x17ab   :  { %v8639_v8 = vpop.eup %8638  ;;  %8438 = vmatpush3.bf16.msk.msra.mxu1 %vm9598_vm15, %v8433_v0 }
0x17ac   :  { %v5727_v57 = vmul.f32 %v8639_v8, %v8635_v54  ;;  %8452 = vmatprep.subr.bf16.mxu1 %v8451_v51  ;;  %v6160_v54 = vld [vmem:[%s10011_s19 + $0x10] sm:$0xff]  ;;  %v6606_v8 = vld [vmem:[%s10010_s18] ss:$0 sm:$0xff] }
0x17ad   :  { %v8455_v41 = vpack.c.bf16 %v6161_v50, %v6160_v54 }
0x17ae   :  { %7880 = vmatmul.mubr.msk.f32.vlgmr.msra.gmra.mrb[60].mxu0 %vm3650_vm12, %v5727_v57 }
0x187d   :  { %v5797_v2 = vpop.f32.mrb[68].mxu1 }
0x187e   :  { %v7876_v3 = vpop.f32.mrb[69].mxu1  ;;  %7886 = vmatprep.mubr.msk.f32.mxu1 %vm3483_vm11, %v5797_v2 }
0x1881   :  { %v5870_v1 = vpop.f32.mrb[60].mxu0 }
0x1882   :  { %v7881_v7 = vpop.f32.mrb[61].mxu0  ;;  %7887 = vmatmul.mubr.msk.f32.vlgmr.msra.gmra.mrb[44].mxu1 %vm3483_vm11, %v5870_v1 }
0x1883   :  { %8454 = vmatpush3.bf16.msra.mxu1 %v8451_v51 }
0x1884   :  { %8456 = vmatprep.subr.bf16.mxu1 %v8455_v41 }
0x1887   :  { %8458 = vmatpush3.bf16.msra.mxu1 %v8455_v41  ;;  %v6609_v41 = vld [vmem:[%s10012_s20] ss:$0 sm:$0xff] }
0x1888   :  { %8460 = vmatprep.subr.bf16.mxu1 %v8459_v53 }
0x188b   :  { %8462 = vmatpush3.bf16.msra.mxu1 %v8459_v53 }
0x1955   :  { %v7888_v36 = vpop.f32.mrb[44].mxu1 }
0x1956   :  { %v8463_v11 = vadd.f32 %v7888_v36, %v6480_v23  ;;  %v5952_v26 = vpop.f32.mrb[45].mxu1 }
0x1957   :  { %v8464_v29 = vadd.f32 %v6480_v23, %v5952_v26 }
0x1958   :  { %v5964_v4 = vadd.f32 %v8463_v11, %v9481_v63 }
0x1959   :  { %v5963_v22 = vadd.f32 %v8464_v29, %v9479_v61  ;;  %v6010_v61 = vld [vmem:[%s10009_s17] sm:$0xff] }
0x195a   :  { %v5970_v5 = vsel %vm222_vm1, %v5964_v4, 0.0  ;;  %v8439_v45 = vpack.c.bf16 %v6011_v25, %v6010_v61 }
0x195b   :  { %5971 = vadd.xlane.f32.xlu1 %v5970_v5  ;;  %v5967_v6 = vsel %vm222_vm1, %v5963_v22, 0.0 }
0x195c   :  { %5968 = vadd.xlane.f32.xlu0 %v5967_v6  ;;  %8440 = vmatprep.subr.bf16.mxu0 %v8439_v45 }
0x195d   :  { %8442 = vmatpush3.bf16.msra.mxu0 %v8439_v45 }
0x195e   :  { %8444 = vmatprep.subr.bf16.mxu0 %v8443_v30 }
0x1961   :  { %8446 = vmatpush3.bf16.msra.mxu0 %v8443_v30 }
0x1962   :  { %8448 = vmatprep.subr.bf16.mxu0 %v8447_v17 }
0x1965   :  { %8450 = vmatpush3.bf16.msra.mxu0 %v8447_v17 }
0x19e8   :  { %v5972_v9 = vpop.xlane.xlu1 %5971 }
0x19e9   :  { %v5975_v10 = vmul.f32 0.020833334, %v5972_v9  ;;  %v5969_v12 = vpop.xlane.xlu0 %5968 }
0x19ea   :  { %v5974_v13 = vmul.f32 0.020833334, %v5969_v12 }
0x19eb   :  { %v5977_v15 = vsub.f32 %v5964_v4, %v5975_v10 }
0x19ec   :  { %v5976_v16 = vsub.f32 %v5963_v22, %v5974_v13 }
0x19ed   :  { %v5979_v18 = vmul.f32 %v5977_v15, %v5977_v15 }
0x19ee   :  { %v5978_v19 = vmul.f32 %v5976_v16, %v5976_v16 }
0x19ef   :  { %v5983_v24 = vsel %vm222_vm1, %v5979_v18, 0.0 }
0x19f0   :  { %5984 = vadd.xlane.f32.xlu1 %v5983_v24  ;;  %v5980_v63 = vsel %vm222_vm1, %v5978_v19, 0.0 }
0x19f1   :  { %5981 = vadd.xlane.f32.xlu0 %v5980_v63 }
0x1a7d   :  { %v5985_v32 = vpop.xlane.xlu1 %5984 }
0x1a7e   :  { %v5987_v37 = vmul.f32 0.020833334, %v5985_v32  ;;  %v5982_v59 = vpop.xlane.xlu0 %5981 }
0x1a7f   :  { %v5986_v20 = vmul.f32 0.020833334, %v5982_v59 }
0x1a80   :  { %v5989_v38 = vadd.f32 1e-12, %v5987_v37 }
0x1a81   :  { %v5988_v39 = vadd.f32 1e-12, %v5986_v20 }
0x1a82   :  { %8640 = vrsqrt.f32 %v5989_v38 }
0x1a83   :  { %8642 = vrsqrt.f32 %v5988_v39 }
0x1a8c   :  { %v8641_v42 = vpop.eup %8640 }
0x1a8d   :  { %v8643_v62 = vpop.eup %8642  ;;  %v5993_v44 = vmul.f32 %v8641_v42, %v5977_v15 }
0x1a8e   :  { %v5992_v34 = vmul.f32 %v8643_v62, %v5976_v16 }
0x1a8f   :  { %v6001_v46 = vmul.f32 %v6604_v40, %v5993_v44 }
0x1a90   :  { %v6000_v47 = vmul.f32 %v6604_v40, %v5992_v34  ;;  %v8685_v40 = vmov -1.0  }
0x1a91   :  { %v9929_v48 = vadd.f32 %v6605_v43, %v6001_v46 }
0x1a92   :  { %v9927_v56 = vadd.f32 %v6605_v43, %v6000_v47 }
0x1a94   :  { %7901 = vmatprep.mubr.msk.f32.mxu0 %vm222_vm1, %v9927_v56 }
0x1a95   :  { %7902 = vmatmul.mubr.msk.f32.vlgmr.msra.gmra.mrb[62].mxu0 %vm222_vm1, %v9929_v48 }
0x1b68   :  { %v7903_v57 = vpop.f32.mrb[62].mxu0 }
0x1b69   :  { %v6101_v58 = vadd.f32 %v7903_v57, %v6606_v8  ;;  %v6095_v60 = vpop.f32.mrb[63].mxu0 }
0x1b6a   :  { %v6096_v0 = vadd.f32 %v6606_v8, %v6095_v60 }
0x1b6b   :  { %v6107_v2 = vmul.f32 0.70710677, %v6101_v58  ;;  %v6105_v51 = vmul.f32 0.5, %v6101_v58 }
0x1b6c   :  { %v6106_v3 = vmul.f32 0.70710677, %v6096_v0  ;;  %v6104_v49 = vmul.f32 0.5, %v6096_v0 }
0x1b6d   :  { %v6113_v1 = vand.u32 2147483647, %v6107_v2  ;;  %vm6109_vm0 = vcmp.ge.f32.partialorder %v6107_v2, 0.0 }
0x1b6e   :  { %v6112_v7 = vand.u32 2147483647, %v6106_v3  ;;  %vm6108_vm2 = vcmp.ge.f32.partialorder %v6106_v3, 0.0  ;;  %v6111_v62 = vsel %vm6109_vm0, 1.0, %v8685_v40 }
0x1b6f   :  { %v6115_v23 = vmul.f32 0.3275911, %v6113_v1  ;;  %v6141_v29 = vsub.f32 0.0, %v6113_v1  ;;  %v6110_v43 = vsel %vm6108_vm2, 1.0, %v8685_v40 }
0x1b70   :  { %v6114_v36 = vmul.f32 0.3275911, %v6112_v7  ;;  %v6140_v4 = vsub.f32 0.0, %v6112_v7 }
0x1b71   :  { %v6117_v11 = vadd.f32 1.0, %v6115_v23  ;;  %v6143_v5 = vmul.f32 %v6141_v29, %v6113_v1 }
0x1b72   :  { %v6116_v26 = vadd.f32 1.0, %v6114_v36  ;;  %v6142_v10 = vmul.f32 %v6140_v4, %v6112_v7 }
0x1b73   :  { %8644 = vrcp.f32 %v6117_v11  ;;  %v6146_v15 = vmul.f32 1.442695, %v6143_v5 }
0x1b74   :  { %8646 = vrcp.f32 %v6116_v26  ;;  %v6144_v19 = vmul.f32 1.442695, %v6142_v10 }
0x1b75   :  { %8648 = vpow2.f32 %v6146_v15 }
0x1b76   :  { %8650 = vpow2.f32 %v6144_v19 }
0x1b7d   :  { %v8645_v22 = vpop.eup %8644 }
0x1b7e   :  { %v8647_v6 = vpop.eup %8646  ;;  %v6123_v9 = vmul.f32 1.0614054, %v8645_v22 }
0x1b7f   :  { %v6122_v12 = vmul.f32 1.0614054, %v8647_v6  ;;  %v8649_v37 = vpop.eup %8648 }
0x1b80   :  { %v6125_v13 = vadd.f32 -1.4531521, %v6123_v9  ;;  %v8651_v20 = vpop.eup %8650 }
0x1b81   :  { %v6124_v16 = vadd.f32 -1.4531521, %v6122_v12 }
0x1b82   :  { %v6127_v18 = vmul.f32 %v8645_v22, %v6125_v13  ;;  %v6612_v13 = vld [vmem:[%s10013_s21] ss:$0 sm:$0xff]  ;;  %s8687_s21 = smov [#allocation4]  }
0x1b83   :  { %v6126_v24 = vmul.f32 %v8647_v6, %v6124_v16 }
0x1b84   :  { %v6129_v63 = vadd.f32 1.4214138, %v6127_v18  ;;  %v6613_v18 = vld [vmem:[%s10014_s22] ss:$0 sm:$0xff]  ;;  %s6348_s22 = sshll.u32 %s8687_s21, 4  ;;  %s6349_s22 = int_to_ptr.vmem [resolvable:$true] %s6348_s22 }
0x1b85   :  { %v6128_v61 = vadd.f32 1.4214138, %v6126_v24  ;;  %p8661_p1 = scmp.lt.s32.totalorder %s6349_s22, %s6349_s22 }
0x1b86   :  { %v6131_v25 = vmul.f32 %v8645_v22, %v6129_v63  ;;  %v6614_v63 = vld [vmem:[%s10015_s23] ss:$0 sm:$0xff]  ;;  %s8656_s23 = scalar_lea.vmem %s6349_s22, 32 }
0x1b87   :  { %v6130_v45 = vmul.f32 %v8647_v6, %v6128_v61  ;;  %p8657_p0 = scmp.ne.s32.totalorder %s6349_s22, %s8656_s23  ;;  %p8662_p2 = scmp.lt.s32.totalorder %s8656_s23, %s8656_s23 }
0x1b88   :  { %v6133_v14 = vadd.f32 -0.28449672, %v6131_v25 }
0x1b89   :  { %v6132_v28 = vadd.f32 -0.28449672, %v6130_v45  ;;  %p8663_p3 = por %p8662_p2, %p8661_p1 }
0x1b8a   :  { %v6135_v30 = vmul.f32 %v8645_v22, %v6133_v14 }
0x1b8b   :  { %v6134_v31 = vmul.f32 %v8647_v6, %v6132_v28  ;;  %p8664_p4 = pnand %p8663_p3, %p8657_p0 }
0x1b8c   :  { %v6137_v52 = vadd.f32 0.2548296, %v6135_v30 }
0x1b8d   :  { %v6136_v17 = vadd.f32 0.2548296, %v6134_v31 }
0x1b8e   :  { %v6139_v32 = vmul.f32 %v8645_v22, %v6137_v52  ;;  %v6615_v52 = vld [vmem:[#allocation3] ss:$0 sm:$0xff] }
0x1b8f   :  { %v6138_v59 = vmul.f32 %v8647_v6, %v6136_v17  ;;  %v6328_v17 = vand.u32 127, %v3193_v21 }
0x1b90   :  { %v6149_v38 = vmul.f32 %v8649_v37, %v6139_v32 }
0x1b91   :  { %v6148_v39 = vmul.f32 %v8651_v20, %v6138_v59  ;;  %v6331_v37 = vsub.s32 %v6328_v17, %v9529_v27 }
0x1b92   :  { %v6151_v42 = vsub.f32 1.0, %v6149_v38 }
0x1b93   :  { %v6150_v44 = vsub.f32 1.0, %v6148_v39 }
0x1b94   :  { %v6153_v34 = vmul.f32 %v6151_v42, %v6111_v62 }
0x1b95   :  { %v6152_v46 = vmul.f32 %v6150_v44, %v6110_v43 }
0x1b96   :  { %v6155_v47 = vadd.f32 1.0, %v6153_v34 }
0x1b97   :  { %v6154_v33 = vadd.f32 1.0, %v6152_v46 }
0x1b98   :  { %v6157_v50 = vmul.f32 %v6155_v47, %v6105_v51 }
0x1b99   :  { %v6156_v54 = vmul.f32 %v6154_v33, %v6104_v49 }
0x1b9b   :  { %7916 = vmatprep.mubr.msk.f32.mxu1 %vm222_vm1, %v6156_v54 }
0x1b9c   :  { %7917 = vmatmul.mubr.msk.f32.vlgmr.msra.gmra.mrb[70].mxu1 %vm222_vm1, %v6157_v50 }
0x1c6f   :  { %v7918_v35 = vpop.f32.mrb[70].mxu1 }
0x1c70   :  { %v6249_v55 = vadd.f32 %v7918_v35, %v6609_v41  ;;  %v6243_v53 = vpop.f32.mrb[71].mxu1 }
0x1c71   :  { %v6244_v8 = vadd.f32 %v6609_v41, %v6243_v53 }
0x1c72   :  { %v6253_v57 = vadd.f32 %v6249_v55, %v9929_v48 }
0x1c73   :  { %v6252_v60 = vadd.f32 %v6244_v8, %v9927_v56  ;;  %v8686_v56 = vmov 0  }
0x1c74   :  { %v6259_v58 = vsel %vm222_vm1, %v6253_v57, 0.0  ;;  %8479 = vset.pattern.permute.xlu0 %v8686_v56 }
0x1c75   :  { %6260 = vadd.xlane.f32.xlu1 %v6259_v58  ;;  %v6256_v0 = vsel %vm222_vm1, %v6252_v60, 0.0 }
0x1c76   :  { %6257 = vadd.xlane.f32.xlu0 %v6256_v0 }
0x1d02   :  { %v6261_v2 = vpop.xlane.xlu1 %6260 }
0x1d03   :  { %v6263_v3 = vmul.f32 0.020833334, %v6261_v2  ;;  %v6258_v1 = vpop.xlane.xlu0 %6257 }
0x1d04   :  { %v6262_v7 = vmul.f32 0.020833334, %v6258_v1 }
0x1d05   :  { %v6265_v23 = vsub.f32 %v6253_v57, %v6263_v3 }
0x1d06   :  { %v6264_v36 = vsub.f32 %v6252_v60, %v6262_v7 }
0x1d07   :  { %v6267_v11 = vmul.f32 %v6265_v23, %v6265_v23 }
0x1d08   :  { %v6266_v26 = vmul.f32 %v6264_v36, %v6264_v36 }
0x1d09   :  { %v6271_v29 = vsel %vm222_vm1, %v6267_v11, 0.0 }
0x1d0a   :  { %6272 = vadd.xlane.f32.xlu1 %v6271_v29  ;;  %v6268_v48 = vsel %vm222_vm1, %v6266_v26, 0.0 }
0x1d0b   :  { %6269 = vadd.xlane.f32.xlu0 %v6268_v48 }
0x1d97   :  { %v6273_v4 = vpop.xlane.xlu1 %6272 }
0x1d98   :  { %v6275_v22 = vmul.f32 0.020833334, %v6273_v4  ;;  %v6270_v5 = vpop.xlane.xlu0 %6269 }
0x1d99   :  { %v6274_v6 = vmul.f32 0.020833334, %v6270_v5 }
0x1d9a   :  { %v6277_v9 = vadd.f32 1e-12, %v6275_v22 }
0x1d9b   :  { %v6276_v10 = vadd.f32 1e-12, %v6274_v6 }
0x1d9c   :  { %8652 = vrsqrt.f32 %v6277_v9 }
0x1d9d   :  { %8654 = vrsqrt.f32 %v6276_v10 }
0x1da6   :  { %v8653_v12 = vpop.eup %8652 }
0x1da7   :  { %v8655_v15 = vpop.eup %8654  ;;  %v6281_v16 = vmul.f32 %v8653_v12, %v6265_v23 }
0x1da8   :  { %v6280_v19 = vmul.f32 %v8655_v15, %v6264_v36 }
0x1da9   :  { %v6289_v24 = vmul.f32 %v6612_v13, %v6281_v16 }
0x1daa   :  { %v6288_v61 = vmul.f32 %v6612_v13, %v6280_v19 }
0x1dab   :  { %v6297_v25 = vadd.f32 %v6613_v18, %v6289_v24 }
0x1dac   :  { %v6296_v45 = vadd.f32 %v6613_v18, %v6288_v61 }
0x1dad   :  { %v6306_v14 = vmul.f32 %v6614_v63, %v6297_v25 }
0x1dae   :  { %v6305_v28 = vmul.f32 %v6614_v63, %v6296_v45 }
0x1daf   :  { %v6310_v30 = vsel %vm222_vm1, %v6306_v14, 0.0 }
0x1db0   :  { %6311 = vadd.xlane.f32.xlu1 %v6310_v30  ;;  %v6307_v31 = vsel %vm222_vm1, %v6305_v28, 0.0 }
0x1db1   :  { %6308 = vadd.xlane.f32.xlu0 %v6307_v31 }
0x1dc7   :  { %6320 = vperm.xlu0 %8479, %v6615_v52  }
0x1e3d   :  { %v6312_v59 = vpop.xlane.xlu1 %6311 }
0x1e3e   :  { %v6309_v32 = vpop.xlane.xlu0 %6308 }
0x1e46   :  { %v6321_v20 = vpop.permute.xlu0 %6320 }
0x1e47   :  { %v6323_v38 = vadd.f32 %v6321_v20, %v6309_v32  ;;  %v6324_v39 = vadd.f32 %v6321_v20, %v6312_v59 }
0x1e49   :  { %v6332_v42 = vrot.slane %v6323_v38, %v6331_v37  ;;  %v6336_v40 = vrot.slane %v6324_v39, %v6331_v37 }
0x1e4b   :  { %v6338_v62 = vsel %vm6337_vm3, %v6336_v40, %v6332_v42 }
0x1e4c   :  { %6341 = vst.msk [vmem:[#allocation4] sm:$0x3] %vm6340_vm4, %v6338_v62 }
0x1e4d   :  { %8667 = shalt.err (!%p8664_p4)
}
0x1e4e   :  { %s8668_s1 = scalar_lea.hbm %s10017_s25, 32 }
0x1e4f   :  { %p8669_p5 = scmp.ne.s32.totalorder %s10017_s25, %s8668_s1  ;;  %p8672_p6 = scmp.lt.u32.totalorder %s8668_s1, %s10017_s25 }
0x1e51   :  { %p8674_p7 = pnand %p8672_p6, %p8669_p5 }
0x1e53   :  { %8677 = shalt.err (!%p8674_p7)
}
0x1e54   :  { %6351 = dma.vmem_to_hbm [thread:$0]  %s6349_s22, 32, %s10017_s25, [#allocation5]  }
0x1e55   :  { %8678 = dma.done.wait [#allocation5], 32  }
0x1e56   :  { %8679 = vsyncadd [#allocation5], 4294967264 }
0x1e57   :  { %6355 = vsyncpa [#allocation5], 1 }

</bundles_post_ra>
